<compile_context>
chip_gen: v6e
topology: v6e:2x2x1
jax: 0.10.0
libtpu: 0.0.40
codegen_flags: <defaults>
</compile_context>

<pallas_src>
import functools

import numpy as np
import jax
import jax.numpy as jnp
from jax import lax
from jax.experimental import pallas as pl
from jax.experimental.pallas import tpu as pltpu


LANE = 128          # TPU lane width: batch elements processed per inner chunk
SUBLANE = 8
FEAT_ROWS = 128     # sublane height of the assembled block fed to the in-kernel transpose

_TARGET_LANE_TILE = 16 * 1024          # batch elements per grid step (lane-major path)
_TARGET_ROW_TILE = 1024                # rows per grid step (row-major path, c >= 128)
_VMEM_BLOCK_BUDGET = 10 * 1024 * 1024  # per-step (in+out) block budget; safe on v7x 64MiB VMEM

# Flipped to False (and a channel-first fallback kernel used) iff the in-kernel
# concatenate/transpose fails to lower on this jaxlib — safety net only.
_IN_KERNEL_TRANSPOSE_OK = True


# ---------------------------------------------------------------------------
# helpers
# ---------------------------------------------------------------------------
def _host_freqs(max_freq, n_freq, linspace):
    """Static frequency table, computed host-side (mirrors PeriodicEmbed.__init__)."""
    if linspace:
        f = np.linspace(1.0, float(max_freq) + 1.0, int(n_freq))
    else:
        f = 2.0 ** np.linspace(0.0, float(n_freq) - 1.0, int(n_freq))
    return tuple(float(v) for v in f)


def _cdiv(a, b):
    return -(-a // b)


def _round_up(x, m):
    return ((x + m - 1) // m) * m


def _part_descriptors(freqs):
    """Output feature blocks in torch order: identity, all cos, then all sin."""
    return [("id", 0.0)] + [("cos", f) for f in freqs] + [("sin", f) for f in freqs]


def _pick_tile(m, per_elem_bytes, target, granule):
    """Largest VMEM-budgeted tile; adaptive so padding waste is small and >=2 grid steps
    exist when possible (lets v7x shard the 'parallel' grid axis across its 2 TCs)."""
    cap = max(granule, (_VMEM_BLOCK_BUDGET // max(1, per_elem_bytes)) // granule * granule)
    t = max(granule, min(target, cap))
    n_steps = _cdiv(m, t)
    if n_steps < 2 and m > granule:
        n_steps = 2
    t = _round_up(_cdiv(m, n_steps), granule)
    return max(granule, min(t, cap))


def _vmem_limit(block_bytes):
    # double-buffered blocks + slack; explicit because v5e scoped default is only 16 MiB
    return int(min(64 << 20, max(16 << 20, 2 * block_bytes + (2 << 20))))


# ---------------------------------------------------------------------------
# kernels
# ---------------------------------------------------------------------------
def _lane_kernel(x_ref, o_ref, *, freqs, c, n_chunks):
    """Lane-major compute, row-major output.

    x_ref: (c, tile_n)       channel-first input block (flattened batch on lanes)
    o_ref: (tile_n, out_c)   row-major output block (out_c == full last dim)

    Per 128-lane chunk: compute all 1+2N parts lane-dense, concatenate them along
    sublanes into a (128, 128) block (idle XLU), transpose in-kernel (idle XLU) and
    issue one dense store per part-group.  No wrapper-side transpose of the expanded
    output is needed.
    """
    parts = _part_descriptors(freqs)
    n_parts = len(parts)
    per_group = max(1, min(n_parts, FEAT_ROWS // c))

    def chunk(q, carry):
        off = pl.multiple_of(q * LANE, LANE)
        xc = x_ref[:, pl.ds(off, LANE)].astype(jnp.float32)          # (c, LANE), lane-dense

        for g0 in range(0, n_parts, per_group):
            group = parts[g0:g0 + per_group]
            pieces = []
            for kind, f in group:
                if kind == "id":
                    pieces.append(xc)
                elif kind == "cos":
                    pieces.append(jnp.cos(f * xc))
                else:
                    pieces.append(jnp.sin(f * xc))
            rows = len(group) * c
            if rows < FEAT_ROWS:
                pieces.append(jnp.zeros((FEAT_ROWS - rows, LANE), jnp.float32))
            # channel-major (FEAT_ROWS, LANE) block, assembled in registers (XLU concat)
            feat = jnp.concatenate(pieces, axis=0) if len(pieces) > 1 else pieces[0]
            # in-kernel transpose (idle XLU; canonical 128x128 f32 tile)
            feat_t = jnp.transpose(feat, (1, 0))                      # (LANE, FEAT_ROWS)
            lane0 = g0 * c
            o_ref[pl.ds(off, LANE), lane0:lane0 + rows] = (
                feat_t[:, :rows].astype(o_ref.dtype))
        return carry

    lax.fori_loop(0, n_chunks, chunk, 0)


def _lane_kernel_channel_first(x_ref, o_ref, *, freqs, c, n_chunks):
    """Fallback: channel-first output (wrapper transposes afterwards). Only used if the
    in-kernel concatenate/transpose fails to lower on this jaxlib."""
    n = len(freqs)

    def chunk(q, carry):
        off = pl.multiple_of(q * LANE, LANE)
        xc = x_ref[:, pl.ds(off, LANE)].astype(jnp.float32)
        o_ref[0:c, pl.ds(off, LANE)] = xc.astype(o_ref.dtype)
        for k, f in enumerate(freqs):
            o_ref[(1 + k) * c:(2 + k) * c, pl.ds(off, LANE)] = (
                jnp.cos(f * xc).astype(o_ref.dtype))
        for k, f in enumerate(freqs):
            o_ref[(1 + n + k) * c:(2 + n + k) * c, pl.ds(off, LANE)] = (
                jnp.sin(f * xc).astype(o_ref.dtype))
        return carry

    lax.fori_loop(0, n_chunks, chunk, 0)


def _row_kernel(x_ref, o_ref, *, freqs, c, n_chunks):
    """Row-major path for c >= 128 (feature axis already lane-dense).

    x_ref: (tile_m, c);  o_ref: (tile_m, out_c).  Inner loop over 8-row chunks bounds
    vreg live ranges; part stores are static lane slices at multiples of c.
    """
    n = len(freqs)

    def chunk(q, carry):
        off = pl.multiple_of(q * SUBLANE, SUBLANE)
        xc = x_ref[pl.ds(off, SUBLANE), :].astype(jnp.float32)       # (8, c)
        o_ref[pl.ds(off, SUBLANE), 0:c] = xc.astype(o_ref.dtype)
        for k, f in enumerate(freqs):
            o_ref[pl.ds(off, SUBLANE), (1 + k) * c:(2 + k) * c] = (
                jnp.cos(f * xc).astype(o_ref.dtype))
        for k, f in enumerate(freqs):
            o_ref[pl.ds(off, SUBLANE), (1 + n + k) * c:(2 + n + k) * c] = (
                jnp.sin(f * xc).astype(o_ref.dtype))
        return carry

    lax.fori_loop(0, n_chunks, chunk, 0)


# ---------------------------------------------------------------------------
# wrapper paths
# ---------------------------------------------------------------------------
def _lane_path(x2d, freqs, out_c, dtype):
    m, c = x2d.shape
    itemsize = jnp.dtype(dtype).itemsize
    per_elem = (c + out_c) * itemsize
    tile_n = _pick_tile(m, per_elem, _TARGET_LANE_TILE, LANE)
    grid = _cdiv(m, tile_n)
    n_chunks = tile_n // LANE
    block_bytes = tile_n * per_elem

    xt = x2d.T  # (c, m): cheap (out_c/c smaller than the output); keeps compute lane-dense

    kernel = functools.partial(_lane_kernel, freqs=freqs, c=c, n_chunks=n_chunks)
    return pl.pallas_call(
        kernel,
        out_shape=jax.ShapeDtypeStruct((m, out_c), dtype),
        grid_spec=pltpu.PrefetchScalarGridSpec(
            num_scalar_prefetch=0,
            grid=(grid,),
            in_specs=[pl.BlockSpec((c, tile_n), lambda i: (0, i))],
            out_specs=pl.BlockSpec((tile_n, out_c), lambda i: (i, 0)),
        ),
        compiler_params=pltpu.CompilerParams(
            dimension_semantics=("parallel",),
            vmem_limit_bytes=_vmem_limit(block_bytes),
        ),
    )(xt)


def _lane_path_channel_first(x2d, freqs, out_c, dtype):
    m, c = x2d.shape
    itemsize = jnp.dtype(dtype).itemsize
    per_elem = (c + out_c) * itemsize
    tile_n = _pick_tile(m, per_elem, _TARGET_LANE_TILE, LANE)
    grid = _cdiv(m, tile_n)
    n_chunks = tile_n // LANE
    block_bytes = tile_n * per_elem

    xt = x2d.T
    kernel = functools.partial(_lane_kernel_channel_first, freqs=freqs, c=c,
                               n_chunks=n_chunks)
    out_cf = pl.pallas_call(
        kernel,
        out_shape=jax.ShapeDtypeStruct((out_c, m), dtype),
        grid_spec=pltpu.PrefetchScalarGridSpec(
            num_scalar_prefetch=0,
            grid=(grid,),
            in_specs=[pl.BlockSpec((c, tile_n), lambda i: (0, i))],
            out_specs=pl.BlockSpec((out_c, tile_n), lambda i: (0, i)),
        ),
        compiler_params=pltpu.CompilerParams(
            dimension_semantics=("parallel",),
            vmem_limit_bytes=_vmem_limit(block_bytes),
        ),
    )(xt)
    return out_cf.T  # extra HBM pass — fallback only


def _row_path(x2d, freqs, out_c, dtype):
    m, c = x2d.shape
    itemsize = jnp.dtype(dtype).itemsize
    per_elem = (c + out_c) * itemsize
    tile_m = _pick_tile(m, per_elem, _TARGET_ROW_TILE, SUBLANE)
    grid = _cdiv(m, tile_m)
    n_chunks = tile_m // SUBLANE
    block_bytes = tile_m * per_elem

    kernel = functools.partial(_row_kernel, freqs=freqs, c=c, n_chunks=n_chunks)
    return pl.pallas_call(
        kernel,
        out_shape=jax.ShapeDtypeStruct((m, out_c), dtype),
        grid_spec=pltpu.PrefetchScalarGridSpec(
            num_scalar_prefetch=0,
            grid=(grid,),
            in_specs=[pl.BlockSpec((tile_m, c), lambda i: (i, 0))],
            out_specs=pl.BlockSpec((tile_m, out_c), lambda i: (i, 0)),
        ),
        compiler_params=pltpu.CompilerParams(
            dimension_semantics=("parallel",),
            vmem_limit_bytes=_vmem_limit(block_bytes),
        ),
    )(x2d)


def periodic_embed(x, max_freq, n_freq, linspace=True):
    """JAX wrapper reproducing PeriodicEmbed.forward via Pallas TPU kernels."""
    global _IN_KERNEL_TRANSPOSE_OK
    freqs = _host_freqs(max_freq, n_freq, linspace)

    orig_shape = x.shape
    c = int(orig_shape[-1])
    m = 1
    for d in orig_shape[:-1]:
        m *= int(d)
    out_c = c * (1 + 2 * int(n_freq))
    dtype = x.dtype

    x2d = x.reshape(m, c)

    if c < 128:
        # small / non-lane-dense feature dim -> lane-major kernel (in-kernel transpose)
        if _IN_KERNEL_TRANSPOSE_OK:
            try:
                out2d = _lane_path(x2d, freqs, out_c, dtype)
            except Exception:  # lowering failed on this jaxlib -> channel-first fallback
                _IN_KERNEL_TRANSPOSE_OK = False
                out2d = _lane_path_channel_first(x2d, freqs, out_c, dtype)
        else:
            out2d = _lane_path_channel_first(x2d, freqs, out_c, dtype)
    else:
        # feature axis already lane-dense -> row-major kernel
        out2d = _row_path(x2d, freqs, out_c, dtype)

    return out2d.reshape(*orig_shape[:-1], out_c)


# ---------------------------------------------------------------------------
# pure-JAX reference (mirrors the PyTorch forward exactly)
# ---------------------------------------------------------------------------
def periodic_embed_ref(x, max_freq, n_freq, linspace=True):
    freqs = _host_freqs(max_freq, n_freq, linspace)
    xf = x.astype(jnp.float32)
    outputs = [x]
    for fn in (jnp.cos, jnp.sin):
        for f in freqs:
            outputs.append(fn(f * xf).astype(x.dtype))
    return jnp.concatenate(outputs, axis=-1)


if __name__ == "__main__":
    key = jax.random.PRNGKey(0)
    k1, k2, k3 = jax.random.split(key, 3)

    # Case 1: typical 3-D coordinates -> lane-major path (c=3, N=10, out_c=63).
    x1 = jax.random.normal(k1, (2, 16, 16, 3), dtype=jnp.float32)
    o1 = jax.block_until_ready(periodic_embed(x1, 8, 10, linspace=True))
    r1 = periodic_embed_ref(x1, 8, 10, linspace=True)
    assert o1.shape == (2, 16, 16, 63), o1.shape
    assert jnp.allclose(o1, r1, atol=1e-5, rtol=1e-5), "small-C mismatch"

    # Case 2: ragged flattened batch (m=255) -> exercises the partial last grid block
    # (no wrapper-side padding or slicing of the expanded output).
    x2 = jax.random.normal(k2, (5, 51, 3), dtype=jnp.float32)
    o2 = jax.block_until_ready(periodic_embed(x2, 4, 6, linspace=True))
    r2 = periodic_embed_ref(x2, 4, 6, linspace=True)
    assert o2.shape == (5, 51, 39), o2.shape
    assert jnp.allclose(o2, r2, atol=1e-5, rtol=1e-5), "ragged-batch mismatch"

    # Case 3: wide, lane-dense feature dim -> row-major path.
    x3 = jax.random.normal(k3, (4, 8, 128), dtype=jnp.float32)
    o3 = jax.block_until_ready(periodic_embed(x3, 4, 2, linspace=True))
    r3 = periodic_embed_ref(x3, 4, 2, linspace=True)
    assert o3.shape == (4, 8, 640), o3.shape
    assert jnp.allclose(o3, r3, atol=1e-5, rtol=1e-5), "wide-C mismatch"

    print("KERNEL_OK")
</pallas_src>

<mosaic_0001>
module attributes {stable_mosaic.version = 11 : i64} {
  func.func @_lane_kernel(%arg0: i32, %arg1: memref<3x256xf32, #tpu.memory_space<vmem>>, %arg2: memref<256x63xf32, #tpu.memory_space<vmem>>) attributes {dimension_semantics = [#tpu.dimension_semantics<parallel>], iteration_bounds = array<i64: 2>, scalar_prefetch = 0 : i64, scratch_operands = 0 : i64, tpu.core_type = #tpu.core_type<tc>, window_params = [{transform_indices = @transform_0, window_bounds = array<i64: 3, 256>}, {transform_indices = @transform_1, window_bounds = array<i64: 256, 63>}]} {
    %c0_i32 = arith.constant 0 : i32
    %c2_i32 = arith.constant 2 : i32
    %0 = arith.addi %c0_i32, %c2_i32 : i32
    %c1_i32 = arith.constant 1 : i32
    scf.for %arg3 = %c0_i32 to %0 step %c1_i32  : i32 {
      %c128_i32 = arith.constant 128 : i32
      %1 = arith.muli %arg3, %c128_i32 : i32
      %2 = tpu.assume_multiple %1, 128 : i32
      %c0 = arith.constant 0 : index
      %3 = arith.index_cast %2 : i32 to index
      %4 = vector.load %arg1[%c0, %3] : memref<3x256xf32, #tpu.memory_space<vmem>>, vector<3x128xf32>
      %cst = arith.constant 1.000000e+00 : f32
      %5 = vector.broadcast %cst : f32 to vector<3x128xf32>
      %6 = arith.mulf %5, %4 : vector<3x128xf32>
      %7 = math.cos %6 : vector<3x128xf32>
      %cst_1 = arith.constant 1.88888884 : f32
      %8 = vector.broadcast %cst_1 : f32 to vector<3x128xf32>
      %9 = arith.mulf %8, %4 : vector<3x128xf32>
      %10 = math.cos %9 : vector<3x128xf32>
      %cst_2 = arith.constant 2.77777767 : f32
      %11 = vector.broadcast %cst_2 : f32 to vector<3x128xf32>
      %12 = arith.mulf %11, %4 : vector<3x128xf32>
      %13 = math.cos %12 : vector<3x128xf32>
      %cst_3 = arith.constant 3.66666675 : f32
      %14 = vector.broadcast %cst_3 : f32 to vector<3x128xf32>
      %15 = arith.mulf %14, %4 : vector<3x128xf32>
      %16 = math.cos %15 : vector<3x128xf32>
      %cst_4 = arith.constant 4.55555534 : f32
      %17 = vector.broadcast %cst_4 : f32 to vector<3x128xf32>
      %18 = arith.mulf %17, %4 : vector<3x128xf32>
      %19 = math.cos %18 : vector<3x128xf32>
      %cst_5 = arith.constant 5.44444466 : f32
      %20 = vector.broadcast %cst_5 : f32 to vector<3x128xf32>
      %21 = arith.mulf %20, %4 : vector<3x128xf32>
      %22 = math.cos %21 : vector<3x128xf32>
      %cst_6 = arith.constant 6.33333349 : f32
      %23 = vector.broadcast %cst_6 : f32 to vector<3x128xf32>
      %24 = arith.mulf %23, %4 : vector<3x128xf32>
      %25 = math.cos %24 : vector<3x128xf32>
      %cst_7 = arith.constant 7.22222232 : f32
      %26 = vector.broadcast %cst_7 : f32 to vector<3x128xf32>
      %27 = arith.mulf %26, %4 : vector<3x128xf32>
      %28 = math.cos %27 : vector<3x128xf32>
      %cst_8 = arith.constant 8.11111069 : f32
      %29 = vector.broadcast %cst_8 : f32 to vector<3x128xf32>
      %30 = arith.mulf %29, %4 : vector<3x128xf32>
      %31 = math.cos %30 : vector<3x128xf32>
      %cst_9 = arith.constant 9.000000e+00 : f32
      %32 = vector.broadcast %cst_9 : f32 to vector<3x128xf32>
      %33 = arith.mulf %32, %4 : vector<3x128xf32>
      %34 = math.cos %33 : vector<3x128xf32>
      %cst_10 = arith.constant 1.000000e+00 : f32
      %35 = vector.broadcast %cst_10 : f32 to vector<3x128xf32>
      %36 = arith.mulf %35, %4 : vector<3x128xf32>
      %37 = math.sin %36 : vector<3x128xf32>
      %cst_11 = arith.constant 1.88888884 : f32
      %38 = vector.broadcast %cst_11 : f32 to vector<3x128xf32>
      %39 = arith.mulf %38, %4 : vector<3x128xf32>
      %40 = math.sin %39 : vector<3x128xf32>
      %cst_12 = arith.constant 2.77777767 : f32
      %41 = vector.broadcast %cst_12 : f32 to vector<3x128xf32>
      %42 = arith.mulf %41, %4 : vector<3x128xf32>
      %43 = math.sin %42 : vector<3x128xf32>
      %cst_13 = arith.constant 3.66666675 : f32
      %44 = vector.broadcast %cst_13 : f32 to vector<3x128xf32>
      %45 = arith.mulf %44, %4 : vector<3x128xf32>
      %46 = math.sin %45 : vector<3x128xf32>
      %cst_14 = arith.constant 4.55555534 : f32
      %47 = vector.broadcast %cst_14 : f32 to vector<3x128xf32>
      %48 = arith.mulf %47, %4 : vector<3x128xf32>
      %49 = math.sin %48 : vector<3x128xf32>
      %cst_15 = arith.constant 5.44444466 : f32
      %50 = vector.broadcast %cst_15 : f32 to vector<3x128xf32>
      %51 = arith.mulf %50, %4 : vector<3x128xf32>
      %52 = math.sin %51 : vector<3x128xf32>
      %cst_16 = arith.constant 6.33333349 : f32
      %53 = vector.broadcast %cst_16 : f32 to vector<3x128xf32>
      %54 = arith.mulf %53, %4 : vector<3x128xf32>
      %55 = math.sin %54 : vector<3x128xf32>
      %cst_17 = arith.constant 7.22222232 : f32
      %56 = vector.broadcast %cst_17 : f32 to vector<3x128xf32>
      %57 = arith.mulf %56, %4 : vector<3x128xf32>
      %58 = math.sin %57 : vector<3x128xf32>
      %cst_18 = arith.constant 8.11111069 : f32
      %59 = vector.broadcast %cst_18 : f32 to vector<3x128xf32>
      %60 = arith.mulf %59, %4 : vector<3x128xf32>
      %61 = math.sin %60 : vector<3x128xf32>
      %cst_19 = arith.constant 9.000000e+00 : f32
      %62 = vector.broadcast %cst_19 : f32 to vector<3x128xf32>
      %63 = arith.mulf %62, %4 : vector<3x128xf32>
      %64 = math.sin %63 : vector<3x128xf32>
      %cst_20 = arith.constant 0.000000e+00 : f32
      %65 = vector.broadcast %cst_20 : f32 to vector<65x128xf32>
      %66 = tpu.concatenate %4, %7, %10, %13, %16, %19, %22, %25, %28, %31, %34, %37, %40, %43, %46, %49 in 0 : vector<3x128xf32>, vector<3x128xf32>, vector<3x128xf32>, vector<3x128xf32>, vector<3x128xf32>, vector<3x128xf32>, vector<3x128xf32>, vector<3x128xf32>, vector<3x128xf32>, vector<3x128xf32>, vector<3x128xf32>, vector<3x128xf32>, vector<3x128xf32>, vector<3x128xf32>, vector<3x128xf32>, vector<3x128xf32> -> vector<48x128xf32>
      %67 = tpu.concatenate %52, %55, %58, %61, %64, %65 in 0 : vector<3x128xf32>, vector<3x128xf32>, vector<3x128xf32>, vector<3x128xf32>, vector<3x128xf32>, vector<65x128xf32> -> vector<80x128xf32>
      %68 = tpu.concatenate %66, %67 in 0 : vector<48x128xf32>, vector<80x128xf32> -> vector<128x128xf32>
      %69 = tpu.transpose %68, [1, 0] : vector<128x128xf32> -> vector<128x128xf32>
      %70 = vector.extract_strided_slice %69 {offsets = [0, 0], sizes = [128, 63], strides = [1, 1]} : vector<128x128xf32> to vector<128x63xf32>
      %71 = arith.index_cast %2 : i32 to index
      %c0_21 = arith.constant 0 : index
      %72 = vector.load %arg2[%71, %c0_21] : memref<256x63xf32, #tpu.memory_space<vmem>>, vector<128x63xf32>
      tpu.vector_store %arg2[%71, %c0_21], %70 {strides = array<i32>} : memref<256x63xf32, #tpu.memory_space<vmem>>, vector<128x63xf32>,
    }
    %c2_i32_0 = arith.constant 2 : i32
    return
  }
  func.func @transform_0(%arg0: i32) -> (i32, i32) {
    %c0_i32 = arith.constant 0 : i32
    %c0_i32_0 = arith.constant 0 : i32
    return %c0_i32, %arg0 : i32, i32
  }
  func.func @transform_1(%arg0: i32) -> (i32, i32) {
    %c0_i32 = arith.constant 0 : i32
    %c0_i32_0 = arith.constant 0 : i32
    return %arg0, %c0_i32 : i32, i32
  }
}

module attributes {stable_mosaic.version = 11 : i64} {
  func.func @_lane_kernel_channel_first(%arg0: i32, %arg1: memref<3x256xf32, #tpu.memory_space<vmem>>, %arg2: memref<63x256xf32, #tpu.memory_space<vmem>>) attributes {dimension_semantics = [#tpu.dimension_semantics<parallel>], iteration_bounds = array<i64: 2>, scalar_prefetch = 0 : i64, scratch_operands = 0 : i64, tpu.core_type = #tpu.core_type<tc>, window_params = [{transform_indices = @transform_0, window_bounds = array<i64: 3, 256>}, {transform_indices = @transform_1, window_bounds = array<i64: 63, 256>}]} {
    %c0_i32 = arith.constant 0 : i32
    %c2_i32 = arith.constant 2 : i32
    %0 = arith.addi %c0_i32, %c2_i32 : i32
    %c1_i32 = arith.constant 1 : i32
    scf.for %arg3 = %c0_i32 to %0 step %c1_i32  : i32 {
      %c128_i32 = arith.constant 128 : i32
      %1 = arith.muli %arg3, %c128_i32 : i32
      %2 = tpu.assume_multiple %1, 128 : i32
      %c0 = arith.constant 0 : index
      %3 = arith.index_cast %2 : i32 to index
      %4 = vector.load %arg1[%c0, %3] : memref<3x256xf32, #tpu.memory_space<vmem>>, vector<3x128xf32>
      %c0_1 = arith.constant 0 : index
      %5 = arith.index_cast %2 : i32 to index
      %6 = vector.load %arg2[%c0_1, %5] : memref<63x256xf32, #tpu.memory_space<vmem>>, vector<3x128xf32>
      tpu.vector_store %arg2[%c0_1, %5], %4 {strides = array<i32>} : memref<63x256xf32, #tpu.memory_space<vmem>>, vector<3x128xf32>,
      %cst = arith.constant 1.000000e+00 : f32
      %7 = vector.broadcast %cst : f32 to vector<3x128xf32>
      %8 = arith.mulf %7, %4 : vector<3x128xf32>
      %9 = math.cos %8 : vector<3x128xf32>
      %c3 = arith.constant 3 : index
      %10 = arith.index_cast %2 : i32 to index
      %11 = vector.load %arg2[%c3, %10] : memref<63x256xf32, #tpu.memory_space<vmem>>, vector<3x128xf32>
      tpu.vector_store %arg2[%c3, %10], %9 {strides = array<i32>} : memref<63x256xf32, #tpu.memory_space<vmem>>, vector<3x128xf32>,
      %cst_2 = arith.constant 1.88888884 : f32
      %12 = vector.broadcast %cst_2 : f32 to vector<3x128xf32>
      %13 = arith.mulf %12, %4 : vector<3x128xf32>
      %14 = math.cos %13 : vector<3x128xf32>
      %c6 = arith.constant 6 : index
      %15 = arith.index_cast %2 : i32 to index
      %16 = vector.load %arg2[%c6, %15] : memref<63x256xf32, #tpu.memory_space<vmem>>, vector<3x128xf32>
      tpu.vector_store %arg2[%c6, %15], %14 {strides = array<i32>} : memref<63x256xf32, #tpu.memory_space<vmem>>, vector<3x128xf32>,
      %cst_3 = arith.constant 2.77777767 : f32
      %17 = vector.broadcast %cst_3 : f32 to vector<3x128xf32>
      %18 = arith.mulf %17, %4 : vector<3x128xf32>
      %19 = math.cos %18 : vector<3x128xf32>
      %c9 = arith.constant 9 : index
      %20 = arith.index_cast %2 : i32 to index
      %21 = vector.load %arg2[%c9, %20] : memref<63x256xf32, #tpu.memory_space<vmem>>, vector<3x128xf32>
      tpu.vector_store %arg2[%c9, %20], %19 {strides = array<i32>} : memref<63x256xf32, #tpu.memory_space<vmem>>, vector<3x128xf32>,
      %cst_4 = arith.constant 3.66666675 : f32
      %22 = vector.broadcast %cst_4 : f32 to vector<3x128xf32>
      %23 = arith.mulf %22, %4 : vector<3x128xf32>
      %24 = math.cos %23 : vector<3x128xf32>
      %c12 = arith.constant 12 : index
      %25 = arith.index_cast %2 : i32 to index
      %26 = vector.load %arg2[%c12, %25] : memref<63x256xf32, #tpu.memory_space<vmem>>, vector<3x128xf32>
      tpu.vector_store %arg2[%c12, %25], %24 {strides = array<i32>} : memref<63x256xf32, #tpu.memory_space<vmem>>, vector<3x128xf32>,
      %cst_5 = arith.constant 4.55555534 : f32
      %27 = vector.broadcast %cst_5 : f32 to vector<3x128xf32>
      %28 = arith.mulf %27, %4 : vector<3x128xf32>
      %29 = math.cos %28 : vector<3x128xf32>
      %c15 = arith.constant 15 : index
      %30 = arith.index_cast %2 : i32 to index
      %31 = vector.load %arg2[%c15, %30] : memref<63x256xf32, #tpu.memory_space<vmem>>, vector<3x128xf32>
      tpu.vector_store %arg2[%c15, %30], %29 {strides = array<i32>} : memref<63x256xf32, #tpu.memory_space<vmem>>, vector<3x128xf32>,
      %cst_6 = arith.constant 5.44444466 : f32
      %32 = vector.broadcast %cst_6 : f32 to vector<3x128xf32>
      %33 = arith.mulf %32, %4 : vector<3x128xf32>
      %34 = math.cos %33 : vector<3x128xf32>
      %c18 = arith.constant 18 : index
      %35 = arith.index_cast %2 : i32 to index
      %36 = vector.load %arg2[%c18, %35] : memref<63x256xf32, #tpu.memory_space<vmem>>, vector<3x128xf32>
      tpu.vector_store %arg2[%c18, %35], %34 {strides = array<i32>} : memref<63x256xf32, #tpu.memory_space<vmem>>, vector<3x128xf32>,
      %cst_7 = arith.constant 6.33333349 : f32
      %37 = vector.broadcast %cst_7 : f32 to vector<3x128xf32>
      %38 = arith.mulf %37, %4 : vector<3x128xf32>
      %39 = math.cos %38 : vector<3x128xf32>
      %c21 = arith.constant 21 : index
      %40 = arith.index_cast %2 : i32 to index
      %41 = vector.load %arg2[%c21, %40] : memref<63x256xf32, #tpu.memory_space<vmem>>, vector<3x128xf32>
      tpu.vector_store %arg2[%c21, %40], %39 {strides = array<i32>} : memref<63x256xf32, #tpu.memory_space<vmem>>, vector<3x128xf32>,
      %cst_8 = arith.constant 7.22222232 : f32
      %42 = vector.broadcast %cst_8 : f32 to vector<3x128xf32>
      %43 = arith.mulf %42, %4 : vector<3x128xf32>
      %44 = math.cos %43 : vector<3x128xf32>
      %c24 = arith.constant 24 : index
      %45 = arith.index_cast %2 : i32 to index
      %46 = vector.load %arg2[%c24, %45] : memref<63x256xf32, #tpu.memory_space<vmem>>, vector<3x128xf32>
      tpu.vector_store %arg2[%c24, %45], %44 {strides = array<i32>} : memref<63x256xf32, #tpu.memory_space<vmem>>, vector<3x128xf32>,
      %cst_9 = arith.constant 8.11111069 : f32
      %47 = vector.broadcast %cst_9 : f32 to vector<3x128xf32>
      %48 = arith.mulf %47, %4 : vector<3x128xf32>
      %49 = math.cos %48 : vector<3x128xf32>
      %c27 = arith.constant 27 : index
      %50 = arith.index_cast %2 : i32 to index
      %51 = vector.load %arg2[%c27, %50] : memref<63x256xf32, #tpu.memory_space<vmem>>, vector<3x128xf32>
      tpu.vector_store %arg2[%c27, %50], %49 {strides = array<i32>} : memref<63x256xf32, #tpu.memory_space<vmem>>, vector<3x128xf32>,
      %cst_10 = arith.constant 9.000000e+00 : f32
      %52 = vector.broadcast %cst_10 : f32 to vector<3x128xf32>
      %53 = arith.mulf %52, %4 : vector<3x128xf32>
      %54 = math.cos %53 : vector<3x128xf32>
      %c30 = arith.constant 30 : index
      %55 = arith.index_cast %2 : i32 to index
      %56 = vector.load %arg2[%c30, %55] : memref<63x256xf32, #tpu.memory_space<vmem>>, vector<3x128xf32>
      tpu.vector_store %arg2[%c30, %55], %54 {strides = array<i32>} : memref<63x256xf32, #tpu.memory_space<vmem>>, vector<3x128xf32>,
      %cst_11 = arith.constant 1.000000e+00 : f32
      %57 = vector.broadcast %cst_11 : f32 to vector<3x128xf32>
      %58 = arith.mulf %57, %4 : vector<3x128xf32>
      %59 = math.sin %58 : vector<3x128xf32>
      %c33 = arith.constant 33 : index
      %60 = arith.index_cast %2 : i32 to index
      %61 = vector.load %arg2[%c33, %60] : memref<63x256xf32, #tpu.memory_space<vmem>>, vector<3x128xf32>
      tpu.vector_store %arg2[%c33, %60], %59 {strides = array<i32>} : memref<63x256xf32, #tpu.memory_space<vmem>>, vector<3x128xf32>,
      %cst_12 = arith.constant 1.88888884 : f32
      %62 = vector.broadcast %cst_12 : f32 to vector<3x128xf32>
      %63 = arith.mulf %62, %4 : vector<3x128xf32>
      %64 = math.sin %63 : vector<3x128xf32>
      %c36 = arith.constant 36 : index
      %65 = arith.index_cast %2 : i32 to index
      %66 = vector.load %arg2[%c36, %65] : memref<63x256xf32, #tpu.memory_space<vmem>>, vector<3x128xf32>
      tpu.vector_store %arg2[%c36, %65], %64 {strides = array<i32>} : memref<63x256xf32, #tpu.memory_space<vmem>>, vector<3x128xf32>,
      %cst_13 = arith.constant 2.77777767 : f32
      %67 = vector.broadcast %cst_13 : f32 to vector<3x128xf32>
      %68 = arith.mulf %67, %4 : vector<3x128xf32>
      %69 = math.sin %68 : vector<3x128xf32>
      %c39 = arith.constant 39 : index
      %70 = arith.index_cast %2 : i32 to index
      %71 = vector.load %arg2[%c39, %70] : memref<63x256xf32, #tpu.memory_space<vmem>>, vector<3x128xf32>
      tpu.vector_store %arg2[%c39, %70], %69 {strides = array<i32>} : memref<63x256xf32, #tpu.memory_space<vmem>>, vector<3x128xf32>,
      %cst_14 = arith.constant 3.66666675 : f32
      %72 = vector.broadcast %cst_14 : f32 to vector<3x128xf32>
      %73 = arith.mulf %72, %4 : vector<3x128xf32>
      %74 = math.sin %73 : vector<3x128xf32>
      %c42 = arith.constant 42 : index
      %75 = arith.index_cast %2 : i32 to index
      %76 = vector.load %arg2[%c42, %75] : memref<63x256xf32, #tpu.memory_space<vmem>>, vector<3x128xf32>
      tpu.vector_store %arg2[%c42, %75], %74 {strides = array<i32>} : memref<63x256xf32, #tpu.memory_space<vmem>>, vector<3x128xf32>,
      %cst_15 = arith.constant 4.55555534 : f32
      %77 = vector.broadcast %cst_15 : f32 to vector<3x128xf32>
      %78 = arith.mulf %77, %4 : vector<3x128xf32>
      %79 = math.sin %78 : vector<3x128xf32>
      %c45 = arith.constant 45 : index
      %80 = arith.index_cast %2 : i32 to index
      %81 = vector.load %arg2[%c45, %80] : memref<63x256xf32, #tpu.memory_space<vmem>>, vector<3x128xf32>
      tpu.vector_store %arg2[%c45, %80], %79 {strides = array<i32>} : memref<63x256xf32, #tpu.memory_space<vmem>>, vector<3x128xf32>,
      %cst_16 = arith.constant 5.44444466 : f32
      %82 = vector.broadcast %cst_16 : f32 to vector<3x128xf32>
      %83 = arith.mulf %82, %4 : vector<3x128xf32>
      %84 = math.sin %83 : vector<3x128xf32>
      %c48 = arith.constant 48 : index
      %85 = arith.index_cast %2 : i32 to index
      %86 = vector.load %arg2[%c48, %85] : memref<63x256xf32, #tpu.memory_space<vmem>>, vector<3x128xf32>
      tpu.vector_store %arg2[%c48, %85], %84 {strides = array<i32>} : memref<63x256xf32, #tpu.memory_space<vmem>>, vector<3x128xf32>,
      %cst_17 = arith.constant 6.33333349 : f32
      %87 = vector.broadcast %cst_17 : f32 to vector<3x128xf32>
      %88 = arith.mulf %87, %4 : vector<3x128xf32>
      %89 = math.sin %88 : vector<3x128xf32>
      %c51 = arith.constant 51 : index
      %90 = arith.index_cast %2 : i32 to index
      %91 = vector.load %arg2[%c51, %90] : memref<63x256xf32, #tpu.memory_space<vmem>>, vector<3x128xf32>
      tpu.vector_store %arg2[%c51, %90], %89 {strides = array<i32>} : memref<63x256xf32, #tpu.memory_space<vmem>>, vector<3x128xf32>,
      %cst_18 = arith.constant 7.22222232 : f32
      %92 = vector.broadcast %cst_18 : f32 to vector<3x128xf32>
      %93 = arith.mulf %92, %4 : vector<3x128xf32>
      %94 = math.sin %93 : vector<3x128xf32>
      %c54 = arith.constant 54 : index
      %95 = arith.index_cast %2 : i32 to index
      %96 = vector.load %arg2[%c54, %95] : memref<63x256xf32, #tpu.memory_space<vmem>>, vector<3x128xf32>
      tpu.vector_store %arg2[%c54, %95], %94 {strides = array<i32>} : memref<63x256xf32, #tpu.memory_space<vmem>>, vector<3x128xf32>,
      %cst_19 = arith.constant 8.11111069 : f32
      %97 = vector.broadcast %cst_19 : f32 to vector<3x128xf32>
      %98 = arith.mulf %97, %4 : vector<3x128xf32>
      %99 = math.sin %98 : vector<3x128xf32>
      %c57 = arith.constant 57 : index
      %100 = arith.index_cast %2 : i32 to index
      %101 = vector.load %arg2[%c57, %100] : memref<63x256xf32, #tpu.memory_space<vmem>>, vector<3x128xf32>
      tpu.vector_store %arg2[%c57, %100], %99 {strides = array<i32>} : memref<63x256xf32, #tpu.memory_space<vmem>>, vector<3x128xf32>,
      %cst_20 = arith.constant 9.000000e+00 : f32
      %102 = vector.broadcast %cst_20 : f32 to vector<3x128xf32>
      %103 = arith.mulf %102, %4 : vector<3x128xf32>
      %104 = math.sin %103 : vector<3x128xf32>
      %c60 = arith.constant 60 : index
      %105 = arith.index_cast %2 : i32 to index
      %106 = vector.load %arg2[%c60, %105] : memref<63x256xf32, #tpu.memory_space<vmem>>, vector<3x128xf32>
      tpu.vector_store %arg2[%c60, %105], %104 {strides = array<i32>} : memref<63x256xf32, #tpu.memory_space<vmem>>, vector<3x128xf32>,
    }
    %c2_i32_0 = arith.constant 2 : i32
    return
  }
  func.func @transform_0(%arg0: i32) -> (i32, i32) {
    %c0_i32 = arith.constant 0 : i32
    %c0_i32_0 = arith.constant 0 : i32
    return %c0_i32, %arg0 : i32, i32
  }
  func.func @transform_1(%arg0: i32) -> (i32, i32) {
    %c0_i32 = arith.constant 0 : i32
    %c0_i32_0 = arith.constant 0 : i32
    return %c0_i32, %arg0 : i32, i32
  }
}

</mosaic_0001>

<bundles_post_ra>
// kernel: tpu_custom_call.1
= control target key start
LH: loop header
LB: loop body
LE: loop exit
PB: predicated region body
PF: predicated region fallthrough
CT: control target
= control target key end

     0   :  { %6 = vsyncpa [#allocation3], 0  ;;  %s3929_s0 = inlined_call_operand.hbm [shape: f32[3,512], index: 0, kind: input, shape index: {}]   ;;  %s3930_s1 = inlined_call_operand.vmem [shape: f32[512,63], index: 1, kind: output, shape index: {}]  }
   0x1   :  { %8 = vsyncpa [#allocation3 + $0x1], 0  ;;  %s2754_s6 = smov 0   ;;  %s2756_s7 = smov 0  }
   0x2   :  { %s2758_s8 = smov 0   ;;  %s2760_s9 = smov 0  }
   0x3 LB: > { %s2434_s10 = sadd.s32 4294967295, %s2731_s9   ;;  %s2774_s11 = sadd.s32 1, %s2731_s9   ;;  %s2731_s9 = sphi %s2760_s9, %s3983_s9   ;;  %s2727_s8 = sphi %s2758_s8, %s3982_s8   ;;  %s2723_s7 = sphi %s2756_s7, %s3981_s7   ;;  %s2719_s6 = sphi %s2754_s6, %s3980_s6  }
   0x4   : > { %s18_s12 = ssub.s32 %s2731_s9, %s2774_s11  ;;  %s21_s13 = sadd.s32 1, %s2727_s8 }
   0x5   : > { %p19_p0 = scmp.eq.s32.totalorder %s18_s12, 0  ;;  %p28_p1 = scmp.ne.s32.totalorder %s2727_s8, %s2723_s7 }
   0x6   : > { %p29_p2 = scmp.eq.s32.totalorder %s2731_s9, 0  ;;  %p34_p3 = scmp.ne.s32.totalorder %s2723_s7, %s2719_s6 }
   0x7   : > { %s2784_s14 = scalar_select %p19_p0, %s2727_s8, %s21_s13  }
   0x8   : > { %p30_p4 = por %p29_p2, %p28_p1  ;;  %p35_p5 = scmp.eq.s32.totalorder %s2434_s10, 0 }
   0x9   : > { %p2576_p6 = scmp.lt.s32.totalorder %s2731_s9, 2  ;;  %s84_s16 = sand.u32 1, %s2727_s8  }
   0xa   : > { %p2789_p7 = por %p35_p5, %p34_p3  ;;  %s2438_s17 = sshll.u32 %s84_s16, 3 }
   0xb   : > { %s2529_s18 = sshll.u32 %s2731_s9, 7  ;;  %s88_s22 = scalar_lea.vmem [#allocation2], %s2438_s17 }
   0xc   : > { %s3942_s15 = scalar_select %p2789_p7, 1, 0 }
   0xd   : > { %s2798_s21 = scalar_lea.hbm %s3929_s0, %s2529_s18  ;;  %s96_s23 = sshll.u32 %s88_s22, 4  ;;  %s2800_s23 = int_to_ptr.vmem [resolvable:$true] %s96_s23 }
   0xe   : > { %p2802_p8 = pnand %p2576_p6, %p30_p4  ;;  %s85_s25 = scalar_lea.sflag [#allocation3], %s84_s16 }
   0xf   : > { %s2665_s26 = scalar_lea.hbm %s2798_s21, 128  ;;  %s2670_s29 = scalar_lea.hbm %s3929_s0, 256 }
  0x10   : > { %p2666_p11 = scmp.ne.s32.totalorder %s2798_s21, %s2665_s26  ;;  %p2667_p12 = pneg %p2802_p8 }
  0x11   : > { %p2671_p1 = scmp.lt.s32.totalorder %s2798_s21, %s3929_s0  ;;  %p2672_p2 = scmp.lt.s32.totalorder %s2670_s29, %s2665_s26 }
  0x12   : > { %p2668_p13 = pnand %p2667_p12, %p2666_p11 }
  0x13   : > { %p2673_p3 = por %p2672_p2, %p2671_p1 }
  0x14   : > { %p2669_p0 = pneg %p2668_p13 }
  0x16   : > { %p2674_p4 = pnand %p2673_p3, %p2669_p0 }
  0x18   : > { %2677 = shalt.err (!%p2674_p4)
}
  0x19   : > { %s2678_s3 = scalar_lea.vmem %s2800_s23, 128  ;;  %s2737_s4 = smov [#allocation2]  }
  0x1a   : > { %p2679_p5 = scmp.ne.s32.totalorder %s2800_s23, %s2678_s3  ;;  %s2683_s5 = sshll.u32 %s2737_s4, 4  ;;  %s2684_s5 = int_to_ptr.vmem [resolvable:$false] %s2683_s5 }
  0x1b   : > { %s2685_s6 = scalar_lea.vmem %s2684_s5, 256  ;;  %p2686_p13 = scmp.lt.s32.totalorder %s2800_s23, %s2684_s5 }
  0x1c   : > { %p2681_p6 = pnand %p2679_p5, %p2667_p12  ;;  %p2687_p9 = scmp.lt.s32.totalorder %s2685_s6, %s2678_s3 }
  0x1e   : > { %p2682_p11 = pneg %p2681_p6  ;;  %p2688_p10 = por %p2687_p9, %p2686_p13 }
  0x20   : > { %p2689_p7 = pnand %p2688_p10, %p2682_p11 }
  0x22   : > { %2692 = shalt.err (!%p2689_p7)
}
  0x23   : > { %2575 = dma.hbm_to_vmem [thread:$0]  (!%p2802_p8), %s2798_s21, 128, %s2800_s23, %s85_s25  }
  0x24   : > { %p3944_p0 = scmp.lt.s32.totalorder %s2731_s9, 3  ;;  %p3945_p1 = scmp.ge.s32.totalorder %s2731_s9, 1 }
  0x26   : > { %p102_p12 = pnand %p3945_p1, %p3944_p0 }
  0x27   : > { %s107_s12 = sand.u32 (!%p102_p12), 1, %s2723_s7   ;;  %p3946_p7 = scmp.ne.s32.totalorder (!%p102_p12), %s3942_s15, 0 }
  0x28   : > { %105 = sbr.rel (%p102_p12) target bundleno = 535 (0x217), region = 24  ;;  %s2831_s13 = sshll.u32 (!%p102_p12), %s107_s12, 3 }
  0x29   : > { %s108_s16 = scalar_lea.sflag (!%p102_p12), [#allocation3], %s107_s12  ;;  %s111_s17 = scalar_lea.vmem (!%p102_p12), [#allocation2], %s2831_s13 }
  0x2d   : > { %2714 = dma.done.wait (%p3946_p7), %s108_s16, 128  }
  0x2e   : > { %2716 = vsyncadd (%p3946_p7), %s108_s16, 4294967168  ;;  %s2443_s18 = sshll.u32 %s2434_s10, 5  ;;  %s2845_s23 = smov 0  }
  0x2f   : > { %p132_p8 = scmp.lt.s32.totalorder %s2443_s18, 63 }
  0x31   : > { %s3985_s18 = smov (!%p132_p8, %s2443_s18), 63 }
  0x32   : > { %s2444_s19 = sshll.u32 %s3985_s18, 3 }
  0x33   : > { %s2843_s22 = scalar_lea.vmem %s3930_s1, %s2444_s19 }
  0x34 LB: >> { %s2445_s9 = sshll.u32 %s2735_s23, 7  ;;  %v2738_v26 = vmov 683565275   ;;  %v2739_v28 = vmov 2475754826   ;;  %s142_s23 = sadd.s32 1, %s2735_s23   ;;  %s2735_s23 = sphi %s2845_s23, %s142_s23  }
  0x35   : >> { %s144_s10 = sshra.s32 %s2445_s9, 7  ;;  %v2740_v30 = vmov 2131351028   ;;  %v2741_v32 = vmov 2102212464   ;;  %s3879_s25 = scalar_lea.vmem %s2843_s22, %s2445_s9 }
  0x36   : >> { %s2446_s15 = sshll.u32 %s144_s10, 2  ;;  %v2742_v34 = vmov 920167782   ;;  %v2743_v41 = vmov 1326507024   ;;  %p139_p9 = scmp.ge.s32.totalorder %s142_s23, 2  }
  0x37   : >> { %s2855_s24 = scalar_lea.vmem %s111_s17, %s2446_s15 [#allocation2] }
  0x38   : >> { %v2858_v0 = vld [vmem:[%s2855_s24] sm:$0x7] }
  0x39   : >> { %v149_v1 = vand.u32 2147483647, %v2858_v0  ;;  %v152_v2 = vand.u32 2139095040, %v2858_v0  ;;  %v2863_v3 = vmul.f32 1.8888888, %v2858_v0  ;;  %vm151_vm13 = vcmp.lt.s32.totalorder %v2858_v0, 0 }
  0x3a   : >> { %v2866_v4 = vmul.f32 2.7777777, %v2858_v0 }
  0x3b   : >> { %v153_v5 = vshrl.u32 %v152_v2, 23  ;;  %v156_v6 = vand.u32 8388607, %v149_v1  ;;  %v253_v7 = vand.u32 2147483647, %v2863_v3  ;;  %v256_v8 = vand.u32 2139095040, %v2863_v3 }
  0x3c   : >> { %v360_v12 = vand.u32 2139095040, %v2866_v4 }
  0x3d   : >> { %v2447_v9 = vadd.s32 4294967169, %v153_v5  ;;  %v257_v10 = vshrl.u32 %v256_v8, 23  ;;  %v260_v11 = vand.u32 8388607, %v253_v7  ;;  %v157_v14 = vor.u32 8388608, %v156_v6 }
  0x3e   : >> { %v361_v17 = vshrl.u32 %v360_v12, 23 }
  0x3f   : >> { %v159_v13 = vadd.s32 1, %v2447_v9  ;;  %v2451_v15 = vadd.s32 4294967169, %v257_v10  ;;  %v261_v16 = vor.u32 8388608, %v260_v11  ;;  %v2875_v22 = vshll.u32 %v157_v14, 8 }
  0x40   : >> { %v2879_v24 = vadd.s32 4294967169, %v361_v17 }
  0x41   : >> { %vm160_vm0 = vcmp.gt.s32.totalorder %v159_v13, 0  ;;  %v263_v19 = vadd.s32 1, %v2451_v15  ;;  %v2877_v23 = vshll.u32 %v261_v16, 8 }
  0x42   : >> { %v161_v18 = vsel %vm160_vm0, %v159_v13, 0  ;;  %vm2982_vm0 = vcmp.le.f32.partialorder %v149_v1, 0.7853982 }
  0x43   : >> { %v162_v20 = vshrl.u32 %v161_v18, 5  ;;  %v163_v21 = vand.u32 31, %v161_v18  ;;  %vm264_vm1 = vcmp.gt.s32.totalorder %v263_v19, 0 }
  0x44   : >> { %v265_v46 = vsel %vm264_vm1, %v263_v19, 0 }
  0x45   : >> { %v164_v25 = vsub.s32 32, %v163_v21  ;;  %v166_v27 = vshll.u32 %v2738_v26, %v163_v21  ;;  %v169_v29 = vshll.u32 %v2739_v28, %v163_v21  ;;  %v172_v31 = vshll.u32 %v2740_v30, %v163_v21 }
  0x46   : >> { %v175_v33 = vshll.u32 %v2741_v32, %v163_v21  ;;  %v178_v35 = vshll.u32 %v2742_v34, %v163_v21  ;;  %vm181_vm2 = vcmp.lt.s32.totalorder %v162_v20, 1  ;;  %vm182_vm3 = vcmp.lt.s32.totalorder %v162_v20, 2 }
  0x47   : >> { %v165_v36 = vshrl.u32 %v2738_v26, %v164_v25  ;;  %v167_v37 = vshrl.u32 %v2739_v28, %v164_v25  ;;  %v170_v38 = vshrl.u32 %v2740_v30, %v164_v25  ;;  %v173_v39 = vshrl.u32 %v2741_v32, %v164_v25 }
  0x48   : >> { %v176_v40 = vshrl.u32 %v2742_v34, %v164_v25  ;;  %v179_v42 = vshrl.u32 %v2743_v41, %v164_v25  ;;  %vm183_vm4 = vcmp.lt.s32.totalorder %v162_v20, 3  ;;  %vm184_vm5 = vcmp.lt.s32.totalorder %v162_v20, 4 }
  0x49   : >> { %v168_v43 = vor.u32 %v167_v37, %v166_v27  ;;  %v171_v44 = vor.u32 %v170_v38, %v169_v29  ;;  %v174_v45 = vor.u32 %v173_v39, %v172_v31  ;;  %v266_v49 = vshrl.u32 %v265_v46, 5 }
  0x4a   : >> { %v177_v47 = vor.u32 %v176_v40, %v175_v33  ;;  %v180_v48 = vor.u32 %v179_v42, %v178_v35  ;;  %v267_v50 = vand.u32 31, %v265_v46  ;;  %v367_v29 = vadd.s32 1, %v2879_v24 }
  0x4b   : >> { %v185_v51 = vsel %vm181_vm2, %v165_v36, %v168_v43  ;;  %v186_v52 = vsel %vm184_vm5, %v174_v45, 2102212464  ;;  %v189_v53 = vsel %vm181_vm2, %v168_v43, %v171_v44  ;;  %v193_v54 = vsel %vm181_vm2, %v171_v44, %v174_v45 }
  0x4c   : >> { %v187_v55 = vsel %vm183_vm4, %v171_v44, %v186_v52  ;;  %v190_v56 = vsel %vm184_vm5, %v177_v47, 920167782  ;;  %v194_v57 = vsel %vm184_vm5, %v180_v48, 1326507024  ;;  %v268_v58 = vsub.s32 32, %v267_v50 }
  0x4d   : >> { %v188_v59 = vsel %vm182_vm3, %v185_v51, %v187_v55  ;;  %v191_v60 = vsel %vm183_vm4, %v174_v45, %v190_v56  ;;  %v195_v61 = vsel %vm183_vm4, %v177_v47, %v194_v57  ;;  %v270_v62 = vshll.u32 %v2738_v26, %v267_v50 }
  0x4e   : >> { %v192_v63 = vsel %vm182_vm3, %v189_v53, %v191_v60  ;;  %v196_v2 = vsel %vm182_vm3, %v193_v54, %v195_v61  ;;  %v204_v5 = vmul.u32 %v2875_v22, %v188_v59  ;;  %v269_v6 = vshrl.u32 %v2738_v26, %v268_v58 }
  0x4f   : >> { %v2906_v8 = vmul.u32.u64.low %v2875_v22, %v196_v2  ;;  %v2907_v9 = vmul.u32.u64.high %v2875_v22, %v196_v2, %v2906_v8  ;;  %v2910_v10 = vmul.u32.u64.low %v2875_v22, %v192_v63  ;;  %v2911_v11 = vmul.u32.u64.high %v2875_v22, %v192_v63, %v2910_v10 }
  0x50   : >> { %v271_v12 = vshrl.u32 %v2739_v28, %v268_v58  ;;  %v273_v13 = vshll.u32 %v2739_v28, %v267_v50  ;;  %v274_v14 = vshrl.u32 %v2740_v30, %v268_v58  ;;  %v276_v15 = vshll.u32 %v2740_v30, %v267_v50 }
  0x51   : >> { %v277_v16 = vshrl.u32 %v2741_v32, %v268_v58  ;;  %v279_v17 = vshll.u32 %v2741_v32, %v267_v50  ;;  %v280_v18 = vshrl.u32 %v2742_v34, %v268_v58  ;;  %v282_v19 = vshll.u32 %v2742_v34, %v267_v50 }
  0x52   : >> { %v272_v20 = vor.u32 %v271_v12, %v270_v62  ;;  %v275_v21 = vor.u32 %v274_v14, %v273_v13  ;;  %v283_v22 = vshrl.u32 %v2743_v41, %v268_v58  ;;  %vm285_vm6 = vcmp.lt.s32.totalorder %v266_v49, 1 }
  0x53   : >> { %vm206_vm7 = vc.u32 %v2907_v9, %v2910_v10  ;;  %v207_v25 = vadd.s32 1, %v2911_v11  ;;  %v278_v27 = vor.u32 %v277_v16, %v276_v15  ;;  %v281_v31 = vor.u32 %v280_v18, %v279_v17 }
  0x54   : >> { %v284_v33 = vor.u32 %v283_v22, %v282_v19  ;;  %vm286_vm8 = vcmp.lt.s32.totalorder %v266_v49, 2  ;;  %vm287_vm9 = vcmp.lt.s32.totalorder %v266_v49, 3  ;;  %vm288_vm10 = vcmp.lt.s32.totalorder %v266_v49, 4 }
  0x55   : >> { %v208_v35 = vsel %vm206_vm7, %v207_v25, %v2911_v11  ;;  %v289_v36 = vsel %vm285_vm6, %v269_v6, %v272_v20  ;;  %v293_v37 = vsel %vm285_vm6, %v272_v20, %v275_v21  ;;  %v290_v39 = vsel %vm288_vm10, %v278_v27, 2102212464 }
  0x56   : >> { %v209_v38 = vadd.s32 %v208_v35, %v204_v5  ;;  %v294_v40 = vsel %vm288_vm10, %v281_v31, 920167782  ;;  %v297_v42 = vsel %vm285_vm6, %v275_v21, %v278_v27  ;;  %v291_v43 = vsel %vm287_vm9, %v275_v21, %v290_v39 }
  0x57   : >> { %v295_v44 = vsel %vm287_vm9, %v278_v27, %v294_v40  ;;  %v298_v45 = vsel %vm288_vm10, %v284_v33, 1326507024  ;;  %vm368_vm11 = vcmp.gt.s32.totalorder %v367_v29, 0  ;;  %v357_v48 = vand.u32 2147483647, %v2866_v4 }
  0x58   : >> { %v210_v24 = vadd.s32 536870912, %v209_v38  ;;  %v296_v46 = vsel %vm286_vm8, %v293_v37, %v295_v44  ;;  %v299_v47 = vsel %vm287_vm9, %v281_v31, %v298_v45  ;;  %v292_v50 = vsel %vm286_vm8, %v289_v36, %v291_v43 }
  0x59   : >> { %v300_v51 = vsel %vm286_vm8, %v297_v42, %v299_v47  ;;  %v2936_v52 = vmul.u32.u64.low %v2877_v23, %v296_v46  ;;  %v2937_v53 = vmul.u32.u64.high %v2877_v23, %v296_v46, %v2936_v52  ;;  %v369_v57 = vsel %vm368_vm11, %v367_v29, 0 }
  0x5a   : >> { %v2940_v54 = vshrl.u32 %v210_v24, 30  ;;  %v2943_v55 = vmul.u32.u64.low %v2877_v23, %v300_v51  ;;  %v2944_v56 = vmul.u32.u64.high %v2877_v23, %v300_v51, %v2943_v55  ;;  %v371_v58 = vand.u32 31, %v369_v57 }
  0x5b   : >> { %v308_v60 = vmul.u32 %v2877_v23, %v292_v50  ;;  %v311_v49 = vadd.s32 1, %v2937_v53  ;;  %v364_v62 = vand.u32 8388607, %v357_v48  ;;  %v2955_v8 = vmul.f32 3.6666667, %v2858_v0 }
  0x5c   : >> { %v212_v59 = vshll.u32 %v2940_v54, 30  ;;  %vm310_vm12 = vc.u32 %v2944_v56, %v2936_v52  ;;  %v372_v2 = vsub.s32 32, %v371_v58  ;;  %v374_v14 = vshll.u32 %v2738_v26, %v371_v58 }
  0x5d   : >> { %v312_v63 = vsel %vm310_vm12, %v311_v49, %v2937_v53  ;;  %v365_v12 = vor.u32 8388608, %v364_v62  ;;  %v461_v23 = vand.u32 2147483647, %v2955_v8  ;;  %v377_v16 = vshll.u32 %v2739_v28, %v371_v58 }
  0x5e   : >> { %v213_v61 = vsub.s32 %v209_v38, %v212_v59  ;;  %v313_v6 = vadd.s32 %v312_v63, %v308_v60  ;;  %v375_v15 = vshrl.u32 %v2739_v28, %v372_v2  ;;  %v378_v18 = vshrl.u32 %v2740_v30, %v372_v2 }
  0x5f   : >> { %v380_v19 = vshll.u32 %v2740_v30, %v371_v58  ;;  %v381_v20 = vshrl.u32 %v2741_v32, %v372_v2  ;;  %v370_v22 = vshrl.u32 %v369_v57, 5  ;;  %v383_v25 = vshll.u32 %v2741_v32, %v371_v58 }
  0x60   : >> { %v215_v5 = vsub.s32 0, %v213_v61  ;;  %v314_v13 = vadd.s32 536870912, %v313_v6  ;;  %v384_v27 = vshrl.u32 %v2742_v34, %v372_v2  ;;  %v205_v29 = vadd.s32 %v2910_v10, %v2907_v9 }
  0x61   : >> { %v2970_v33 = vshll.u32 %v365_v12, 8  ;;  %v464_v35 = vand.u32 2139095040, %v2955_v8  ;;  %v373_v37 = vshrl.u32 %v2738_v26, %v372_v2  ;;  %v386_v38 = vshll.u32 %v2742_v34, %v371_v58 }
  0x62   : >> { %v2448_v11 = vmin.u32 %v215_v5, %v213_v61  ;;  %v2964_v21 = vshrl.u32 %v314_v13, 30  ;;  %v387_v39 = vshrl.u32 %v2743_v41, %v372_v2  ;;  %v376_v40 = vor.u32 %v375_v15, %v374_v14 }
  0x63   : >> { %v379_v42 = vor.u32 %v378_v18, %v377_v16  ;;  %v382_v43 = vor.u32 %v381_v20, %v380_v19  ;;  %v385_v44 = vor.u32 %v384_v27, %v383_v25  ;;  %vm392_vm15 = vcmp.lt.s32.totalorder %v370_v22, 4 }
  0x64   : >> { %v217_v17 = vclz %v2448_v11  ;;  %v316_v36 = vshll.u32 %v2964_v21, 30  ;;  %v388_v53 = vor.u32 %v387_v39, %v386_v38  ;;  %vm389_vm1 = vcmp.lt.s32.totalorder %v370_v22, 1 }
  0x65   : >> { %v394_v50 = vsel %vm392_vm15, %v382_v43, 2102212464  ;;  %v465_v55 = vshrl.u32 %v464_v35, 23  ;;  %v235_v59 = vsub.s32 4, %v2940_v54  ;;  %vm391_vm2 = vcmp.lt.s32.totalorder %v370_v22, 3 }
  0x66   : >> { %v2449_v31 = vadd.s32 4294967294, %v217_v17  ;;  %v2978_v10 = vsub.s32 %v313_v6, %v316_v36  ;;  %vm390_vm3 = vcmp.lt.s32.totalorder %v370_v22, 2  ;;  %v393_v60 = vsel %vm389_vm1, %v373_v37, %v376_v40 }
  0x67   : >> { %v395_v49 = vsel %vm391_vm2, %v379_v42, %v394_v50  ;;  %v397_v63 = vsel %vm389_vm1, %v376_v40, %v379_v42  ;;  %v398_v2 = vsel %vm392_vm15, %v385_v44, 920167782  ;;  %v401_v11 = vsel %vm389_vm1, %v379_v42, %v382_v43 }
  0x68   : >> { %vm2450_vm14 = vcmp.lt.s32.totalorder %v2449_v31, 0  ;;  %v319_v51 = vsub.s32 0, %v2978_v10  ;;  %v399_v6 = vsel %vm391_vm2, %v382_v43, %v398_v2  ;;  %v402_v12 = vsel %vm392_vm15, %v388_v53, 1326507024 }
  0x69   : >> { %v220_v9 = vsel %vm2450_vm14, 0, %v2449_v31  ;;  %v236_v15 = vsel %vm151_vm13, %v235_v59, %v2940_v54  ;;  %v309_v16 = vadd.s32 %v2936_v52, %v2944_v56  ;;  %vm255_vm4 = vcmp.lt.s32.totalorder %v2863_v3, 0 }
  0x6a   : >> { %v221_v24 = vsub.s32 32, %v220_v9  ;;  %v222_v46 = vshll.u32 %v213_v61, %v220_v9  ;;  %v225_v47 = vsub.s32 4294967266, %v220_v9  ;;  %v2452_v1 = vmin.u32 %v319_v51, %v2978_v10 }
  0x6b   : >> { %v396_v18 = vsel %vm390_vm3, %v393_v60, %v395_v49  ;;  %v400_v19 = vsel %vm390_vm3, %v397_v63, %v399_v6  ;;  %v403_v20 = vsel %vm391_vm2, %v385_v44, %v402_v12  ;;  %v238_v52 = vsel %vm2982_vm0, 0, %v236_v15 }
  0x6c   : >> { %v223_v57 = vshrl.u32 %v205_v29, %v221_v24  ;;  %v226_v58 = vadd.s32 127, %v225_v47  ;;  %v321_v5 = vclz %v2452_v1  ;;  %v404_v27 = vsel %vm390_vm3, %v401_v11, %v403_v20 }
  0x6d   : >> { %v3008_v29 = vmul.u32.u64.low %v2970_v33, %v400_v19  ;;  %v3009_v31 = vmul.u32.u64.high %v2970_v33, %v400_v19, %v3008_v29  ;;  %v3015_v54 = vmul.u32.u64.low %v2970_v33, %v404_v27  ;;  %v3016_v56 = vmul.u32.u64.high %v2970_v33, %v404_v27, %v3015_v54 }
  0x6e   : >> { %v224_v61 = vor.u32 %v223_v57, %v222_v46  ;;  %v227_v62 = vshll.u32 %v226_v58, 23  ;;  %v2453_v17 = vadd.s32 4294967294, %v321_v5  ;;  %v1281_v37 = vadd.s32 3, %v238_v52 }
  0x6f   : >> { %v2459_v38 = vadd.s32 4294967169, %v465_v55  ;;  %v412_v42 = vmul.u32 %v2970_v33, %v396_v18  ;;  %v339_v9 = vsub.s32 4, %v2964_v21  ;;  %v415_v44 = vadd.s32 1, %v3009_v31 }
  0x70   : >> { %v228_v13 = vor.u32 4788187, %v227_v62  ;;  %v231_v14 = vcvt.s32.f32 %v224_v61  ;;  %vm2454_vm5 = vcmp.lt.s32.totalorder %v2453_v17, 0  ;;  %vm414_vm6 = vc.u32 %v3016_v56, %v3008_v29 }
  0x71   : >> { %v324_v36 = vsel %vm2454_vm5, 0, %v2453_v17  ;;  %v471_v24 = vadd.s32 1, %v2459_v38  ;;  %v468_v50 = vand.u32 8388607, %v461_v23  ;;  %v3028_v51 = vand.u32 3, %v238_v52 }
  0x72   : >> { %v229_v25 = vand.u32 2147483647, %v228_v13  ;;  %v325_v39 = vsub.s32 32, %v324_v36  ;;  %v326_v22 = vshll.u32 %v2978_v10, %v324_v36  ;;  %v329_v40 = vsub.s32 4294967266, %v324_v36 }
  0x73   : >> { %v416_v33 = vsel %vm414_vm6, %v415_v44, %v3009_v31  ;;  %vm472_vm7 = vcmp.gt.s32.totalorder %v471_v24, 0  ;;  %v340_v59 = vsel %vm255_vm4, %v339_v9, %v2964_v21  ;;  %v3037_v1 = vand.u32 3, %v1281_v37 }
  0x74   : >> { %v232_v35 = vmul.f32 %v231_v14, %v229_v25  ;;  %v327_v46 = vshrl.u32 %v309_v16, %v325_v39  ;;  %v330_v47 = vadd.s32 127, %v329_v40  ;;  %v417_v58 = vadd.s32 %v416_v33, %v412_v42 }
  0x75   : >> { %v473_v60 = vsel %vm472_vm7, %v471_v24, 0  ;;  %vm3041_vm8 = vcmp.le.f32.partialorder %v253_v7, 0.7853982  ;;  %v469_v21 = vor.u32 8388608, %v468_v50  ;;  %v3052_v14 = vmul.f32 4.5555553, %v2858_v0 }
  0x76   : >> { %v233_v43 = vxor.u32 2147483648, %v232_v35  ;;  %v328_v55 = vor.u32 %v327_v46, %v326_v22  ;;  %v331_v57 = vshll.u32 %v330_v47, 23  ;;  %v418_v62 = vadd.s32 536870912, %v417_v58 }
  0x77   : >> { %v475_v63 = vand.u32 31, %v473_v60  ;;  %v342_v5 = vsel %vm3041_vm8, 0, %v340_v59  ;;  %v3049_v12 = vshrl.u32 %v473_v60, 5  ;;  %vm247_vm9 = vcmp.eq.s32.totalorder %v3028_v51, 2 }
  0x78   : >> { %v234_v10 = vsel %vm151_vm13, %v233_v43, %v232_v35  ;;  %v332_v49 = vor.u32 4788187, %v331_v57  ;;  %v335_v61 = vcvt.s32.f32 %v328_v55  ;;  %v3047_v6 = vshrl.u32 %v418_v62, 30 }
  0x79   : >> { %v237_v53 = vsel %vm2982_vm0, %v2858_v0, %v234_v10  ;;  %v1385_v11 = vadd.s32 3, %v342_v5  ;;  %v476_v13 = vsub.s32 32, %v475_v63  ;;  %vm1287_vm10 = vcmp.eq.s32.totalorder %v3037_v1, 2 }
  0x7a   : >> { %2624 = vcosq.f32 %v237_v53  ;;  %v333_v2 = vand.u32 2147483647, %v332_v49  ;;  %v420_v15 = vshll.u32 %v3047_v6, 30  ;;  %v478_v16 = vshll.u32 %v2738_v26, %v475_v63 }
  0x7b   : >> { %2626 = vsinq.f32 %v237_v53  ;;  %v481_v17 = vshll.u32 %v2739_v28, %v475_v63  ;;  %vm244_vm11 = vcmp.eq.s32.totalorder %v3028_v51, 0  ;;  %vm1284_vm12 = vcmp.eq.s32.totalorder %v3037_v1, 0 }
  0x7c   : >> { %v336_v7 = vmul.f32 %v335_v61, %v333_v2  ;;  %v479_v18 = vshrl.u32 %v2739_v28, %v476_v13  ;;  %v482_v19 = vshrl.u32 %v2740_v30, %v476_v13  ;;  %v484_v20 = vshll.u32 %v2740_v30, %v475_v63 }
  0x7d   : >> { %v487_v25 = vshll.u32 %v2741_v32, %v475_v63  ;;  %vm1283_vm13 = vcmp.lt.s32.totalorder %v3037_v1, 2  ;;  %v3066_v31 = vsub.s32 %v417_v58, %v420_v15  ;;  %v485_v52 = vshrl.u32 %v2741_v32, %v476_v13 }
  0x7e   : >> { %v337_v27 = vxor.u32 2147483648, %v336_v7  ;;  %v488_v54 = vshrl.u32 %v2742_v34, %v476_v13  ;;  %vm243_vm14 = vcmp.lt.s32.totalorder %v3028_v51, 2  ;;  %v3071_v35 = vand.u32 3, %v342_v5 }
  0x7f   : >> { %v3073_v36 = vand.u32 3, %v1385_v11  ;;  %v3075_v37 = vshll.u32 %v469_v21, 8  ;;  %v568_v38 = vand.u32 2139095040, %v3052_v14  ;;  %v423_v22 = vsub.s32 0, %v3066_v31 }
  0x80   : >> { %v338_v39 = vsel %vm255_vm4, %v337_v27, %v336_v7  ;;  %v480_v40 = vor.u32 %v479_v18, %v478_v16  ;;  %v483_v42 = vor.u32 %v482_v19, %v481_v17  ;;  %vm241_vm15 = vweird.f32 %v2858_v0 }
  0x81   : >> { %v341_v43 = vsel %vm3041_vm8, %v2863_v3, %v338_v39  ;;  %v489_v9 = vor.u32 %v488_v54, %v487_v25  ;;  %v490_v44 = vshll.u32 %v2742_v34, %v475_v63  ;;  %v491_v24 = vshrl.u32 %v2743_v41, %v476_v13 }
  0x82   : >> { %2628 = vcosq.f32 %v341_v43  ;;  %v2456_v46 = vmin.u32 %v423_v22, %v3066_v31  ;;  %v486_v47 = vor.u32 %v485_v52, %v484_v20  ;;  %vm493_vm0 = vcmp.lt.s32.totalorder %v3049_v12, 1 }
  0x83   : >> { %2630 = vsinq.f32 %v341_v43  ;;  %v413_v50 = vadd.s32 %v3008_v29, %v3016_v56  ;;  %v477_v10 = vshrl.u32 %v2738_v26, %v476_v13  ;;  %v492_v33 = vor.u32 %v491_v24, %v490_v44 }
  0x84   : >> { %v425_v55 = vclz %v2456_v46  ;;  %vm494_vm1 = vcmp.lt.s32.totalorder %v3049_v12, 2  ;;  %vm495_vm2 = vcmp.lt.s32.totalorder %v3049_v12, 3  ;;  %vm496_vm3 = vcmp.lt.s32.totalorder %v3049_v12, 4 }
  0x85   : >> { %v498_v59 = vsel %vm496_vm3, %v486_v47, 2102212464  ;;  %v501_v60 = vsel %vm493_vm0, %v480_v40, %v483_v42  ;;  %v502_v29 = vsel %vm496_vm3, %v489_v9, 920167782  ;;  %v569_v62 = vshrl.u32 %v568_v38, 23 }
  0x86   : >> { %v2457_v49 = vadd.s32 4294967294, %v425_v55  ;;  %v503_v61 = vsel %vm495_vm2, %v486_v47, %v502_v29  ;;  %v497_v2 = vsel %vm493_vm0, %v477_v10, %v480_v40  ;;  %v499_v5 = vsel %vm495_vm2, %v483_v42, %v498_v59 }
  0x87   : >> { %v2625_v53 = vpop.eup %2624  ;;  %vm348_vm4 = vcmp.eq.s32.totalorder %v3071_v35, 0  ;;  %v504_v13 = vsel %vm494_vm1, %v501_v60, %v503_v61  ;;  %vm347_vm6 = vcmp.lt.s32.totalorder %v3071_v35, 2  ;;  %vm2270_vm7 = vcmask 1042432  }
  0x88   : >> { %v2627_v57 = vpop.eup %2626  ;;  %v248_v58 = vxor.u32 2147483648, %v2625_v53  ;;  %vm2458_vm5 = vcmp.lt.s32.totalorder %v2457_v49, 0  ;;  %v505_v16 = vsel %vm493_vm0, %v483_v42, %v486_v47  ;;  %v506_v17 = vsel %vm496_vm3, %v492_v33, 1326507024 }
  0x89   : >> { %v245_v56 = vxor.u32 2147483648, %v2627_v57  ;;  %v428_v15 = vsel %vm2458_vm5, 0, %v2457_v49  ;;  %vm345_vm8 = vweird.f32 %v2863_v3  ;;  %v500_v27 = vsel %vm494_vm1, %v497_v2, %v499_v5 }
  0x8a   : >> { %v249_v45 = vsel %vm247_vm9, %v248_v58, %v2627_v57  ;;  %v1289_v63 = vsel %vm1287_vm10, %v248_v58, %v2627_v57  ;;  %v429_v20 = vsub.s32 32, %v428_v15  ;;  %v430_v1 = vshll.u32 %v3066_v31, %v428_v15 }
  0x8b   : >> { %v246_v21 = vsel %vm244_vm11, %v2625_v53, %v245_v56  ;;  %v1286_v11 = vsel %vm1284_vm12, %v2625_v53, %v245_v56  ;;  %vm351_vm9 = vcmp.eq.s32.totalorder %v3071_v35, 2  ;;  %v433_v25 = vsub.s32 4294967266, %v428_v15 }
  0x8c   : >> { %v1290_v7 = vsel %vm1283_vm13, %v1286_v11, %v1289_v63  ;;  %v250_v18 = vsel %vm243_vm14, %v246_v21, %v249_v45  ;;  %v507_v52 = vsel %vm495_vm2, %v489_v9, %v506_v17  ;;  %v431_v51 = vshrl.u32 %v413_v50, %v429_v20 }
  0x8d   : >> { %v3130_v19 = vsel %vm241_vm15, nan, %v1290_v7  ;;  %v508_v54 = vsel %vm494_vm1, %v505_v16, %v507_v52  ;;  %v3141_v38 = vmul.u32.u64.low %v3075_v37, %v504_v13  ;;  %v3142_v39 = vmul.u32.u64.high %v3075_v37, %v504_v13, %v3141_v38 }
  0x8e   : >> { %v251_v31 = vsel %vm241_vm15, nan, %v250_v18  ;;  %vm2272_vm10 = vcmask 1045504   ;;  %v434_v22 = vadd.s32 127, %v433_v25  ;;  %vm1387_vm11 = vcmp.lt.s32.totalorder %v3073_v36, 2 }
  0x8f   : >> { %v3148_v40 = vmul.u32.u64.low %v3075_v37, %v508_v54  ;;  %v3149_v42 = vmul.u32.u64.high %v3075_v37, %v508_v54, %v3148_v40  ;;  %vm1388_vm12 = vcmp.eq.s32.totalorder %v3073_v36, 0  ;;  %v432_v12 = vor.u32 %v431_v51, %v430_v1  ;;  %v2629_v9 = vpop.eup %2628 }
  0x90   : >> { %v2463_v43 = vadd.s32 4294967169, %v569_v62  ;;  %vm1391_vm13 = vcmp.eq.s32.totalorder %v3073_v36, 2  ;;  %v435_v44 = vshll.u32 %v434_v22, 23  ;;  %v516_v24 = vmul.u32 %v3075_v37, %v500_v27  ;;  %v2631_v47 = vpop.eup %2630 }
  0x91   : >> { %v565_v46 = vand.u32 2147483647, %v3052_v14  ;;  %v352_v50 = vxor.u32 2147483648, %v2629_v9  ;;  %v2229_v10 = vrot.slane %v251_v31, 5  ;;  %v519_v33 = vadd.s32 1, %v3142_v39 }
  0x92   : >> { %v575_v53 = vadd.s32 1, %v2463_v43  ;;  %v349_v55 = vxor.u32 2147483648, %v2631_v47  ;;  %v436_v57 = vor.u32 4788187, %v435_v44  ;;  %v439_v58 = vcvt.s32.f32 %v432_v12 }
  0x93   : >> { %vm518_vm14 = vc.u32 %v3149_v42, %v3141_v38  ;;  %v353_v59 = vsel %vm351_vm9, %v352_v50, %v2631_v47  ;;  %v1393_v60 = vsel %vm1391_vm13, %v352_v50, %v2631_v47  ;;  %v2271_v63 = vsel %vm2270_vm7, %v2858_v0, %v2229_v10 }
  0x94   : >> { %v520_v37 = vsel %vm518_vm14, %v519_v33, %v3142_v39  ;;  %vm576_vm15 = vcmp.gt.s32.totalorder %v575_v53, 0  ;;  %v350_v29 = vsel %vm348_vm4, %v2629_v9, %v349_v55  ;;  %v1390_v56 = vsel %vm1388_vm12, %v2629_v9, %v349_v55 }
  0x95   : >> { %v437_v49 = vand.u32 2147483647, %v436_v57  ;;  %v521_v61 = vadd.s32 %v520_v37, %v516_v24  ;;  %v354_v62 = vsel %vm347_vm6, %v350_v29, %v353_v59  ;;  %v1394_v45 = vsel %vm1387_vm11, %v1390_v56, %v1393_v60 }
  0x96   : >> { %v577_v2 = vsel %vm576_vm15, %v575_v53, 0  ;;  %v3174_v5 = vsel %vm345_vm8, nan, %v354_v62  ;;  %v3178_v21 = vsel %vm345_vm8, nan, %v1394_v45  ;;  %vm359_vm0 = vcmp.lt.s32.totalorder %v2866_v4, 0 }
  0x97   : >> { %v440_v11 = vmul.f32 %v439_v58, %v437_v49  ;;  %v522_v13 = vadd.s32 536870912, %v521_v61  ;;  %v2232_v35 = vrot.slane %v3174_v5, 2  ;;  %v579_v36 = vand.u32 31, %v577_v2 }
  0x98   : >> { %vm3184_vm1 = vcmp.le.f32.partialorder %v357_v48, 0.7853982  ;;  %v572_v3 = vand.u32 8388607, %v565_v46  ;;  %v443_v18 = vsub.s32 4, %v3047_v6  ;;  %v578_v54 = vshrl.u32 %v577_v2, 5 }
  0x99   : >> { %v441_v15 = vxor.u32 2147483648, %v440_v11  ;;  %v3188_v16 = vshrl.u32 %v522_v13, 30  ;;  %v2273_v17 = vsel %vm2272_vm10, %v2271_v63, %v2232_v35  ;;  %v580_v20 = vsub.s32 32, %v579_v36 }
  0x9a   : >> { %v582_v1 = vshll.u32 %v2738_v26, %v579_v36  ;;  %2308 = vxpose.xlu0.b32.start [1/8] (short) %v2273_v17, 128  ;;  %v585_v27 = vshll.u32 %v2739_v28, %v579_v36  ;;  %v588_v52 = vshll.u32 %v2740_v30, %v579_v36  ;;  %v573_v40 = vor.u32 8388608, %v572_v3 }
  0x9b   : >> { %v442_v48 = vsel %vm359_vm0, %v441_v15, %v440_v11  ;;  %v524_v25 = vshll.u32 %v3188_v16, 30  ;;  %v583_v39 = vshrl.u32 %v2739_v28, %v580_v20  ;;  %v586_v31 = vshrl.u32 %v2740_v30, %v580_v20 }
  0x9c   : >> { %v445_v51 = vsel %vm3184_vm1, %v2866_v4, %v442_v48  ;;  %v589_v12 = vshrl.u32 %v2741_v32, %v580_v20  ;;  %v444_v43 = vsel %vm359_vm0, %v443_v18, %v3047_v6  ;;  %v581_v9 = vshrl.u32 %v2738_v26, %v580_v20 }
  0x9d   : >> { %v525_v22 = vsub.s32 %v521_v61, %v524_v25  ;;  %2632 = vcosq.f32 %v445_v51  ;;  %v584_v44 = vor.u32 %v583_v39, %v582_v1  ;;  %v587_v47 = vor.u32 %v586_v31, %v585_v27 }
  0x9e   : >> { %v590_v50 = vor.u32 %v589_v12, %v588_v52  ;;  %v591_v10 = vshll.u32 %v2741_v32, %v579_v36  ;;  %v592_v33 = vshrl.u32 %v2742_v34, %v580_v20  ;;  %v594_v53 = vshll.u32 %v2742_v34, %v579_v36 }
  0x9f   : >> { %v527_v24 = vsub.s32 0, %v525_v22  ;;  %v595_v55 = vshrl.u32 %v2743_v41, %v580_v20  ;;  %vm597_vm2 = vcmp.lt.s32.totalorder %v578_v54, 1  ;;  %2634 = vsinq.f32 %v445_v51 }
  0xa0   : >> { %v613_v58 = vshll.u32 %v573_v40, 8  ;;  %v3217_v6 = vmul.f32 5.4444447, %v2858_v0  ;;  %v593_v59 = vor.u32 %v592_v33, %v591_v10  ;;  %vm598_vm3 = vcmp.lt.s32.totalorder %v578_v54, 2 }
  0xa1   : >> { %v2460_v57 = vmin.u32 %v527_v24, %v525_v22  ;;  %v596_v60 = vor.u32 %v595_v55, %v594_v53  ;;  %vm599_vm4 = vcmp.lt.s32.totalorder %v578_v54, 3  ;;  %vm600_vm5 = vcmp.lt.s32.totalorder %v578_v54, 4 }
  0xa2   : >> { %v601_v29 = vsel %vm597_vm2, %v581_v9, %v584_v44  ;;  %v605_v56 = vsel %vm597_vm2, %v584_v44, %v587_v47  ;;  %v602_v49 = vsel %vm600_vm5, %v590_v50, 2102212464  ;;  %v606_v61 = vsel %vm600_vm5, %v593_v59, 920167782 }
  0xa3   : >> { %v529_v37 = vclz %v2460_v57  ;;  %v609_v62 = vsel %vm597_vm2, %v587_v47, %v590_v50  ;;  %v610_v45 = vsel %vm600_vm5, %v596_v60, 1326507024  ;;  %v603_v2 = vsel %vm599_vm4, %v587_v47, %v602_v49 }
  0xa4   : >> { %v607_v11 = vsel %vm599_vm4, %v590_v50, %v606_v61  ;;  %v611_v13 = vsel %vm599_vm4, %v593_v59, %v610_v45  ;;  %v517_v36 = vadd.s32 %v3141_v38, %v3149_v42  ;;  %v672_v17 = vand.u32 2139095040, %v3217_v6 }
  0xa5   : >> { %v2461_v63 = vadd.s32 4294967294, %v529_v37  ;;  %v608_v15 = vsel %vm598_vm3, %v605_v56, %v607_v11  ;;  %v612_v3 = vsel %vm598_vm3, %v609_v62, %v611_v13  ;;  %v604_v18 = vsel %vm598_vm3, %v601_v29, %v603_v2 }
  0xa6   : >> { %v3225_v20 = vmul.u32.u64.low %v613_v58, %v612_v3  ;;  %v3226_v1 = vmul.u32.u64.high %v613_v58, %v612_v3, %v3225_v20  ;;  %v3228_v25 = vmul.u32.u64.low %v613_v58, %v608_v15  ;;  %v3229_v27 = vmul.u32.u64.high %v613_v58, %v608_v15, %v3228_v25 }
  0xa7   : >> { %vm2462_vm6 = vcmp.lt.s32.totalorder %v2461_v63, 0  ;;  %v673_v52 = vshrl.u32 %v672_v17, 23  ;;  %v3235_v40 = vsel %vm3184_vm1, 0, %v444_v43  ;;  %v620_v9 = vmul.u32 %v613_v58, %v604_v18 }
  0xa8   : >> { %v532_v48 = vsel %vm2462_vm6, 0, %v2461_v63  ;;  %vm622_vm8 = vc.u32 %v3226_v1, %v3228_v25  ;;  %v623_v44 = vadd.s32 1, %v3229_v27  ;;  %v669_v7 = vand.u32 2147483647, %v3217_v6 }
  0xa9   : >> { %v533_v51 = vsub.s32 32, %v532_v48  ;;  %v534_v39 = vshll.u32 %v525_v22, %v532_v48  ;;  %v537_v38 = vsub.s32 4294967266, %v532_v48  ;;  %v2467_v42 = vadd.s32 4294967169, %v673_v52 }
  0xaa   : >> { %v3231_v31 = vpop.eup %2632  ;;  %v3242_v22 = vand.u32 3, %v3235_v40  ;;  %v624_v33 = vsel %vm622_vm8, %v623_v44, %v3229_v27  ;;  %v547_v55 = vsub.s32 4, %v3188_v16  ;;  %vm463_vm13 = vcmp.lt.s32.totalorder %v2955_v8, 0 }
  0xab   : >> { %v535_v54 = vshrl.u32 %v517_v36, %v533_v51  ;;  %v538_v12 = vadd.s32 127, %v537_v38  ;;  %v679_v50 = vadd.s32 1, %v2467_v42  ;;  %v625_v57 = vadd.s32 %v624_v33, %v620_v9 }
  0xac   : >> { %v3239_v10 = vpop.eup %2634  ;;  %vm452_vm11 = vcmp.eq.s32.totalorder %v3242_v22, 0  ;;  %vm455_vm12 = vcmp.eq.s32.totalorder %v3242_v22, 2  ;;  %v3253_v56 = vsel %vm463_vm13, %v547_v55, %v3188_v16  ;;  %v676_v61 = vand.u32 8388607, %v669_v7 }
  0xad   : >> { %v536_v24 = vor.u32 %v535_v54, %v534_v39  ;;  %v539_v47 = vshll.u32 %v538_v12, 23  ;;  %vm680_vm9 = vcmp.gt.s32.totalorder %v679_v50, 0  ;;  %v626_v59 = vadd.s32 536870912, %v625_v57 }
  0xae   : >> { %v681_v60 = vsel %vm680_vm9, %v679_v50, 0  ;;  %v453_v62 = vxor.u32 2147483648, %v3239_v10  ;;  %v3938_v45 = vxor.u32 2147483648, %v3231_v31  ;;  %v3262_v2 = vmul.f32 6.3333335, %v2858_v0 }
  0xaf   : >> { %v540_v43 = vor.u32 4788187, %v539_v47  ;;  %v543_v53 = vcvt.s32.f32 %v536_v24  ;;  %v683_v37 = vand.u32 31, %v681_v60  ;;  %v3255_v49 = vshrl.u32 %v626_v59, 30 }
  0xb0   : >> { %vm3266_vm14 = vcmp.le.f32.partialorder %v461_v23, 0.7853982  ;;  %v677_v48 = vor.u32 8388608, %v676_v61  ;;  %v454_v52 = vsel %vm452_vm11, %v3231_v31, %v453_v62  ;;  %v457_v51 = vsel %vm455_vm12, %v3938_v45, %v3239_v10 }
  0xb1   : >> { %v541_v58 = vand.u32 2147483647, %v540_v43  ;;  %v684_v63 = vsub.s32 32, %v683_v37  ;;  %v628_v16 = vshll.u32 %v3255_v49, 30  ;;  %v686_v13 = vshll.u32 %v2738_v26, %v683_v37 }
  0xb2   : >> { %v689_v36 = vshll.u32 %v2739_v28, %v683_v37  ;;  %v692_v15 = vshll.u32 %v2740_v30, %v683_v37  ;;  %v695_v18 = vshll.u32 %v2741_v32, %v683_v37  ;;  %v621_v39 = vadd.s32 %v3228_v25, %v3226_v1 }
  0xb3   : >> { %v544_v29 = vmul.f32 %v543_v53, %v541_v58  ;;  %v687_v3 = vshrl.u32 %v2739_v28, %v684_v63  ;;  %v690_v17 = vshrl.u32 %v2740_v30, %v684_v63  ;;  %v693_v0 = vshrl.u32 %v2741_v32, %v684_v63 }
  0xb4   : >> { %v3278_v20 = vsub.s32 %v625_v57, %v628_v16  ;;  %v696_v27 = vshrl.u32 %v2742_v34, %v684_v63  ;;  %v682_v38 = vshrl.u32 %v681_v60, 5  ;;  %vm451_vm15 = vcmp.lt.s32.totalorder %v3242_v22, 2 }
  0xb5   : >> { %v545_v23 = vxor.u32 2147483648, %v544_v29  ;;  %v685_v54 = vshrl.u32 %v2738_v26, %v684_v63  ;;  %v688_v12 = vor.u32 %v687_v3, %v686_v13  ;;  %v691_v9 = vor.u32 %v690_v17, %v689_v36 }
  0xb6   : >> { %v631_v42 = vsub.s32 0, %v3278_v20  ;;  %v694_v44 = vor.u32 %v693_v0, %v692_v15  ;;  %v697_v24 = vor.u32 %v696_v27, %v695_v18  ;;  %v698_v47 = vshll.u32 %v2742_v34, %v683_v37 }
  0xb7   : >> { %v699_v50 = vshrl.u32 %v2743_v41, %v684_v63  ;;  %v546_v33 = vsel %vm463_vm13, %v545_v23, %v544_v29  ;;  %v717_v25 = vshll.u32 %v677_v48, 8  ;;  %v776_v43 = vand.u32 2139095040, %v3262_v2 }
  0xb8   : >> { %v2464_v1 = vmin.u32 %v631_v42, %v3278_v20  ;;  %vm449_vm0 = vweird.f32 %v2866_v4  ;;  %vm701_vm1 = vcmp.lt.s32.totalorder %v682_v38, 1  ;;  %vm702_vm2 = vcmp.lt.s32.totalorder %v682_v38, 2 }
  0xb9   : >> { %v700_v53 = vor.u32 %v699_v50, %v698_v47  ;;  %vm703_vm3 = vcmp.lt.s32.totalorder %v682_v38, 3  ;;  %vm704_vm4 = vcmp.lt.s32.totalorder %v682_v38, 4  ;;  %v705_v57 = vsel %vm701_vm1, %v685_v54, %v688_v12 }
  0xba   : >> { %v633_v55 = vclz %v2464_v1  ;;  %v709_v58 = vsel %vm701_vm1, %v688_v12, %v691_v9  ;;  %v706_v59 = vsel %vm704_vm4, %v694_v44, 2102212464  ;;  %v710_v60 = vsel %vm704_vm4, %v697_v24, 920167782 }
  0xbb   : >> { %v713_v37 = vsel %vm701_vm1, %v691_v9, %v694_v44  ;;  %v714_v61 = vsel %vm704_vm4, %v700_v53, 1326507024  ;;  %vm567_vm5 = vcmp.lt.s32.totalorder %v3052_v14, 0  ;;  %v707_v63 = vsel %vm703_vm3, %v691_v9, %v706_v59 }
  0xbc   : >> { %v2465_v29 = vadd.s32 4294967294, %v633_v55  ;;  %v711_v16 = vsel %vm703_vm3, %v694_v44, %v710_v60  ;;  %v715_v13 = vsel %vm703_vm3, %v697_v24, %v714_v61  ;;  %v549_v36 = vsel %vm3266_vm14, %v2955_v8, %v546_v33 }
  0xbd   : >> { %v712_v15 = vsel %vm702_vm2, %v709_v58, %v711_v16  ;;  %v716_v3 = vsel %vm702_vm2, %v713_v37, %v715_v13  ;;  %v777_v17 = vshrl.u32 %v776_v43, 23  ;;  %v708_v0 = vsel %vm702_vm2, %v705_v57, %v707_v63 }
  0xbe   : >> { %vm2466_vm6 = vcmp.lt.s32.totalorder %v2465_v29, 0  ;;  %v3309_v18 = vmul.u32.u64.low %v717_v25, %v716_v3  ;;  %v3310_v23 = vmul.u32.u64.high %v717_v25, %v716_v3, %v3309_v18  ;;  %2636 = vcosq.f32 %v549_v36 }
  0xbf   : >> { %v636_v48 = vsel %vm2466_vm6, 0, %v2465_v29  ;;  %v3312_v27 = vmul.u32.u64.low %v717_v25, %v712_v15  ;;  %v3313_v42 = vmul.u32.u64.high %v717_v25, %v712_v15, %v3312_v27  ;;  %v2471_v54 = vadd.s32 4294967169, %v777_v17 }
  0xc0   : >> { %v637_v12 = vsub.s32 32, %v636_v48  ;;  %v638_v9 = vshll.u32 %v3278_v20, %v636_v48  ;;  %v641_v44 = vsub.s32 4294967266, %v636_v48  ;;  %v458_v24 = vsel %vm451_vm15, %v454_v52, %v457_v51 }
  0xc1   : >> { %2638 = vsinq.f32 %v549_v36  ;;  %v651_v38 = vsub.s32 4, %v3255_v49  ;;  %v783_v47 = vadd.s32 1, %v2471_v54  ;;  %v724_v1 = vmul.u32 %v717_v25, %v708_v0 }
  0xc2   : >> { %v639_v50 = vshrl.u32 %v621_v39, %v637_v12  ;;  %v642_v33 = vadd.s32 127, %v641_v44  ;;  %vm726_vm8 = vc.u32 %v3310_v23, %v3312_v27  ;;  %v3325_v43 = vsel %vm3266_vm14, 0, %v3253_v56 }
  0xc3   : >> { %v727_v20 = vadd.s32 1, %v3313_v42  ;;  %v773_v22 = vand.u32 2147483647, %v3262_v2  ;;  %vm784_vm9 = vcmp.gt.s32.totalorder %v783_v47, 0  ;;  %v3331_v52 = vsel %vm449_vm0, nan, %v458_v24 }
  0xc4   : >> { %v640_v51 = vor.u32 %v639_v50, %v638_v9  ;;  %v643_v39 = vshll.u32 %v642_v33, 23  ;;  %v785_v25 = vsel %vm784_vm9, %v783_v47, 0  ;;  %v652_v53 = vsel %vm567_vm5, %v651_v38, %v3255_v49  ;;  %v3370_v38 = vld [vmem:[%s2855_s24] sm:$0x7] }
  0xc5   : >> { %v728_v11 = vsel %vm726_vm8, %v727_v20, %v3313_v42  ;;  %v787_v56 = vand.u32 31, %v785_v25  ;;  %v3338_v55 = vand.u32 3, %v3325_v43  ;;  %vm3342_vm11 = vcmp.le.f32.partialorder %v565_v46, 0.7853982 }
  0xc6   : >> { %v644_v57 = vor.u32 4788187, %v643_v39  ;;  %v647_v58 = vcvt.s32.f32 %v640_v51  ;;  %v729_v59 = vadd.s32 %v728_v11, %v724_v1  ;;  %v2235_v37 = vrot.slane %v3331_v52, 7 }
  0xc7   : >> { %v788_v61 = vsub.s32 32, %v787_v56  ;;  %v3349_v49 = vsel %vm3342_vm11, 0, %v652_v53  ;;  %v780_v16 = vand.u32 8388607, %v773_v22  ;;  %v790_v13 = vshll.u32 %v2738_v26, %v787_v56 }
  0xc8   : >> { %v645_v29 = vand.u32 2147483647, %v644_v57  ;;  %v730_v63 = vadd.s32 536870912, %v729_v59  ;;  %v793_v46 = vshll.u32 %v2739_v28, %v787_v56  ;;  %v796_v15 = vshll.u32 %v2740_v30, %v787_v56 }
  0xc9   : >> { %v791_v36 = vshrl.u32 %v2739_v28, %v788_v61  ;;  %vm559_vm12 = vcmp.eq.s32.totalorder %v3338_v55, 2  ;;  %v794_v0 = vshrl.u32 %v2740_v30, %v788_v61  ;;  %v797_v18 = vshrl.u32 %v2741_v32, %v788_v61 }
  0xca   : >> { %v648_v3 = vmul.f32 %v647_v58, %v645_v29  ;;  %v3358_v17 = vshrl.u32 %v730_v63, 30  ;;  %vm556_vm13 = vcmp.eq.s32.totalorder %v3338_v55, 0  ;;  %v3364_v48 = vand.u32 3, %v3349_v49 }
  0xcb   : >> { %v786_v42 = vshrl.u32 %v785_v25, 5  ;;  %v799_v54 = vshll.u32 %v2741_v32, %v787_v56  ;;  %v800_v12 = vshrl.u32 %v2742_v34, %v788_v61  ;;  %v781_v24 = vor.u32 8388608, %v780_v16  ;;  %v3375_v50 = vpop.eup %2636 }
  0xcc   : >> { %v649_v9 = vxor.u32 2147483648, %v648_v3  ;;  %v732_v44 = vshll.u32 %v3358_v17, 30  ;;  %v3373_v47 = vmul.f32 7.2222223, %v3370_v38  ;;  %vm3941_vm14 = vcmask 1040384  }
  0xcd   : >> { %v789_v33 = vshrl.u32 %v2738_v26, %v788_v61  ;;  %v792_v1 = vor.u32 %v791_v36, %v790_v13  ;;  %v802_v20 = vshll.u32 %v2742_v34, %v787_v56  ;;  %v803_v51 = vshrl.u32 %v2743_v41, %v788_v61 }
  0xce   : >> { %v3380_v39 = vpop.eup %2638  ;;  %vm555_vm15 = vcmp.lt.s32.totalorder %v3338_v55, 2  ;;  %v650_v25 = vsel %vm567_vm5, %v649_v9, %v648_v3  ;;  %v3385_v53 = vsub.s32 %v729_v59, %v732_v44  ;;  %v795_v11 = vor.u32 %v794_v0, %v793_v46 }
  0xcf   : >> { %v798_v57 = vor.u32 %v797_v18, %v796_v15  ;;  %v653_v58 = vsel %vm3342_vm11, %v3052_v14, %v650_v25  ;;  %v801_v29 = vor.u32 %v800_v12, %v799_v54  ;;  %v804_v63 = vor.u32 %v803_v51, %v802_v20 }
  0xd0   : >> { %vm805_vm1 = vcmp.lt.s32.totalorder %v786_v42, 1  ;;  %v3936_v56 = vxor.u32 2147483648, %v3375_v50  ;;  %2640 = vcosq.f32 %v653_v58  ;;  %v735_v61 = vsub.s32 0, %v3385_v53 }
  0xd1   : >> { %v821_v16 = vshll.u32 %v781_v24, 8  ;;  %vm553_vm2 = vweird.f32 %v2955_v8  ;;  %v3937_v59 = vxor.u32 2147483648, %v3380_v39  ;;  %2642 = vsinq.f32 %v653_v58 }
  0xd2   : >> { %vm807_vm3 = vcmp.lt.s32.totalorder %v786_v42, 3  ;;  %vm808_vm4 = vcmp.lt.s32.totalorder %v786_v42, 4  ;;  %v2468_v13 = vmin.u32 %v735_v61, %v3385_v53  ;;  %vm806_vm5 = vcmp.lt.s32.totalorder %v786_v42, 2 }
  0xd3   : >> { %v809_v60 = vsel %vm805_vm1, %v789_v33, %v792_v1  ;;  %v813_v36 = vsel %vm805_vm1, %v792_v1, %v795_v11  ;;  %v810_v46 = vsel %vm808_vm4, %v798_v57, 2102212464  ;;  %v814_v15 = vsel %vm808_vm4, %v801_v29, 920167782 }
  0xd4   : >> { %v817_v3 = vsel %vm805_vm1, %v795_v11, %v798_v57  ;;  %v818_v0 = vsel %vm808_vm4, %v804_v63, 1326507024  ;;  %v737_v18 = vclz %v2468_v13  ;;  %v811_v54 = vsel %vm807_vm3, %v795_v11, %v810_v46 }
  0xd5   : >> { %v815_v12 = vsel %vm807_vm3, %v798_v57, %v814_v15  ;;  %v819_v9 = vsel %vm807_vm3, %v801_v29, %v818_v0  ;;  %v561_v44 = vsel %vm559_vm12, %v3936_v56, %v3380_v39  ;;  %v3406_v1 = vmul.f32 8.111111, %v3370_v38 }
  0xd6   : >> { %v816_v24 = vsel %vm806_vm5, %v813_v36, %v815_v12  ;;  %v820_v33 = vsel %vm806_vm5, %v817_v3, %v819_v9  ;;  %v558_v20 = vsel %vm556_vm13, %v3375_v50, %v3937_v59  ;;  %v2469_v51 = vadd.s32 4294967294, %v737_v18 }
  0xd7   : >> { %v3413_v25 = vmul.u32.u64.low %v821_v16, %v820_v33  ;;  %v3414_v11 = vmul.u32.u64.high %v821_v16, %v820_v33, %v3413_v25  ;;  %v812_v57 = vsel %vm806_vm5, %v809_v60, %v811_v54  ;;  %v880_v63 = vand.u32 2139095040, %v3373_v47 }
  0xd8   : >> { %v3417_v58 = vmul.u32.u64.low %v821_v16, %v816_v24  ;;  %v3418_v29 = vmul.u32.u64.high %v821_v16, %v816_v24, %v3417_v58  ;;  %vm657_vm6 = vweird.f32 %v3052_v14  ;;  %v2275_v61 = vsel %vm3941_vm14, %v2232_v35, %v2235_v37 }
  0xd9   : >> { %vm3940_vm8 = vcmask 1043456   ;;  %v725_v13 = vadd.s32 %v3312_v27, %v3310_v23  ;;  %vm2470_vm9 = vcmp.lt.s32.totalorder %v2469_v51, 0  ;;  %v562_v42 = vsel %vm555_vm15, %v558_v20, %v561_v44 }
  0xda   : >> { %v740_v60 = vsel %vm2470_vm9, 0, %v2469_v51  ;;  %v881_v36 = vshrl.u32 %v880_v63, 23  ;;  %v984_v46 = vand.u32 2139095040, %v3406_v1  ;;  %v828_v0 = vmul.u32 %v821_v16, %v812_v57 }
  0xdb   : >> { %v741_v15 = vsub.s32 32, %v740_v60  ;;  %v742_v3 = vshll.u32 %v3385_v53, %v740_v60  ;;  %v745_v52 = vsub.s32 4294967266, %v740_v60  ;;  %vm660_vm11 = vcmp.eq.s32.totalorder %v3364_v48, 0 }
  0xdc   : >> { %vm3939_vm12 = vcmask 1046528   ;;  %vm830_vm13 = vc.u32 %v3414_v11, %v3417_v58  ;;  %v831_v5 = vadd.s32 1, %v3418_v29  ;;  %v2475_v35 = vadd.s32 4294967169, %v881_v36 }
  0xdd   : >> { %v563_v23 = vsel %vm553_vm2, nan, %v562_v42  ;;  %vm663_vm15 = vcmp.eq.s32.totalorder %v3364_v48, 2  ;;  %v743_v27 = vshrl.u32 %v725_v13, %v741_v15  ;;  %v746_v55 = vadd.s32 127, %v745_v52  ;;  %v3441_v37 = vpop.eup %2640 }
  0xde   : >> { %v832_v53 = vsel %vm830_vm13, %v831_v5, %v3418_v29  ;;  %v3932_v16 = vand.u32 2147483647, %v3373_v47  ;;  %v887_v18 = vadd.s32 1, %v2475_v35  ;;  %v985_v54 = vshrl.u32 %v984_v46, 23  ;;  %v3445_v12 = vpop.eup %2642 }
  0xdf   : >> { %v3934_v9 = vxor.u32 2147483648, %v3441_v37  ;;  %v744_v44 = vor.u32 %v743_v27, %v742_v3  ;;  %v747_v24 = vshll.u32 %v746_v55, 23  ;;  %v833_v33 = vadd.s32 %v832_v53, %v828_v0 }
  0xe0   : >> { %vm659_vm1 = vcmp.lt.s32.totalorder %v3364_v48, 2  ;;  %v3935_v20 = vxor.u32 2147483648, %v3445_v12  ;;  %v2238_v51 = vcombine.low %v563_v23, %v563_v23  ;;  %vm888_vm3 = vcmp.gt.s32.totalorder %v887_v18, 0 }
  0xe1   : >> { %v665_v25 = vsel %vm663_vm15, %v3934_v9, %v3445_v12  ;;  %v748_v57 = vor.u32 4788187, %v747_v24  ;;  %v751_v29 = vcvt.s32.f32 %v744_v44  ;;  %v834_v63 = vadd.s32 536870912, %v833_v33 }
  0xe2   : >> { %v662_v13 = vsel %vm660_vm11, %v3441_v37, %v3935_v20  ;;  %v755_v42 = vsub.s32 4, %v3358_v17  ;;  %v884_v60 = vand.u32 8388607, %v3932_v16  ;;  %v889_v36 = vsel %vm888_vm3, %v887_v18, 0 }
  0xe3   : >> { %v666_v46 = vsel %vm659_vm1, %v662_v13, %v665_v25  ;;  %v749_v15 = vand.u32 2147483647, %v748_v57  ;;  %v3463_v3 = vshrl.u32 %v834_v63, 30  ;;  %v2479_v52 = vadd.s32 4294967169, %v985_v54 }
  0xe4   : >> { %v3467_v0 = vsel %vm657_vm6, nan, %v666_v46  ;;  %v2277_v5 = vsel %vm3940_vm8, %v2275_v61, %v2238_v51  ;;  %vm3472_vm4 = vcmp.le.f32.partialorder %v669_v7, 0.7853982  ;;  %v891_v35 = vand.u32 31, %v889_v36 }
  0xe5   : >> { %v2241_v23 = vrot.slane %v3467_v0, 1  ;;  %vm671_vm5 = vcmp.lt.s32.totalorder %v3217_v6, 0  ;;  %v752_v27 = vmul.f32 %v751_v29, %v749_v15  ;;  %v836_v55 = vshll.u32 %v3463_v3, 30 }
  0xe6   : >> { %v756_v53 = vsel %vm671_vm5, %v755_v42, %v3358_v17  ;;  %v885_v18 = vor.u32 8388608, %v884_v60  ;;  %v892_v61 = vsub.s32 32, %v891_v35  ;;  %v3933_v54 = vand.u32 2147483647, %v3406_v1 }
  0xe7   : >> { %v2279_v7 = vsel %vm3939_vm12, %v2277_v5, %v2241_v23  ;;  %v753_v44 = vxor.u32 2147483648, %v752_v27  ;;  %v837_v24 = vsub.s32 %v833_v33, %v836_v55  ;;  %v991_v51 = vadd.s32 1, %v2479_v52 }
  0xe8   : >> { %2309 = vxpose.xlu0.b32.cont [2/8] (short) %v2279_v7, 128  ;;  %v894_v25 = vshll.u32 %v2738_v26, %v891_v35  ;;  %v895_v57 = vshrl.u32 %v2739_v28, %v892_v61  ;;  %v897_v29 = vshll.u32 %v2739_v28, %v891_v35  ;;  %v898_v17 = vshrl.u32 %v2740_v30, %v892_v61 }
  0xe9   : >> { %v754_v63 = vsel %vm671_vm5, %v753_v44, %v752_v27  ;;  %v839_v13 = vsub.s32 0, %v837_v24  ;;  %v3494_v42 = vsel %vm3472_vm4, 0, %v756_v53  ;;  %v829_v33 = vadd.s32 %v3417_v58, %v3414_v11 }
  0xea   : >> { %v900_v60 = vshll.u32 %v2740_v30, %v891_v35  ;;  %v901_v46 = vshrl.u32 %v2741_v32, %v892_v61  ;;  %v757_v15 = vsel %vm3472_vm4, %v3217_v6, %v754_v63  ;;  %v890_v5 = vshrl.u32 %v889_v36, 5 }
  0xeb   : >> { %v2472_v52 = vmin.u32 %v839_v13, %v837_v24  ;;  %v3503_v55 = vshll.u32 %v885_v18, 8  ;;  %v896_v27 = vor.u32 %v895_v57, %v894_v25  ;;  %v899_v7 = vor.u32 %v898_v17, %v897_v29 }
  0xec   : >> { %v988_v53 = vand.u32 8388607, %v3933_v54  ;;  %vm992_vm9 = vcmp.gt.s32.totalorder %v991_v51, 0  ;;  %v903_v11 = vshll.u32 %v2741_v32, %v891_v35  ;;  %v904_v58 = vshrl.u32 %v2742_v34, %v892_v61 }
  0xed   : >> { %v841_v44 = vclz %v2472_v52  ;;  %v906_v16 = vshll.u32 %v2742_v34, %v891_v35  ;;  %2644 = vcosq.f32 %v757_v15  ;;  %v893_v48 = vshrl.u32 %v2738_v26, %v892_v61 }
  0xee   : >> { %v902_v63 = vor.u32 %v901_v46, %v900_v60  ;;  %v907_v36 = vshrl.u32 %v2743_v41, %v892_v61  ;;  %2646 = vsinq.f32 %v757_v15  ;;  %v905_v25 = vor.u32 %v904_v58, %v903_v11 }
  0xef   : >> { %v2473_v18 = vadd.s32 4294967294, %v841_v44  ;;  %vm909_vm11 = vcmp.lt.s32.totalorder %v890_v5, 1  ;;  %vm910_vm13 = vcmp.lt.s32.totalorder %v890_v5, 2  ;;  %vm911_vm15 = vcmp.lt.s32.totalorder %v890_v5, 3 }
  0xf0   : >> { %v908_v57 = vor.u32 %v907_v36, %v906_v16  ;;  %vm912_vm1 = vcmp.lt.s32.totalorder %v890_v5, 4  ;;  %v917_v17 = vsel %vm909_vm11, %v896_v27, %v899_v7  ;;  %v913_v52 = vsel %vm909_vm11, %v893_v48, %v896_v27 }
  0xf1   : >> { %vm2474_vm3 = vcmp.lt.s32.totalorder %v2473_v18, 0  ;;  %v914_v29 = vsel %vm912_vm1, %v902_v63, 2102212464  ;;  %v918_v13 = vsel %vm912_vm1, %v905_v25, 920167782  ;;  %v921_v16 = vsel %vm909_vm11, %v899_v7, %v902_v63 }
  0xf2   : >> { %v844_v35 = vsel %vm2474_vm3, 0, %v2473_v18  ;;  %v915_v60 = vsel %vm911_vm15, %v899_v7, %v914_v29  ;;  %v919_v61 = vsel %vm911_vm15, %v902_v63, %v918_v13  ;;  %v922_v58 = vsel %vm912_vm1, %v908_v57, 1326507024 }
  0xf3   : >> { %v845_v46 = vsub.s32 32, %v844_v35  ;;  %v846_v15 = vshll.u32 %v837_v24, %v844_v35  ;;  %v849_v44 = vsub.s32 4294967266, %v844_v35  ;;  %v920_v11 = vsel %vm910_vm13, %v917_v17, %v919_v61 }
  0xf4   : >> { %v989_v36 = vor.u32 8388608, %v988_v53  ;;  %v993_v54 = vsel %vm992_vm9, %v991_v51, 0  ;;  %v916_v18 = vsel %vm910_vm13, %v913_v52, %v915_v60  ;;  %v923_v27 = vsel %vm911_vm15, %v905_v25, %v922_v58 }
  0xf5   : >> { %v847_v9 = vshrl.u32 %v829_v33, %v845_v46  ;;  %v850_v20 = vadd.s32 127, %v849_v44  ;;  %v924_v48 = vsel %vm910_vm13, %v921_v16, %v923_v27  ;;  %v995_v7 = vand.u32 31, %v993_v54 }
  0xf6   : >> { %v3523_v29 = vmul.u32.u64.low %v3503_v55, %v920_v11  ;;  %v3524_v24 = vmul.u32.u64.high %v3503_v55, %v920_v11, %v3523_v29  ;;  %v3528_v53 = vmul.u32.u64.low %v3503_v55, %v924_v48  ;;  %v3529_v57 = vmul.u32.u64.high %v3503_v55, %v924_v48, %v3528_v53 }
  0xf7   : >> { %v848_v63 = vor.u32 %v847_v9, %v846_v15  ;;  %v851_v17 = vshll.u32 %v850_v20, 23  ;;  %v3532_v51 = vand.u32 3, %v3494_v42  ;;  %vm3536_vm4 = vcmp.le.f32.partialorder %v773_v22, 0.7853982 }
  0xf8   : >> { %v996_v5 = vsub.s32 32, %v995_v7  ;;  %vm775_vm5 = vcmp.lt.s32.totalorder %v3262_v2, 0  ;;  %v932_v9 = vmul.u32 %v3503_v55, %v916_v18  ;;  %v859_v20 = vsub.s32 4, %v3463_v3 }
  0xf9   : >> { %v852_v25 = vor.u32 4788187, %v851_v17  ;;  %v855_v13 = vcvt.s32.f32 %v848_v63  ;;  %v935_v35 = vadd.s32 1, %v3524_v24  ;;  %v3544_v52 = vshrl.u32 %v993_v54, 5 }
  0xfa   : >> { %v3546_v60 = vshll.u32 %v989_v36, 8  ;;  %v3548_v61 = vpop.eup %2644  ;;  %vm934_vm9 = vc.u32 %v3529_v57, %v3523_v29  ;;  %v998_v46 = vshll.u32 %v2738_v26, %v995_v7  ;;  %v1001_v15 = vshll.u32 %v2739_v28, %v995_v7 }
  0xfb   : >> { %v853_v22 = vand.u32 2147483647, %v852_v25  ;;  %v3554_v44 = vpop.eup %2646  ;;  %vm764_vm11 = vcmp.eq.s32.totalorder %v3532_v51, 0  ;;  %vm767_vm13 = vcmp.eq.s32.totalorder %v3532_v51, 2  ;;  %v936_v54 = vsel %vm934_vm9, %v935_v35, %v3524_v24 }
  0xfc   : >> { %v999_v55 = vshrl.u32 %v2739_v28, %v996_v5  ;;  %v1002_v16 = vshrl.u32 %v2740_v30, %v996_v5  ;;  %v1007_v11 = vshll.u32 %v2741_v32, %v995_v7  ;;  %v937_v36 = vadd.s32 %v936_v54, %v932_v9 }
  0xfd   : >> { %v856_v58 = vmul.f32 %v855_v13, %v853_v22  ;;  %v1004_v18 = vshll.u32 %v2740_v30, %v995_v7  ;;  %v1005_v27 = vshrl.u32 %v2741_v32, %v996_v5  ;;  %v768_v48 = vxor.u32 2147483648, %v3548_v61 }
  0xfe   : >> { %v860_v63 = vsel %vm775_vm5, %v859_v20, %v3463_v3  ;;  %v1008_v24 = vshrl.u32 %v2742_v34, %v996_v5  ;;  %v1010_v17 = vshll.u32 %v2742_v34, %v995_v7  ;;  %v765_v53 = vxor.u32 2147483648, %v3554_v44 }
  0xff   : >> { %v857_v25 = vxor.u32 2147483648, %v856_v58  ;;  %v938_v35 = vadd.s32 536870912, %v937_v36  ;;  %v997_v13 = vshrl.u32 %v2738_v26, %v996_v5  ;;  %vm763_vm15 = vcmp.lt.s32.totalorder %v3532_v51, 2 }
 0x100   : >> { %v1000_v9 = vor.u32 %v999_v55, %v998_v46  ;;  %v1003_v22 = vor.u32 %v1002_v16, %v1001_v15  ;;  %v1009_v54 = vor.u32 %v1008_v24, %v1007_v11  ;;  %v1011_v56 = vshrl.u32 %v2743_v41, %v996_v5 }
 0x101   : >> { %v858_v3 = vsel %vm775_vm5, %v857_v25, %v856_v58  ;;  %v3576_v20 = vshrl.u32 %v938_v35, 30  ;;  %v1006_v59 = vor.u32 %v1005_v27, %v1004_v18  ;;  %vm1013_vm1 = vcmp.lt.s32.totalorder %v3544_v52, 1 }
 0x102   : >> { %v861_v7 = vsel %vm3536_vm4, %v3262_v2, %v858_v3  ;;  %v1012_v45 = vor.u32 %v1011_v56, %v1010_v17  ;;  %vm1015_vm3 = vcmp.lt.s32.totalorder %v3544_v52, 3  ;;  %vm1016_vm9 = vcmp.lt.s32.totalorder %v3544_v52, 4 }
 0x103   : >> { %2648 = vcosq.f32 %v861_v7  ;;  %v940_v5 = vshll.u32 %v3576_v20, 30  ;;  %vm1014_vm12 = vcmp.lt.s32.totalorder %v3544_v52, 2  ;;  %v1018_v46 = vsel %vm1016_vm9, %v1006_v59, 2102212464 }
 0x104   : >> { %v862_v15 = vsel %vm3536_vm4, 0, %v860_v63  ;;  %2650 = vsinq.f32 %v861_v7  ;;  %v1021_v55 = vsel %vm1013_vm1, %v1000_v9, %v1003_v22  ;;  %v1022_v56 = vsel %vm1016_vm9, %v1009_v54, 920167782 }
 0x105   : >> { %v1905_v16 = vadd.s32 3, %v862_v15  ;;  %v3594_v11 = vsub.s32 %v937_v36, %v940_v5  ;;  %v1017_v58 = vsel %vm1013_vm1, %v997_v13, %v1000_v9  ;;  %v1023_v18 = vsel %vm1015_vm3, %v1006_v59, %v1022_v56 }
 0x106   : >> { %v1019_v33 = vsel %vm1015_vm3, %v1003_v22, %v1018_v46  ;;  %v1024_v27 = vsel %vm1014_vm12, %v1021_v55, %v1023_v18  ;;  %v1025_v63 = vsel %vm1013_vm1, %v1003_v22, %v1006_v59  ;;  %v1026_v24 = vsel %vm1016_vm9, %v1012_v45, 1326507024 }
 0x107   : >> { %v766_v36 = vsel %vm764_vm11, %v3548_v61, %v765_v53  ;;  %v769_v17 = vsel %vm767_vm13, %v768_v48, %v3554_v44  ;;  %v943_v25 = vsub.s32 0, %v3594_v11  ;;  %v1027_v59 = vsel %vm1015_vm3, %v1009_v54, %v1026_v24 }
 0x108   : >> { %v1028_v45 = vsel %vm1014_vm12, %v1025_v63, %v1027_v59  ;;  %v3624_v35 = vmul.u32.u64.low %v3546_v60, %v1024_v27  ;;  %v3625_v13 = vmul.u32.u64.high %v3546_v60, %v1024_v27, %v3624_v35  ;;  %v3629_v9 = vmul.f32 9.0, %v3370_v38 }
 0x109   : >> { %v2476_v22 = vmin.u32 %v943_v25, %v3594_v11  ;;  %v1020_v3 = vsel %vm1014_vm12, %v1017_v58, %v1019_v33  ;;  %v3635_v7 = vmul.u32.u64.low %v3546_v60, %v1028_v45  ;;  %v3636_v5 = vmul.u32.u64.high %v3546_v60, %v1028_v45, %v3635_v7 }
 0x10a   : >> { %vm761_vm4 = vweird.f32 %v3217_v6  ;;  %v770_v54 = vsel %vm763_vm15, %v766_v36, %v769_v17  ;;  %v866_v46 = vand.u32 3, %v862_v15  ;;  %v1088_v55 = vand.u32 2139095040, %v3629_v9 }
 0x10b   : >> { %v1906_v56 = vand.u32 3, %v1905_v16  ;;  %v1036_v38 = vmul.u32 %v3546_v60, %v1020_v3  ;;  %v1039_v18 = vadd.s32 1, %v3625_v13  ;;  %vm2280_vm5 = vcmask 1041408  }
 0x10c   : >> { %v945_v52 = vclz %v2476_v22  ;;  %v1089_v58 = vshrl.u32 %v1088_v55, 23  ;;  %v771_v33 = vsel %vm761_vm4, nan, %v770_v54  ;;  %vm865_vm12 = vweird.f32 %v3262_v2 }
 0x10d   : >> { %vm2282_vm11 = vcmask 1044480   ;;  %vm1038_vm13 = vc.u32 %v3636_v5, %v3624_v35  ;;  %vm867_vm15 = vcmp.lt.s32.totalorder %v866_v46, 2  ;;  %v1085_v15 = vand.u32 2147483647, %v3629_v9 }
 0x10e   : >> { %v1040_v51 = vsel %vm1038_vm13, %v1039_v18, %v3625_v13  ;;  %v2483_v60 = vadd.s32 4294967169, %v1089_v58  ;;  %vm868_vm1 = vcmp.eq.s32.totalorder %v866_v46, 0  ;;  %vm871_vm3 = vcmp.eq.s32.totalorder %v866_v46, 2 }
 0x10f   : >> { %vm1911_vm9 = vcmp.eq.s32.totalorder %v1906_v56, 2  ;;  %v1041_v27 = vadd.s32 %v1040_v51, %v1036_v38  ;;  %vm1908_vm8 = vcmp.eq.s32.totalorder %v1906_v56, 0  ;;  %v2244_v36 = vrot.slane %v771_v33, 6 }
 0x110   : >> { %v2649_v16 = vpop.eup %2648  ;;  %v2477_v17 = vadd.s32 4294967294, %v945_v52  ;;  %vm1907_vm14 = vcmp.lt.s32.totalorder %v1906_v56, 2  ;;  %v1095_v45 = vadd.s32 1, %v2483_v60  ;;  %v1092_v13 = vand.u32 8388607, %v1085_v15 }
 0x111   : >> { %v2651_v63 = vpop.eup %2650  ;;  %v872_v24 = vxor.u32 2147483648, %v2649_v16  ;;  %v1042_v59 = vadd.s32 536870912, %v1041_v27  ;;  %v1489_v7 = vadd.s32 3, %v3235_v40  ;;  %v2281_v56 = vsel %vm2280_vm5, %v2241_v23, %v2244_v36 }
 0x112   : >> { %v869_v25 = vxor.u32 2147483648, %v2651_v63  ;;  %vm1096_vm13 = vcmp.gt.s32.totalorder %v1095_v45, 0  ;;  %v1593_v51 = vadd.s32 3, %v3325_v43  ;;  %v1093_v46 = vor.u32 8388608, %v1092_v13 }
 0x113   : >> { %v873_v22 = vsel %vm871_vm3, %v872_v24, %v2651_v63  ;;  %v1913_v3 = vsel %vm1911_vm9, %v872_v24, %v2651_v63  ;;  %v3655_v38 = vshrl.u32 %v1042_v59, 30  ;;  %vm2478_vm3 = vcmp.lt.s32.totalorder %v2477_v17, 0 }
 0x114   : >> { %v870_v54 = vsel %vm868_vm1, %v2649_v16, %v869_v25  ;;  %v1910_v55 = vsel %vm1908_vm8, %v2649_v16, %v869_v25  ;;  %v1097_v16 = vsel %vm1096_vm13, %v1095_v45, 0  ;;  %v3669_v63 = vand.u32 3, %v1489_v7 }
 0x115   : >> { %v874_v18 = vsel %vm867_vm15, %v870_v54, %v873_v22  ;;  %v1914_v52 = vsel %vm1907_vm14, %v1910_v55, %v1913_v3  ;;  %v1044_v33 = vshll.u32 %v3655_v38, 30  ;;  %v3671_v0 = vsel %vm2478_vm3, 0, %v2477_v17 }
 0x116   : >> { %v875_v58 = vsel %vm865_vm12, nan, %v874_v18  ;;  %v3665_v40 = vsel %vm865_vm12, nan, %v1914_v52  ;;  %v1099_v24 = vand.u32 31, %v1097_v16  ;;  %v933_v2 = vadd.s32 %v3523_v29, %v3529_v57 }
 0x117   : >> { %v2247_v60 = vrot.slane %v875_v58, 3  ;;  %v3673_v23 = vsub.s32 %v1041_v27, %v1044_v33  ;;  %v3679_v25 = vadd.s32 3, %v3349_v49  ;;  %v1037_v43 = vadd.s32 %v3624_v35, %v3636_v5 }
 0x118   : >> { %v1100_v45 = vsub.s32 32, %v1099_v24  ;;  %v3684_v17 = vand.u32 3, %v1593_v51  ;;  %v949_v27 = vsub.s32 32, %v3671_v0  ;;  %v953_v22 = vsub.s32 4294967266, %v3671_v0 }
 0x119   : >> { %v2283_v36 = vsel %vm2282_vm11, %v2281_v56, %v2247_v60  ;;  %v1047_v59 = vsub.s32 0, %v3673_v23  ;;  %v3688_v3 = vshll.u32 %v1093_v46, 8  ;;  %vm1492_vm14 = vcmp.eq.s32.totalorder %v3669_v63, 0 }
 0x11a   : >> { %2310 = vxpose.xlu0.b32.cont [3/8] (short) %v2283_v36, 128  ;;  %v1098_v29 = vshrl.u32 %v1097_v16, 5  ;;  %v1102_v57 = vshll.u32 %v2738_v26, %v1099_v24  ;;  %v1105_v35 = vshll.u32 %v2739_v28, %v1099_v24  ;;  %v1103_v5 = vshrl.u32 %v2739_v28, %v1100_v45 }
 0x11b   : >> { %v2480_v49 = vmin.u32 %v1047_v59, %v3673_v23  ;;  %v1106_v13 = vshrl.u32 %v2740_v30, %v1100_v45  ;;  %v1108_v7 = vshll.u32 %v2740_v30, %v1099_v24  ;;  %v1111_v54 = vshll.u32 %v2741_v32, %v1099_v24 }
 0x11c   : >> { %v1109_v18 = vshrl.u32 %v2741_v32, %v1100_v45  ;;  %v1112_v52 = vshrl.u32 %v2742_v34, %v1100_v45  ;;  %v1114_v56 = vshll.u32 %v2742_v34, %v1099_v24  ;;  %vm1491_vm8 = vcmp.lt.s32.totalorder %v3669_v63, 2 }
 0x11d   : >> { %v1049_v55 = vclz %v2480_v49  ;;  %v950_v58 = vshll.u32 %v3594_v11, %v3671_v0  ;;  %v951_v33 = vshrl.u32 %v933_v2, %v949_v27  ;;  %v1115_v28 = vshrl.u32 %v2743_v41, %v1100_v45 }
 0x11e   : >> { %v1494_v30 = vsel %vm1492_vm14, %v3231_v31, %v453_v62  ;;  %v1101_v32 = vshrl.u32 %v2738_v26, %v1100_v45  ;;  %v1104_v60 = vor.u32 %v1103_v5, %v1102_v57  ;;  %v1107_v46 = vor.u32 %v1106_v13, %v1105_v35 }
 0x11f   : >> { %v2481_v51 = vadd.s32 4294967294, %v1049_v55  ;;  %v1110_v34 = vor.u32 %v1109_v18, %v1108_v7  ;;  %v1113_v16 = vor.u32 %v1112_v52, %v1111_v54  ;;  %v1116_v24 = vor.u32 %v1115_v28, %v1114_v56 }
 0x120   : >> { %vm1117_vm12 = vcmp.lt.s32.totalorder %v1098_v29, 1  ;;  %v954_v36 = vadd.s32 127, %v953_v22  ;;  %vm1120_vm1 = vcmp.lt.s32.totalorder %v1098_v29, 4  ;;  %vm1495_vm9 = vcmp.eq.s32.totalorder %v3669_v63, 2 }
 0x121   : >> { %vm2482_vm15 = vcmp.lt.s32.totalorder %v2481_v51, 0  ;;  %vm1118_vm13 = vcmp.lt.s32.totalorder %v1098_v29, 2  ;;  %vm1119_vm3 = vcmp.lt.s32.totalorder %v1098_v29, 3  ;;  %v1122_v11 = vsel %vm1120_vm1, %v1110_v34, 2102212464 }
 0x122   : >> { %v1052_v41 = vsel %vm2482_vm15, 0, %v2481_v51  ;;  %v1121_v2 = vsel %vm1117_vm12, %v1101_v32, %v1104_v60  ;;  %v1125_v59 = vsel %vm1117_vm12, %v1104_v60, %v1107_v46  ;;  %v1123_v26 = vsel %vm1119_vm3, %v1107_v46, %v1122_v11 }
 0x123   : >> { %v1053_v0 = vsub.s32 32, %v1052_v41  ;;  %v1057_v62 = vsub.s32 4294967266, %v1052_v41  ;;  %v1126_v45 = vsel %vm1120_vm1, %v1113_v16, 920167782  ;;  %v1129_v27 = vsel %vm1117_vm12, %v1107_v46, %v1110_v34 }
 0x124   : >> { %v1130_v49 = vsel %vm1120_vm1, %v1116_v24, 1326507024  ;;  %v955_v57 = vshll.u32 %v954_v36, 23  ;;  %v1127_v5 = vsel %vm1119_vm3, %v1110_v34, %v1126_v45  ;;  %v1054_v13 = vshll.u32 %v3673_v23, %v1052_v41 }
 0x125   : >> { %v1058_v35 = vadd.s32 127, %v1057_v62  ;;  %v1131_v22 = vsel %vm1119_vm3, %v1113_v16, %v1130_v49  ;;  %v1128_v7 = vsel %vm1118_vm13, %v1125_v59, %v1127_v5  ;;  %v3961_v55 = vxor.u32 2147483648, %v3231_v31 }
 0x126   : >> { %v1132_v54 = vsel %vm1118_vm13, %v1129_v27, %v1131_v22  ;;  %v1055_v52 = vshrl.u32 %v1037_v43, %v1053_v0  ;;  %v1124_v56 = vsel %vm1118_vm13, %v1121_v2, %v1123_v26  ;;  %v952_v32 = vor.u32 %v951_v33, %v950_v58 }
 0x127   : >> { %v1497_v18 = vsel %vm1495_vm9, %v3961_v55, %v3239_v10  ;;  %v3722_v28 = vmul.u32.u64.low %v3688_v3, %v1132_v54  ;;  %v3723_v51 = vmul.u32.u64.high %v3688_v3, %v1132_v54, %v3722_v28  ;;  %v956_v31 = vor.u32 4788187, %v955_v57 }
 0x128   : >> { %v3726_v23 = vmul.u32.u64.low %v3688_v3, %v1128_v7  ;;  %v3727_v60 = vmul.u32.u64.high %v3688_v3, %v1128_v7, %v3726_v23  ;;  %v1498_v46 = vsel %vm1491_vm8, %v1494_v30, %v1497_v18  ;;  %v1059_v34 = vshll.u32 %v1058_v35, 23 }
 0x129   : >> { %vm1595_vm14 = vcmp.lt.s32.totalorder %v3684_v17, 2  ;;  %vm1596_vm12 = vcmp.eq.s32.totalorder %v3684_v17, 0  ;;  %v1140_v10 = vmul.u32 %v3688_v3, %v1124_v56  ;;  %v3962_v43 = vxor.u32 2147483648, %v3380_v39 }
 0x12a   : >> { %vm1599_vm15 = vcmp.eq.s32.totalorder %v3684_v17, 2  ;;  %v1698_v58 = vand.u32 3, %v3679_v25  ;;  %v1056_v33 = vor.u32 %v1055_v52, %v1054_v13  ;;  %vm1142_vm8 = vc.u32 %v3723_v51, %v3726_v23 }
 0x12b   : >> { %v1598_v29 = vsel %vm1596_vm12, %v3375_v50, %v3962_v43  ;;  %v3744_v63 = vsel %vm449_vm0, nan, %v1498_v46  ;;  %v3963_v30 = vxor.u32 2147483648, %v3375_v50  ;;  %v1143_v16 = vadd.s32 1, %v3727_v60 }
 0x12c   : >> { %vm1699_vm1 = vcmp.lt.s32.totalorder %v1698_v58, 2  ;;  %vm1700_vm9 = vcmp.eq.s32.totalorder %v1698_v58, 0  ;;  %v1060_v17 = vor.u32 4788187, %v1059_v34  ;;  %v3964_v36 = vxor.u32 2147483648, %v3445_v12 }
 0x12d   : >> { %v1601_v3 = vsel %vm1599_vm15, %v3963_v30, %v3380_v39  ;;  %vm1703_vm13 = vcmp.eq.s32.totalorder %v1698_v58, 2  ;;  %v1144_v4 = vsel %vm1142_vm8, %v1143_v16, %v3727_v60  ;;  %v2262_v11 = vrot.slane %v3744_v63, 1 }
 0x12e   : >> { %v1602_v24 = vsel %vm1595_vm14, %v1598_v29, %v1601_v3  ;;  %v1702_v41 = vsel %vm1700_vm9, %v3441_v37, %v3964_v36  ;;  %v3965_v50 = vxor.u32 2147483648, %v3441_v37  ;;  %v1145_v62 = vadd.s32 %v1144_v4, %v1140_v10 }
 0x12f   : >> { %v1603_v25 = vsel %vm553_vm2, nan, %v1602_v24  ;;  %v1801_v26 = vadd.s32 3, %v3494_v42  ;;  %v957_v45 = vand.u32 2147483647, %v956_v31  ;;  %v959_v27 = vcvt.s32.f32 %v952_v32 }
 0x130   : >> { %v1705_v39 = vsel %vm1703_vm13, %v3965_v50, %v3445_v12  ;;  %v2265_v0 = vrot.slane %v1603_v25, 6  ;;  %v1146_v49 = vadd.s32 536870912, %v1145_v62  ;;  %v1061_v35 = vand.u32 2147483647, %v1060_v17 }
 0x131   : >> { %v1706_v2 = vsel %vm1699_vm1, %v1702_v41, %v1705_v39  ;;  %v1063_v5 = vcvt.s32.f32 %v1056_v33  ;;  %v1802_v37 = vand.u32 3, %v1801_v26  ;;  %v960_v14 = vmul.f32 %v959_v27, %v957_v45 }
 0x132   : >> { %v1707_v8 = vsel %vm657_vm6, nan, %v1706_v2  ;;  %v2289_v59 = vsel %vm2280_vm5, %v2262_v11, %v2265_v0  ;;  %v3766_v12 = vshrl.u32 %v1146_v49, 30  ;;  %v2292_v18 = vrot.slane %v3665_v40, 5 }
 0x133   : >> { %v2268_v57 = vrot.slane %v1707_v8, 3  ;;  %vm1803_vm0 = vcmp.lt.s32.totalorder %v1802_v37, 2  ;;  %vm1804_vm2 = vcmp.eq.s32.totalorder %v1802_v37, 0  ;;  %vm1807_vm6 = vcmp.eq.s32.totalorder %v1802_v37, 2 }
 0x134   : >> { %v1148_v13 = vshll.u32 %v3766_v12, 30  ;;  %v1806_v42 = vsel %vm1804_vm2, %v3548_v61, %v765_v53  ;;  %v1809_v7 = vsel %vm1807_vm6, %v768_v48, %v3554_v44  ;;  %v1064_v54 = vmul.f32 %v1063_v5, %v1061_v35 }
 0x135   : >> { %v3769_v22 = vsel %vm2282_vm11, %v2289_v59, %v2268_v57  ;;  %v1810_v55 = vsel %vm1803_vm0, %v1806_v42, %v1809_v7  ;;  %v961_v28 = vxor.u32 2147483648, %v960_v14  ;;  %vm879_vm5 = vcmp.lt.s32.totalorder %v3373_v47, 0 }
 0x136   : >> { %v1149_v52 = vsub.s32 %v1145_v62, %v1148_v13  ;;  %v1811_v56 = vsel %vm761_vm4, nan, %v1810_v55  ;;  %v1065_v60 = vxor.u32 2147483648, %v1064_v54  ;;  %vm983_vm11 = vcmp.lt.s32.totalorder %v3406_v1, 0 }
 0x137   : >> { %v3783_v46 = vsel %vm2270_vm7, %v1811_v56, %v2292_v18  ;;  %v3966_v44 = vand.u32 2147483647, %v3373_v47  ;;  %v962_v6 = vsel %vm879_vm5, %v961_v28, %v960_v14  ;;  %v3969_v40 = vand.u32 2147483647, %v3406_v1 }
 0x138   : >> { %v1151_v32 = vsub.s32 0, %v1149_v52  ;;  %v1066_v34 = vsel %vm983_vm11, %v1065_v60, %v1064_v54  ;;  %v1141_v58 = vadd.s32 %v3726_v23, %v3723_v51  ;;  %v1067_v25 = vsub.s32 4, %v3655_v38 }
 0x139   : >> { %vm3788_vm3 = vcmp.le.f32.partialorder %v3966_v44, 0.7853982  ;;  %vm3796_vm4 = vcmp.le.f32.partialorder %v3969_v40, 0.7853982  ;;  %v963_v4 = vsub.s32 4, %v3576_v20  ;;  %vm1087_vm12 = vcmp.lt.s32.totalorder %v3629_v9, 0 }
 0x13a   : >> { %v2484_v61 = vmin.u32 %v1151_v32, %v1149_v52  ;;  %v965_v43 = vsel %vm3788_vm3, %v3373_v47, %v962_v6  ;;  %v1069_v29 = vsel %vm3796_vm4, %v3406_v1, %v1066_v34  ;;  %v1068_v51 = vsel %vm983_vm11, %v1067_v25, %v3655_v38 }
 0x13b   : >> { %2652 = vcosq.f32 %v965_v43  ;;  %v964_v0 = vsel %vm879_vm5, %v963_v4, %v3576_v20  ;;  %v1070_v2 = vsel %vm3796_vm4, 0, %v1068_v51  ;;  %vm3823_vm15 = vcmp.le.f32.partialorder %v1085_v15, 0.7853982 }
 0x13c   : >> { %v1153_v53 = vclz %v2484_v61  ;;  %2654 = vcosq.f32 %v1069_v29  ;;  %v966_v38 = vsel %vm3788_vm3, 0, %v964_v0  ;;  %v1074_v20 = vand.u32 3, %v1070_v2 }
 0x13d   : >> { %2656 = vsinq.f32 %v1069_v29  ;;  %v1171_v57 = vsub.s32 4, %v3766_v12  ;;  %v970_v5 = vand.u32 3, %v966_v38  ;;  %v2009_v32 = vadd.s32 3, %v966_v38 }
 0x13e   : >> { %v2485_v10 = vadd.s32 4294967294, %v1153_v53  ;;  %2658 = vsinq.f32 %v965_v43  ;;  %vm1076_vm8 = vcmp.eq.s32.totalorder %v1074_v20, 0  ;;  %vm1079_vm1 = vcmp.eq.s32.totalorder %v1074_v20, 2 }
 0x13f   : >> { %v1172_v7 = vsel %vm1087_vm12, %v1171_v57, %v3766_v12  ;;  %vm972_vm9 = vcmp.eq.s32.totalorder %v970_v5, 0  ;;  %vm975_vm13 = vcmp.eq.s32.totalorder %v970_v5, 2  ;;  %vm1075_vm0 = vcmp.lt.s32.totalorder %v1074_v20, 2 }
 0x140   : >> { %vm2486_vm14 = vcmp.lt.s32.totalorder %v2485_v10, 0  ;;  %v1174_v18 = vsel %vm3823_vm15, 0, %v1172_v7  ;;  %vm971_vm2 = vcmp.lt.s32.totalorder %v970_v5, 2  ;;  %vm1073_vm6 = vweird.f32 %v3406_v1 }
 0x141   : >> { %v1156_v33 = vsel %vm2486_vm14, 0, %v2485_v10  ;;  %v2217_v60 = vadd.s32 3, %v1174_v18  ;;  %v1178_v44 = vand.u32 3, %v1174_v18  ;;  %vm969_vm5 = vweird.f32 %v3373_v47 }
 0x142   : >> { %v1157_v30 = vsub.s32 32, %v1156_v33  ;;  %v1158_v3 = vshll.u32 %v1149_v52, %v1156_v33  ;;  %v1161_v16 = vsub.s32 4294967266, %v1156_v33  ;;  %v2113_v52 = vadd.s32 3, %v1070_v2 }
 0x143   : >> { %v2010_v6 = vand.u32 3, %v2009_v32  ;;  %v2218_v40 = vand.u32 3, %v2217_v60  ;;  %v2256_v34 = vrot.slane %v3130_v19, 7  ;;  %vm1177_vm11 = vweird.f32 %v3629_v9 }
 0x144   : >> { %v1159_v24 = vshrl.u32 %v1141_v58, %v1157_v30  ;;  %v1162_v17 = vadd.s32 127, %v1161_v16  ;;  %v2114_v48 = vand.u32 3, %v2113_v52  ;;  %vm1183_vm3 = vcmp.eq.s32.totalorder %v1178_v44, 2 }
 0x145   : >> { %vm1180_vm4 = vcmp.eq.s32.totalorder %v1178_v44, 0 }
 0x146   : >> { %v1160_v36 = vor.u32 %v1159_v24, %v1158_v3  ;;  %v1163_v41 = vshll.u32 %v1162_v17, 23  ;;  %vm2116_vm14 = vcmp.eq.s32.totalorder %v2114_v48, 0  ;;  %v2259_v24 = vcombine.low %v3178_v21, %v3178_v21 }
 0x148   : >> { %v1164_v50 = vor.u32 4788187, %v1163_v41  ;;  %v1167_v39 = vcvt.s32.f32 %v1160_v36  ;;  %v3827_v26 = vpop.eup %2652 }
 0x149   : >> { %v2655_v45 = vpop.eup %2654  ;;  %v976_v42 = vxor.u32 2147483648, %v3827_v26 }
 0x14a   : >> { %v1165_v23 = vand.u32 2147483647, %v1164_v50  ;;  %v2657_v49 = vpop.eup %2656  ;;  %v1080_v14 = vxor.u32 2147483648, %v2655_v45 }
 0x14b   : >> { %v2659_v35 = vpop.eup %2658  ;;  %v1077_v37 = vxor.u32 2147483648, %v2657_v49 }
 0x14c   : >> { %v1168_v62 = vmul.f32 %v1167_v39, %v1165_v23  ;;  %v973_v13 = vxor.u32 2147483648, %v2659_v35  ;;  %v1081_v55 = vsel %vm1079_vm1, %v1080_v14, %v2657_v49  ;;  %v977_v28 = vsel %vm975_vm13, %v976_v42, %v2659_v35 }
 0x14d   : >> { %v1078_v54 = vsel %vm1076_vm8, %v2655_v45, %v1077_v37  ;;  %vm2012_vm8 = vcmp.eq.s32.totalorder %v2010_v6, 0  ;;  %vm2015_vm1 = vcmp.eq.s32.totalorder %v2010_v6, 2  ;;  %vm2220_vm13 = vcmp.eq.s32.totalorder %v2218_v40, 0 }
 0x14e   : >> { %v1169_v59 = vxor.u32 2147483648, %v1168_v62  ;;  %v974_v56 = vsel %vm972_vm9, %v3827_v26, %v973_v13  ;;  %v1082_v61 = vsel %vm1075_vm0, %v1078_v54, %v1081_v55  ;;  %vm2115_vm9 = vcmp.lt.s32.totalorder %v2114_v48, 2 }
 0x14f   : >> { %v978_v12 = vsel %vm971_vm2, %v974_v56, %v977_v28  ;;  %v1083_v53 = vsel %vm1073_vm6, nan, %v1082_v61  ;;  %v2118_v3 = vsel %vm2116_vm14, %v2655_v45, %v1077_v37  ;;  %vm2223_vm0 = vcmp.eq.s32.totalorder %v2218_v40, 2 }
 0x150   : >> { %v1170_v27 = vsel %vm1087_vm12, %v1169_v59, %v1168_v62  ;;  %v979_v10 = vsel %vm969_vm5, nan, %v978_v12  ;;  %vm2119_vm12 = vcmp.eq.s32.totalorder %v2114_v48, 2  ;;  %v2250_v33 = vrot.slane %v1083_v53, 5 }
 0x151   : >> { %v1173_v15 = vsel %vm3823_vm15, %v3629_v9, %v1170_v27  ;;  %vm1179_vm15 = vcmp.lt.s32.totalorder %v1178_v44, 2  ;;  %v2121_v16 = vsel %vm2119_vm12, %v1080_v14, %v2657_v49  ;;  %vm2011_vm2 = vcmp.lt.s32.totalorder %v2010_v6, 2 }
 0x152   : >> { %2660 = vcosq.f32 %v1173_v15  ;;  %v2014_v25 = vsel %vm2012_vm8, %v3827_v26, %v973_v13  ;;  %v2284_v41 = vsel %vm2270_vm7, %v979_v10, %v2250_v33  ;;  %v2017_v4 = vsel %vm2015_vm1, %v976_v42, %v2659_v35 }
 0x153   : >> { %2662 = vsinq.f32 %v1173_v15  ;;  %v2122_v39 = vsel %vm2115_vm9, %v2118_v3, %v2121_v16  ;;  %v2018_v21 = vsel %vm2011_vm2, %v2014_v25, %v2017_v4  ;;  %vm3975_vm14 = vcmask 1043456  }
 0x154   : >> { %v2123_v8 = vsel %vm1073_vm6, nan, %v2122_v39  ;;  %vm3976_vm7 = vcmask 1046528   ;;  %v2019_v38 = vsel %vm969_vm5, nan, %v2018_v21  ;;  %vm3978_vm6 = vmmov %vm3975_vm14  ;;  %vm2341_vm5 = vcmask 515072  }
 0x155   : >> { %v2298_v20 = vrot.slane %v2123_v8, 7  ;;  %v2295_v27 = vrot.slane %v2019_v38, 2 }
 0x157   : >> { %v2304_v57 = vsel %vm2272_vm10, %v3783_v46, %v2295_v27 }
 0x15f   : >> { %v2661_v31 = vpop.eup %2660 }
 0x160   : >> { %v2663_v43 = vpop.eup %2662  ;;  %v1184_v29 = vxor.u32 2147483648, %v2661_v31 }
 0x161   : >> { %v1181_v58 = vxor.u32 2147483648, %v2663_v43 }
 0x162   : >> { %v1185_v30 = vsel %vm1183_vm3, %v1184_v29, %v2663_v43  ;;  %vm2219_vm3 = vcmp.lt.s32.totalorder %v2218_v40, 2  ;;  %v2225_v23 = vsel %vm2223_vm0, %v1184_v29, %v2663_v43 }
 0x163   : >> { %v1182_v19 = vsel %vm1180_vm4, %v2661_v31, %v1181_v58  ;;  %v2222_v51 = vsel %vm2220_vm13, %v2661_v31, %v1181_v58  ;;  %vm3974_vm4 = vcmask 1040384  }
 0x164   : >> { %v1186_v17 = vsel %vm1179_vm15, %v1182_v19, %v1185_v30  ;;  %v2226_v59 = vsel %vm2219_vm3, %v2222_v51, %v2225_v23  ;;  %vm3977_vm12 = vmmov %vm3974_vm4 }
 0x165   : >> { %v1187_v36 = vsel %vm1177_vm11, nan, %v1186_v17  ;;  %v2227_v45 = vsel %vm1177_vm11, nan, %v2226_v59  ;;  %v2305_v1 = vsel %vm3977_vm12, %v2295_v27, %v2298_v20  ;;  %vm3979_vm15 = vmmov %vm3976_vm7 }
 0x166   : >> { %v2253_v50 = vrot.slane %v1187_v36, 2  ;;  %v2301_v49 = vcombine.low %v2227_v45, %v2227_v45 }
 0x168   : >> { %v2285_v0 = vsel %vm2272_vm10, %v2284_v41, %v2253_v50  ;;  %v2286_v62 = vsel %vm3974_vm4, %v2253_v50, %v2256_v34  ;;  %v2306_v63 = vsel %vm3978_vm6, %v2305_v1, %v2301_v49 }
 0x169   : >> { %2311 = vxpose.xlu0.b32.cont [4/8] (short) %v2285_v0, 128  ;;  %v2287_v2 = vsel %vm3975_vm14, %v2286_v62, %v2259_v24  ;;  %v2307_v47 = vsel %vm3979_vm15, %v2306_v63, 0.0 }
 0x16a   : >> { %v2288_v26 = vsel %vm3976_vm7, %v2287_v2, %v2262_v11 }
 0x16d   : >> { %2312 = vxpose.xlu0.b32.cont [5/8] (short) %v2288_v26, 128 }
 0x171   : >> { %2313 = vxpose.xlu0.b32.cont [6/8] (short) %v3769_v22, 128 }
 0x175   : >> { %2314 = vxpose.xlu0.b32.cont [7/8] (short) %v2304_v57, 128 }
 0x179   : >> { %2315 = vxpose.xlu0.b32.end [8/8] (short) %v2307_v47, 128 }
 0x1d9   : >> { %v2324_v9 = vpop.trf.xlu0 }
 0x1da   : >> { %2342 = vst.msk [vmem:[%s3879_s25] sm:$0xff] %vm2341_vm5, %v2324_v9 }
 0x1dd   : >> { %v2325_v11 = vpop.trf.xlu0 }
 0x1de   : >> { %2343 = vst.msk [vmem:[%s3879_s25 + $0x8] sm:$0xff] %vm2341_vm5, %v2325_v11 }
 0x1e1   : >> { %v2326_v22 = vpop.trf.xlu0 }
 0x1e2   : >> { %2344 = vst.msk [vmem:[%s3879_s25 + $0x10] sm:$0xff] %vm2341_vm5, %v2326_v22 }
 0x1e5   : >> { %v2327_v46 = vpop.trf.xlu0 }
 0x1e6   : >> { %2345 = vst.msk [vmem:[%s3879_s25 + $0x18] sm:$0xff] %vm2341_vm5, %v2327_v46 }
 0x1e9   : >> { %v2328_v15 = vpop.trf.xlu0 }
 0x1ea   : >> { %2346 = vst.msk [vmem:[%s3879_s25 + $0x20] sm:$0xff] %vm2341_vm5, %v2328_v15 }
 0x1ed   : >> { %v2329_v35 = vpop.trf.xlu0 }
 0x1ee   : >> { %2347 = vst.msk [vmem:[%s3879_s25 + $0x28] sm:$0xff] %vm2341_vm5, %v2329_v35 }
 0x1f1   : >> { %v2330_v5 = vpop.trf.xlu0 }
 0x1f2   : >> { %2348 = vst.msk [vmem:[%s3879_s25 + $0x30] sm:$0xff] %vm2341_vm5, %v2330_v5 }
 0x1f5   : >> { %v2331_v37 = vpop.trf.xlu0 }
 0x1f6   : >> { %2349 = vst.msk [vmem:[%s3879_s25 + $0x38] sm:$0xff] %vm2341_vm5, %v2331_v37 }
 0x1f9   : >> { %v2332_v14 = vpop.trf.xlu0 }
 0x1fa   : >> { %2350 = vst.msk [vmem:[%s3879_s25 + $0x40] sm:$0xff] %vm2341_vm5, %v2332_v14 }
 0x1fd   : >> { %v2333_v13 = vpop.trf.xlu0 }
 0x1fe   : >> { %2351 = vst.msk [vmem:[%s3879_s25 + $0x48] sm:$0xff] %vm2341_vm5, %v2333_v13 }
 0x201   : >> { %v2334_v42 = vpop.trf.xlu0 }
 0x202   : >> { %2352 = vst.msk [vmem:[%s3879_s25 + $0x50] sm:$0xff] %vm2341_vm5, %v2334_v42 }
 0x205   : >> { %v2335_v7 = vpop.trf.xlu0 }
 0x206   : >> { %2353 = vst.msk [vmem:[%s3879_s25 + $0x58] sm:$0xff] %vm2341_vm5, %v2335_v7 }
 0x209   : >> { %v2336_v54 = vpop.trf.xlu0 }
 0x20a   : >> { %2354 = vst.msk [vmem:[%s3879_s25 + $0x60] sm:$0xff] %vm2341_vm5, %v2336_v54 }
 0x20d   : >> { %v2337_v55 = vpop.trf.xlu0 }
 0x20e   : >> { %2355 = vst.msk [vmem:[%s3879_s25 + $0x68] sm:$0xff] %vm2341_vm5, %v2337_v55 }
 0x211   : >> { %v2338_v18 = vpop.trf.xlu0 }
 0x212   : >> { %2356 = vst.msk [vmem:[%s3879_s25 + $0x70] sm:$0xff] %vm2341_vm5, %v2338_v18  ;;  %141 = sbr.rel (!%p139_p9) target bundleno = 52 (0x34), region = 73 }
 0x215   : >> { %v2339_v52 = vpop.trf.xlu0 }
 0x216   : >> { %2357 = vst.msk [vmem:[%s3879_s25 + $0x78] sm:$0xff] %vm2341_vm5, %v2339_v52 }
 0x217 PF: > { %p11_p10 = scmp.ge.s32.totalorder %s2774_s11, 4   ;;  %s3980_s6 = smov %s2723_s7 }
 0x218   : > { %s3981_s7 = smov %s2727_s8  ;;  %s3982_s8 = smov %s2784_s14 }
 0x219   : > { %s3983_s9 = smov %s2774_s11  ;;  %13 = sbr.rel (!%p11_p10) target bundleno = 3 (0x3), region = 84 }
 0x21e   :  { %2380 = vsyncpa [#allocation3], 1 }
 0x21f   :  { %2382 = vsyncpa [#allocation3 + $0x1], 1 }

// kernel: tpu_custom_call.1
= control target key start
LH: loop header
LB: loop body
LE: loop exit
PB: predicated region body
PF: predicated region fallthrough
CT: control target
= control target key end

     0   :  { %6 = vsyncpa [#allocation3], 0  ;;  %s3981_s0 = inlined_call_operand.hbm [shape: f32[3,512], index: 0, kind: input, shape index: {}]   ;;  %s3982_s1 = inlined_call_operand.hbm [shape: f32[63,512], index: 1, kind: output, shape index: {}]  }
   0x1   :  { %8 = vsyncpa [#allocation3 + $0x1], 0 }
   0x2   :  { %9 = vsyncpa [#allocation4], 0 }
   0x3   :  { %11 = vsyncpa [#allocation4 + $0x1], 0  ;;  %s2769_s6 = smov 0   ;;  %s2771_s7 = smov 0  }
   0x4   :  { %s2773_s8 = smov 0   ;;  %s2775_s9 = smov 0  }
   0x5 LB: > { %s2790_s10 = sadd.s32 4294967295, %s2742_s9   ;;  %s2404_s11 = sadd.s32 4294967294, %s2742_s9   ;;  %s2742_s9 = sphi %s2775_s9, %s4062_s9   ;;  %s2738_s8 = sphi %s2773_s8, %s4061_s8   ;;  %s2734_s7 = sphi %s2771_s7, %s4060_s7   ;;  %s2730_s6 = sphi %s2769_s6, %s4059_s6  }
   0x6   : > { %s2794_s12 = sadd.s32 1, %s2742_s9   ;;  %s24_s13 = sadd.s32 1, %s2738_s8 }
   0x7   : > { %s21_s14 = ssub.s32 %s2742_s9, %s2794_s12  ;;  %p31_p0 = scmp.ne.s32.totalorder %s2738_s8, %s2734_s7 }
   0x8   : > { %p22_p1 = scmp.eq.s32.totalorder %s21_s14, 0  ;;  %p32_p2 = scmp.eq.s32.totalorder %s2742_s9, 0 }
   0x9   : > { %p37_p3 = scmp.ne.s32.totalorder %s2734_s7, %s2730_s6  ;;  %p38_p4 = scmp.eq.s32.totalorder %s2790_s10, 0 }
   0xa   : > { %s2806_s15 = scalar_select %p22_p1, %s2738_s8, %s24_s13  }
   0xb   : > { %p2808_p5 = por %p32_p2, %p31_p0  ;;  %p2812_p6 = por %p38_p4, %p37_p3 }
   0xc   : > { %p61_p7 = scmp.eq.s32.totalorder %s2790_s10, 1  ;;  %p67_p8 = scmp.eq.s32.totalorder %s2404_s11, 1 }
   0xd   : > { %s4009_s17 = scalar_select %p2812_p6, 1, 0 }
   0xe   : > { %p2555_p10 = scmp.lt.s32.totalorder %s2742_s9, 2  ;;  %p2819_p11 = por %p61_p7, %p31_p0 }
   0xf   : > { %p2823_p12 = por %p67_p8, %p37_p3  ;;  %s87_s20 = sand.u32 1, %s2738_s8  }
  0x10   : > { %s4010_s18 = scalar_select %p2819_p11, 1, 0 }
  0x11   : > { %s4011_s19 = scalar_select %p2823_p12, 1, 0 }
  0x12   : > { %s2501_s21 = sshll.u32 %s2742_s9, 7  ;;  %s2407_s22 = sshll.u32 %s87_s20, 3 }
  0x13   : > { %s2832_s25 = scalar_lea.hbm %s3981_s0, %s2501_s21  ;;  %s91_s26 = scalar_lea.vmem [#allocation2], %s2407_s22 }
  0x14   : > { %s99_s27 = sshll.u32 %s91_s26, 4  ;;  %p2836_p13 = pnand %p2555_p10, %p2808_p5  ;;  %s2840_s27 = int_to_ptr.vmem [resolvable:$true] %s99_s27 }
  0x15   : > { %s88_s29 = scalar_lea.sflag [#allocation3], %s87_s20  ;;  %s2646_s30 = scalar_lea.hbm %s2832_s25, 128 }
  0x16   : > { %p2647_p2 = scmp.ne.s32.totalorder %s2832_s25, %s2646_s30  ;;  %p2648_p3 = pneg %p2836_p13 }
  0x17   : > { %s2651_s4 = scalar_lea.hbm %s3981_s0, 256  ;;  %p2652_p5 = scmp.lt.s32.totalorder %s2832_s25, %s3981_s0 }
  0x18   : > { %p2649_p4 = pnand %p2648_p3, %p2647_p2  ;;  %p2653_p8 = scmp.lt.s32.totalorder %s2651_s4, %s2646_s30 }
  0x1a   : > { %p2650_p7 = pneg %p2649_p4  ;;  %p2654_p10 = por %p2653_p8, %p2652_p5 }
  0x1c   : > { %p2655_p9 = pnand %p2654_p10, %p2650_p7 }
  0x1e   : > { %2658 = shalt.err (!%p2655_p9)
}
  0x1f   : > { %s2659_s13 = scalar_lea.vmem %s2840_s27, 128  ;;  %s2748_s14 = smov [#allocation2]  }
  0x20   : > { %p2660_p0 = scmp.ne.s32.totalorder %s2840_s27, %s2659_s13  ;;  %s2664_s16 = sshll.u32 %s2748_s14, 4  ;;  %s2665_s16 = int_to_ptr.vmem [resolvable:$false] %s2664_s16 }
  0x21   : > { %s2666_s20 = scalar_lea.vmem %s2665_s16, 256  ;;  %p2667_p4 = scmp.lt.s32.totalorder %s2840_s27, %s2665_s16 }
  0x22   : > { %p2662_p1 = pnand %p2660_p0, %p2648_p3  ;;  %p2668_p12 = scmp.lt.s32.totalorder %s2666_s20, %s2659_s13 }
  0x24   : > { %p2663_p2 = pneg %p2662_p1  ;;  %p2669_p11 = por %p2668_p12, %p2667_p4 }
  0x26   : > { %p2670_p6 = pnand %p2669_p11, %p2663_p2 }
  0x28   : > { %2673 = shalt.err (!%p2670_p6)
}
  0x29   : > { %2550 = dma.hbm_to_vmem [thread:$0]  (!%p2836_p13), %s2832_s25, 128, %s2840_s27, %s88_s29  }
  0x2a   : > { %p4013_p9 = scmp.lt.s32.totalorder %s2742_s9, 3  ;;  %p4014_p7 = scmp.ge.s32.totalorder %s2742_s9, 1 }
  0x2c   : > { %p105_p0 = pnand %p4014_p7, %p4013_p9 }
  0x2d   : > { %s2867_s21 = sand.u32 (!%p105_p0), 1, %s2734_s7   ;;  %p4015_p6 = scmp.ne.s32.totalorder (!%p105_p0), %s4009_s17, 0 }
  0x2e   : > { %108 = sbr.rel (%p105_p0) target bundleno = 375 (0x177), region = 24  ;;  %s2411_s22 = sshll.u32 (!%p105_p0), %s2867_s21, 3 }
  0x2f   : > { %s111_s23 = scalar_lea.sflag (!%p105_p0), [#allocation3], %s2867_s21  ;;  %s2871_s24 = scalar_lea.vmem (!%p105_p0), [#allocation2], %s2411_s22 }
  0x33   : > { %2721 = dma.done.wait (%p4015_p6), %s111_s23, 128  }
  0x34   : > { %2723 = vsyncadd (%p4015_p6), %s111_s23, 4294967168  ;;  %s2412_s25 = sshll.u32 %s2867_s21, 7  ;;  %s2880_s27 = smov 0  }
  0x35   : > { %s2878_s26 = scalar_lea.vmem [#allocation5], %s2412_s25 }
  0x36 LB: >> { %s2413_s28 = sshll.u32 %s2746_s27, 7  ;;  %v2749_v27 = vmov 683565275   ;;  %v2750_v29 = vmov 2475754826   ;;  %s140_s27 = sadd.s32 1, %s2746_s27   ;;  %s2746_s27 = sphi %s2880_s27, %s140_s27  }
  0x37   : >> { %s142_s29 = sshra.s32 %s2413_s28, 7  ;;  %v2751_v31 = vmov 2131351028   ;;  %v3998_v33 = vmov 2102212464   ;;  %p137_p11 = scmp.ge.s32.totalorder %s140_s27, 2  }
  0x38   : >> { %s2414_s30 = sshll.u32 %s142_s29, 2  ;;  %s2415_s2 = sshll.u32 %s142_s29, 3  ;;  %v2753_v35 = vmov 920167782   ;;  %v4000_v42 = vmov 1326507024  }
  0x39   : >> { %s145_s17 = scalar_lea.vmem %s2871_s24, %s2414_s30 [#allocation2]  ;;  %s2888_s3 = scalar_lea.vmem %s2878_s26, %s2415_s2 [#allocation5] }
  0x3a   : >> { %v2890_v0 = vld [vmem:[%s145_s17] sm:$0x7]  ;;  %s2502_s4 = sshll.u32 (%p137_p11), %s2790_s10, 8  ;;  %s2322_s14 = sshll.u32 (%p137_p11), %s2878_s26, 4  ;;  %s3938_s14 = int_to_ptr.vmem [resolvable:$true] %s2322_s14 }
  0x3b   : >> { %149 = vst [vmem:[%s2888_s3] sm:$0x7] %v2890_v0  ;;  %v150_v1 = vand.u32 2147483647, %v2890_v0  ;;  %v153_v2 = vand.u32 2139095040, %v2890_v0  ;;  %v2897_v3 = vmul.f32 1.8888888, %v2890_v0  ;;  %s3935_s13 = scalar_lea.hbm (%p137_p11), %s3982_s1, %s2502_s4 }
  0x3c   : >> { %v2900_v4 = vmul.f32 2.7777777, %v2890_v0  ;;  %s2309_s16 = scalar_lea.sflag (%p137_p11), [#allocation4], %s2867_s21  ;;  %s2674_s20 = scalar_lea.vmem (%p137_p11), %s3938_s14, 2048 }
  0x3d   : >> { %v154_v5 = vshrl.u32 %v153_v2, 23  ;;  %v157_v6 = vand.u32 8388607, %v150_v1  ;;  %v258_v7 = vand.u32 2147483647, %v2897_v3  ;;  %v261_v8 = vand.u32 2139095040, %v2897_v3  ;;  %p2675_p12 = scmp.ne.s32.totalorder (%p137_p11), %s3938_s14, %s2674_s20 }
  0x3e   : >> { %v370_v12 = vand.u32 2139095040, %v2900_v4  ;;  %v367_v22 = vand.u32 2147483647, %v2900_v4  ;;  %p4056_p13 = scmp.ne.s32.totalorder (%p137_p11), %s4010_s18, 0  ;;  %s2755_s22 = smov (%p137_p11), [#allocation5]  }
  0x3f   : >> { %v2416_v9 = vadd.s32 4294967169, %v154_v5  ;;  %v262_v10 = vshrl.u32 %v261_v8, 23  ;;  %v265_v11 = vand.u32 8388607, %v258_v7  ;;  %v158_v14 = vor.u32 8388608, %v157_v6  ;;  %s2678_s23 = sshll.u32 (%p137_p11), %s2755_s22, 4  ;;  %s2679_s23 = int_to_ptr.vmem [resolvable:$false] %s2678_s23 }
  0x40   : >> { %v371_v17 = vshrl.u32 %v370_v12, 23  ;;  %p2676_p1 = pnand (%p137_p11), %p2675_p12, %p4056_p13  ;;  %s2680_s10 = scalar_lea.vmem (%p137_p11), %s2679_s23, 4096 }
  0x41   : >> { %v160_v13 = vadd.s32 1, %v2416_v9  ;;  %v2420_v15 = vadd.s32 4294967169, %v262_v10  ;;  %v266_v16 = vor.u32 8388608, %v265_v11  ;;  %v2910_v23 = vshll.u32 %v158_v14, 8  ;;  %p2681_p5 = scmp.lt.s32.totalorder (%p137_p11), %s3938_s14, %s2679_s23  ;;  %p2682_p8 = scmp.lt.s32.totalorder (%p137_p11), %s2680_s10, %s2674_s20 }
  0x42   : >> { %v2914_v25 = vadd.s32 4294967169, %v371_v17  ;;  %p2677_p3 = pneg (%p137_p11), %p2676_p1 }
  0x43   : >> { %vm161_vm0 = vcmp.gt.s32.totalorder %v160_v13, 0  ;;  %v268_v19 = vadd.s32 1, %v2420_v15  ;;  %v2912_v24 = vshll.u32 %v266_v16, 8  ;;  %p2683_p10 = por (%p137_p11), %p2682_p8, %p2681_p5 }
  0x44   : >> { %v162_v18 = vsel %vm161_vm0, %v160_v13, 0 }
  0x45   : >> { %v163_v20 = vshrl.u32 %v162_v18, 5  ;;  %v164_v21 = vand.u32 31, %v162_v18  ;;  %vm269_vm1 = vcmp.gt.s32.totalorder %v268_v19, 0  ;;  %p2684_p2 = pnand (%p137_p11), %p2683_p10, %p2677_p3 }
  0x46   : >> { %v270_v47 = vsel %vm269_vm1, %v268_v19, 0 }
  0x47   : >> { %v165_v26 = vsub.s32 32, %v164_v21  ;;  %v167_v28 = vshll.u32 %v2749_v27, %v164_v21  ;;  %v170_v30 = vshll.u32 %v2750_v29, %v164_v21  ;;  %v173_v32 = vshll.u32 %v2751_v31, %v164_v21 }
  0x48   : >> { %v176_v34 = vshll.u32 %v3998_v33, %v164_v21  ;;  %v179_v36 = vshll.u32 %v2753_v35, %v164_v21  ;;  %vm182_vm2 = vcmp.lt.s32.totalorder %v163_v20, 1  ;;  %vm183_vm3 = vcmp.lt.s32.totalorder %v163_v20, 2 }
  0x49   : >> { %v166_v37 = vshrl.u32 %v2749_v27, %v165_v26  ;;  %v168_v38 = vshrl.u32 %v2750_v29, %v165_v26  ;;  %v171_v39 = vshrl.u32 %v2751_v31, %v165_v26  ;;  %v174_v40 = vshrl.u32 %v3998_v33, %v165_v26 }
  0x4a   : >> { %v177_v41 = vshrl.u32 %v2753_v35, %v165_v26  ;;  %v180_v43 = vshrl.u32 %v4000_v42, %v165_v26  ;;  %vm184_vm4 = vcmp.lt.s32.totalorder %v163_v20, 3  ;;  %vm185_vm5 = vcmp.lt.s32.totalorder %v163_v20, 4 }
  0x4b   : >> { %v169_v44 = vor.u32 %v168_v38, %v167_v28  ;;  %v172_v45 = vor.u32 %v171_v39, %v170_v30  ;;  %v175_v46 = vor.u32 %v174_v40, %v173_v32  ;;  %v271_v50 = vshrl.u32 %v270_v47, 5 }
  0x4c   : >> { %v178_v48 = vor.u32 %v177_v41, %v176_v34  ;;  %v181_v49 = vor.u32 %v180_v43, %v179_v36  ;;  %v272_v51 = vand.u32 31, %v270_v47  ;;  %v377_v32 = vadd.s32 1, %v2914_v25 }
  0x4d   : >> { %v186_v52 = vsel %vm182_vm2, %v166_v37, %v169_v44  ;;  %v187_v53 = vsel %vm185_vm5, %v175_v46, 2102212464  ;;  %v190_v54 = vsel %vm182_vm2, %v169_v44, %v172_v45  ;;  %v194_v55 = vsel %vm182_vm2, %v172_v45, %v175_v46 }
  0x4e   : >> { %v188_v56 = vsel %vm184_vm4, %v172_v45, %v187_v53  ;;  %v191_v57 = vsel %vm185_vm5, %v178_v48, 920167782  ;;  %v195_v58 = vsel %vm185_vm5, %v181_v49, 1326507024  ;;  %v273_v59 = vsub.s32 32, %v272_v51 }
  0x4f   : >> { %v189_v60 = vsel %vm183_vm3, %v186_v52, %v188_v56  ;;  %v192_v61 = vsel %vm184_vm4, %v175_v46, %v191_v57  ;;  %v196_v62 = vsel %vm184_vm4, %v178_v48, %v195_v58  ;;  %v275_v63 = vshll.u32 %v2749_v27, %v272_v51 }
  0x50   : >> { %v193_v2 = vsel %vm183_vm3, %v190_v54, %v192_v61  ;;  %v197_v5 = vsel %vm183_vm3, %v194_v55, %v196_v62  ;;  %v205_v6 = vmul.u32 %v2910_v23, %v189_v60  ;;  %v274_v8 = vshrl.u32 %v2749_v27, %v273_v59 }
  0x51   : >> { %v2941_v9 = vmul.u32.u64.low %v2910_v23, %v197_v5  ;;  %v2942_v10 = vmul.u32.u64.high %v2910_v23, %v197_v5, %v2941_v9  ;;  %v2945_v11 = vmul.u32.u64.low %v2910_v23, %v193_v2  ;;  %v2946_v12 = vmul.u32.u64.high %v2910_v23, %v193_v2, %v2945_v11 }
  0x52   : >> { %v276_v13 = vshrl.u32 %v2750_v29, %v273_v59  ;;  %v278_v14 = vshll.u32 %v2750_v29, %v272_v51  ;;  %v279_v15 = vshrl.u32 %v2751_v31, %v273_v59  ;;  %v281_v16 = vshll.u32 %v2751_v31, %v272_v51 }
  0x53   : >> { %v282_v17 = vshrl.u32 %v3998_v33, %v273_v59  ;;  %v284_v18 = vshll.u32 %v3998_v33, %v272_v51  ;;  %v285_v19 = vshrl.u32 %v2753_v35, %v273_v59  ;;  %v287_v20 = vshll.u32 %v2753_v35, %v272_v51 }
  0x54   : >> { %v277_v21 = vor.u32 %v276_v13, %v275_v63  ;;  %v280_v23 = vor.u32 %v279_v15, %v278_v14  ;;  %v288_v26 = vshrl.u32 %v4000_v42, %v273_v59  ;;  %vm290_vm6 = vcmp.lt.s32.totalorder %v271_v50, 1 }
  0x55   : >> { %vm207_vm7 = vc.u32 %v2942_v10, %v2945_v11  ;;  %v208_v28 = vadd.s32 1, %v2946_v12  ;;  %v283_v30 = vor.u32 %v282_v17, %v281_v16  ;;  %v286_v34 = vor.u32 %v285_v19, %v284_v18 }
  0x56   : >> { %v289_v36 = vor.u32 %v288_v26, %v287_v20  ;;  %vm291_vm8 = vcmp.lt.s32.totalorder %v271_v50, 2  ;;  %vm292_vm9 = vcmp.lt.s32.totalorder %v271_v50, 3  ;;  %vm293_vm10 = vcmp.lt.s32.totalorder %v271_v50, 4 }
  0x57   : >> { %v209_v37 = vsel %vm207_vm7, %v208_v28, %v2946_v12  ;;  %v294_v38 = vsel %vm290_vm6, %v274_v8, %v277_v21  ;;  %v298_v39 = vsel %vm290_vm6, %v277_v21, %v280_v23  ;;  %v295_v41 = vsel %vm293_vm10, %v283_v30, 2102212464 }
  0x58   : >> { %v210_v40 = vadd.s32 %v209_v37, %v205_v6  ;;  %v299_v43 = vsel %vm293_vm10, %v286_v34, 920167782  ;;  %v302_v44 = vsel %vm290_vm6, %v280_v23, %v283_v30  ;;  %v296_v45 = vsel %vm292_vm9, %v280_v23, %v295_v41 }
  0x59   : >> { %v300_v46 = vsel %vm292_vm9, %v283_v30, %v299_v43  ;;  %v303_v47 = vsel %vm293_vm10, %v289_v36, 1326507024  ;;  %vm378_vm11 = vcmp.gt.s32.totalorder %v377_v32, 0  ;;  %v374_v51 = vand.u32 8388607, %v367_v22 }
  0x5a   : >> { %v211_v25 = vadd.s32 536870912, %v210_v40  ;;  %v301_v48 = vsel %vm291_vm8, %v298_v39, %v300_v46  ;;  %v304_v49 = vsel %vm292_vm9, %v286_v34, %v303_v47  ;;  %v297_v52 = vsel %vm291_vm8, %v294_v38, %v296_v45 }
  0x5b   : >> { %v305_v53 = vsel %vm291_vm8, %v302_v44, %v304_v49  ;;  %v2972_v54 = vmul.u32.u64.low %v2912_v24, %v301_v48  ;;  %v2973_v55 = vmul.u32.u64.high %v2912_v24, %v301_v48, %v2972_v54  ;;  %v379_v59 = vsel %vm378_vm11, %v377_v32, 0 }
  0x5c   : >> { %v2976_v56 = vshrl.u32 %v211_v25, 30  ;;  %v2979_v57 = vmul.u32.u64.low %v2912_v24, %v305_v53  ;;  %v2980_v58 = vmul.u32.u64.high %v2912_v24, %v305_v53, %v2979_v57  ;;  %v381_v60 = vand.u32 31, %v379_v59 }
  0x5d   : >> { %v313_v62 = vmul.u32 %v2912_v24, %v297_v52  ;;  %v316_v50 = vadd.s32 1, %v2973_v55  ;;  %v375_v5 = vor.u32 8388608, %v374_v51  ;;  %v2992_v9 = vmul.f32 3.6666667, %v2890_v0 }
  0x5e   : >> { %v213_v61 = vshll.u32 %v2976_v56, 30  ;;  %v382_v63 = vsub.s32 32, %v381_v60  ;;  %vm315_vm12 = vc.u32 %v2980_v58, %v2972_v54  ;;  %v384_v8 = vshll.u32 %v2749_v27, %v381_v60 }
  0x5f   : >> { %v317_v6 = vsel %vm315_vm12, %v316_v50, %v2973_v55  ;;  %v387_v14 = vshll.u32 %v2750_v29, %v381_v60  ;;  %v390_v16 = vshll.u32 %v2751_v31, %v381_v60  ;;  %v393_v18 = vshll.u32 %v3998_v33, %v381_v60 }
  0x60   : >> { %v2985_v2 = vsub.s32 %v210_v40, %v213_v61  ;;  %v318_v13 = vadd.s32 %v317_v6, %v313_v62  ;;  %v385_v24 = vshrl.u32 %v2750_v29, %v382_v63  ;;  %v388_v15 = vshrl.u32 %v2751_v31, %v382_v63 }
  0x61   : >> { %v391_v17 = vshrl.u32 %v3998_v33, %v382_v63  ;;  %v380_v20 = vshrl.u32 %v379_v59, 5  ;;  %v3002_v21 = vshll.u32 %v375_v5, 8  ;;  %v475_v23 = vand.u32 2147483647, %v2992_v9 }
  0x62   : >> { %v216_v12 = vsub.s32 0, %v2985_v2  ;;  %v319_v26 = vadd.s32 536870912, %v318_v13  ;;  %v383_v28 = vshrl.u32 %v2749_v27, %v382_v63  ;;  %v394_v30 = vshrl.u32 %v2753_v35, %v382_v63 }
  0x63   : >> { %v478_v32 = vand.u32 2139095040, %v2992_v9  ;;  %v386_v36 = vor.u32 %v385_v24, %v384_v8  ;;  %v396_v37 = vshll.u32 %v2753_v35, %v381_v60  ;;  %v397_v38 = vshrl.u32 %v4000_v42, %v382_v63 }
  0x64   : >> { %v2417_v19 = vmin.u32 %v216_v12, %v2985_v2  ;;  %v3010_v39 = vshrl.u32 %v319_v26, 30  ;;  %v389_v40 = vor.u32 %v388_v15, %v387_v14  ;;  %v392_v41 = vor.u32 %v391_v17, %v390_v16 }
  0x65   : >> { %v395_v43 = vor.u32 %v394_v30, %v393_v18  ;;  %v206_v44 = vadd.s32 %v2945_v11, %v2942_v10  ;;  %vm399_vm13 = vcmp.lt.s32.totalorder %v380_v20, 1  ;;  %vm402_vm14 = vcmp.lt.s32.totalorder %v380_v20, 4 }
  0x66   : >> { %v218_v34 = vclz %v2417_v19  ;;  %v321_v46 = vshll.u32 %v3010_v39, 30  ;;  %v398_v47 = vor.u32 %v397_v38, %v396_v37  ;;  %v404_v25 = vsel %vm402_vm14, %v392_v41, 2102212464 }
  0x67   : >> { %v479_v48 = vshrl.u32 %v478_v32, 23  ;;  %vm400_vm0 = vcmp.lt.s32.totalorder %v380_v20, 2  ;;  %vm401_vm1 = vcmp.lt.s32.totalorder %v380_v20, 3  ;;  %v408_v49 = vsel %vm402_vm14, %v395_v43, 920167782 }
  0x68   : >> { %v2418_v45 = vadd.s32 4294967294, %v218_v34  ;;  %vm152_vm2 = vcmp.lt.s32.totalorder %v2890_v0, 0  ;;  %v3018_v52 = vsub.s32 %v318_v13, %v321_v46  ;;  %v403_v10 = vsel %vm399_vm13, %v383_v28, %v386_v36 }
  0x69   : >> { %v407_v11 = vsel %vm399_vm13, %v386_v36, %v389_v40  ;;  %v405_v59 = vsel %vm401_vm1, %v389_v40, %v404_v25  ;;  %v409_v61 = vsel %vm401_vm1, %v392_v41, %v408_v49  ;;  %v411_v62 = vsel %vm399_vm13, %v389_v40, %v392_v41 }
  0x6a   : >> { %vm2419_vm15 = vcmp.lt.s32.totalorder %v2418_v45, 0  ;;  %v324_v60 = vsub.s32 0, %v3018_v52  ;;  %v412_v50 = vsel %vm402_vm14, %v398_v47, 1326507024  ;;  %vm3030_vm3 = vcmp.le.f32.partialorder %v150_v1, 0.7853982 }
  0x6b   : >> { %v221_v51 = vsel %vm2419_vm15, 0, %v2418_v45  ;;  %v236_v8 = vsub.s32 4, %v2976_v56  ;;  %v410_v13 = vsel %vm400_vm0, %v407_v11, %v409_v61  ;;  %v3040_v24 = vand.u32 8388607, %v475_v23 }
  0x6c   : >> { %v222_v53 = vsub.s32 32, %v221_v51  ;;  %v223_v55 = vshll.u32 %v2985_v2, %v221_v51  ;;  %v226_v57 = vsub.s32 4294967266, %v221_v51  ;;  %v413_v2 = vsel %vm401_vm1, %v395_v43, %v412_v50 }
  0x6d   : >> { %v2421_v12 = vmin.u32 %v324_v60, %v3018_v52  ;;  %v406_v1 = vsel %vm400_vm0, %v403_v10, %v405_v59  ;;  %v414_v16 = vsel %vm400_vm0, %v411_v62, %v413_v2  ;;  %v2428_v26 = vadd.s32 4294967169, %v479_v48 }
  0x6e   : >> { %v224_v5 = vshrl.u32 %v206_v44, %v222_v53  ;;  %v227_v6 = vadd.s32 127, %v226_v57  ;;  %v3045_v18 = vmul.u32.u64.low %v3002_v21, %v414_v16  ;;  %v3046_v19 = vmul.u32.u64.high %v3002_v21, %v414_v16, %v3045_v18 }
  0x6f   : >> { %v326_v17 = vclz %v2421_v12  ;;  %v3049_v32 = vmul.u32.u64.low %v3002_v21, %v410_v13  ;;  %v3050_v34 = vmul.u32.u64.high %v3002_v21, %v410_v13, %v3049_v32  ;;  %vm260_vm4 = vcmp.lt.s32.totalorder %v2897_v3, 0 }
  0x70   : >> { %v225_v14 = vor.u32 %v224_v5, %v223_v55  ;;  %v228_v15 = vshll.u32 %v227_v6, 23  ;;  %v483_v37 = vor.u32 8388608, %v3040_v24  ;;  %v485_v20 = vadd.s32 1, %v2428_v26 }
  0x71   : >> { %v2422_v36 = vadd.s32 4294967294, %v326_v17  ;;  %v237_v40 = vsel %vm152_vm2, %v236_v8, %v2976_v56  ;;  %v314_v41 = vadd.s32 %v2972_v54, %v2980_v58  ;;  %v344_v43 = vsub.s32 4, %v3010_v39 }
  0x72   : >> { %v229_v28 = vor.u32 4788187, %v228_v15  ;;  %v232_v30 = vcvt.s32.f32 %v225_v14  ;;  %vm3063_vm5 = vcmp.le.f32.partialorder %v258_v7, 0.7853982  ;;  %v422_v45 = vmul.u32 %v3002_v21, %v406_v1 }
  0x73   : >> { %vm2423_vm6 = vcmp.lt.s32.totalorder %v2422_v36, 0  ;;  %vm424_vm7 = vc.u32 %v3046_v19, %v3049_v32  ;;  %vm486_vm8 = vcmp.gt.s32.totalorder %v485_v20, 0  ;;  %v425_v47 = vadd.s32 1, %v3050_v34 }
  0x74   : >> { %v230_v38 = vand.u32 2147483647, %v229_v28  ;;  %v329_v56 = vsel %vm2423_vm6, 0, %v2422_v36  ;;  %v487_v54 = vsel %vm486_vm8, %v485_v20, 0  ;;  %v3073_v58 = vsel %vm3030_vm3, 0, %v237_v40 }
  0x75   : >> { %v330_v7 = vsub.s32 32, %v329_v56  ;;  %v331_v25 = vshll.u32 %v3018_v52, %v329_v56  ;;  %v334_v48 = vsub.s32 4294967266, %v329_v56  ;;  %v3077_v21 = vand.u32 3, %v3073_v58 }
  0x76   : >> { %v233_v46 = vmul.f32 %v232_v30, %v230_v38  ;;  %v426_v51 = vsel %vm424_vm7, %v425_v47, %v3050_v34  ;;  %v489_v10 = vand.u32 31, %v487_v54  ;;  %v345_v55 = vsel %vm260_vm4, %v344_v43, %v3010_v39 }
  0x77   : >> { %v332_v11 = vshrl.u32 %v314_v41, %v330_v7  ;;  %v335_v53 = vadd.s32 127, %v334_v48  ;;  %v427_v57 = vadd.s32 %v426_v51, %v422_v45  ;;  %v3085_v60 = vshrl.u32 %v487_v54, 5 }
  0x78   : >> { %v234_v49 = vxor.u32 2147483648, %v233_v46  ;;  %v490_v52 = vsub.s32 32, %v489_v10  ;;  %v492_v61 = vshll.u32 %v2749_v27, %v489_v10  ;;  %v495_v39 = vshll.u32 %v2750_v29, %v489_v10 }
  0x79   : >> { %v333_v50 = vor.u32 %v332_v11, %v331_v25  ;;  %v336_v5 = vshll.u32 %v335_v53, 23  ;;  %v428_v6 = vadd.s32 536870912, %v427_v57  ;;  %v3098_v15 = vsel %vm3063_vm5, 0, %v345_v55 }
  0x7a   : >> { %v235_v59 = vsel %vm152_vm2, %v234_v49, %v233_v46  ;;  %v493_v2 = vshrl.u32 %v2750_v29, %v490_v52  ;;  %v496_v8 = vshrl.u32 %v2751_v31, %v490_v52  ;;  %v498_v63 = vshll.u32 %v2751_v31, %v489_v10 }
  0x7b   : >> { %v238_v62 = vsel %vm3030_vm3, %v2890_v0, %v235_v59  ;;  %v337_v12 = vor.u32 4788187, %v336_v5  ;;  %v340_v13 = vcvt.s32.f32 %v333_v50  ;;  %v3094_v14 = vshrl.u32 %v428_v6, 30 }
  0x7c   : >> { %2606 = vcosq.f32 %v238_v62  ;;  %v499_v1 = vshrl.u32 %v3998_v33, %v490_v52  ;;  %v3103_v16 = vmul.f32 4.5555553, %v2890_v0  ;;  %v494_v26 = vor.u32 %v493_v2, %v492_v61 }
  0x7d   : >> { %2608 = vsinq.f32 %v238_v62  ;;  %v338_v17 = vand.u32 2147483647, %v337_v12  ;;  %v430_v18 = vshll.u32 %v3094_v14, 30  ;;  %v501_v28 = vshll.u32 %v3998_v33, %v489_v10 }
  0x7e   : >> { %v497_v30 = vor.u32 %v496_v8, %v495_v39  ;;  %v502_v34 = vshrl.u32 %v2753_v35, %v490_v52  ;;  %v504_v36 = vshll.u32 %v2753_v35, %v489_v10  ;;  %v505_v20 = vshrl.u32 %v4000_v42, %v490_v52 }
  0x7f   : >> { %vm248_vm9 = vcmp.eq.s32.totalorder %v3077_v21, 2  ;;  %v341_v38 = vmul.f32 %v340_v13, %v338_v17  ;;  %v3112_v40 = vand.u32 3, %v3098_v15  ;;  %v3114_v41 = vsub.s32 %v427_v57, %v430_v18 }
  0x80   : >> { %vm507_vm10 = vcmp.lt.s32.totalorder %v3085_v60, 1  ;;  %vm245_vm11 = vcmp.eq.s32.totalorder %v3077_v21, 0  ;;  %v491_v43 = vshrl.u32 %v2749_v27, %v490_v52  ;;  %v500_v45 = vor.u32 %v499_v1, %v498_v63 }
  0x81   : >> { %v503_v46 = vor.u32 %v502_v34, %v501_v28  ;;  %vm508_vm12 = vcmp.lt.s32.totalorder %v3085_v60, 2  ;;  %vm244_vm13 = vcmp.lt.s32.totalorder %v3077_v21, 2  ;;  %v342_v56 = vxor.u32 2147483648, %v341_v38 }
  0x82   : >> { %v433_v47 = vsub.s32 0, %v3114_v41  ;;  %vm509_vm14 = vcmp.lt.s32.totalorder %v3085_v60, 3  ;;  %vm510_vm15 = vcmp.lt.s32.totalorder %v3085_v60, 4  ;;  %vm242_vm0 = vweird.f32 %v2890_v0 }
  0x83   : >> { %v506_v54 = vor.u32 %v505_v20, %v504_v36  ;;  %v512_v7 = vsel %vm510_vm15, %v500_v45, 2102212464  ;;  %v515_v25 = vsel %vm507_vm10, %v494_v26, %v497_v30  ;;  %v516_v48 = vsel %vm510_vm15, %v503_v46, 920167782 }
  0x84   : >> { %v343_v49 = vsel %vm260_vm4, %v342_v56, %v341_v38  ;;  %v2425_v51 = vmin.u32 %v433_v47, %v3114_v41  ;;  %v523_v10 = vshll.u32 %v483_v37, 8  ;;  %v586_v11 = vand.u32 2139095040, %v3103_v16 }
  0x85   : >> { %v346_v53 = vsel %vm3063_vm5, %v2897_v3, %v343_v49  ;;  %vm369_vm1 = vcmp.lt.s32.totalorder %v2900_v4, 0  ;;  %v423_v55 = vadd.s32 %v3049_v32, %v3046_v19  ;;  %v511_v57 = vsel %vm507_vm10, %v491_v43, %v494_v26 }
  0x86   : >> { %v517_v59 = vsel %vm509_vm14, %v500_v45, %v516_v48  ;;  %2610 = vcosq.f32 %v346_v53  ;;  %v435_v24 = vclz %v2425_v51  ;;  %v513_v37 = vsel %vm509_vm14, %v497_v30, %v512_v7 }
  0x87   : >> { %v518_v44 = vsel %vm508_vm12, %v515_v25, %v517_v59  ;;  %2612 = vsinq.f32 %v346_v53  ;;  %v453_v52 = vsub.s32 4, %v3094_v14  ;;  %v519_v19 = vsel %vm507_vm10, %v497_v30, %v500_v45 }
  0x88   : >> { %v520_v32 = vsel %vm510_vm15, %v506_v54, 1326507024  ;;  %v2426_v62 = vadd.s32 4294967294, %v435_v24  ;;  %v3160_v5 = vmul.u32.u64.low %v523_v10, %v518_v44  ;;  %v3161_v6 = vmul.u32.u64.high %v523_v10, %v518_v44, %v3160_v5 }
  0x89   : >> { %v3156_v61 = vpop.eup %2606  ;;  %v521_v50 = vsel %vm509_vm14, %v503_v46, %v520_v32  ;;  %v514_v8 = vsel %vm508_vm12, %v511_v57, %v513_v37  ;;  %v587_v13 = vshrl.u32 %v586_v11, 23  ;;  %v583_v28 = vand.u32 2147483647, %v3103_v16 }
  0x8a   : >> { %v3164_v2 = vpop.eup %2608  ;;  %v3991_v39 = vxor.u32 2147483648, %v3156_v61  ;;  %v522_v12 = vsel %vm508_vm12, %v519_v19, %v521_v50  ;;  %vm2427_vm2 = vcmp.lt.s32.totalorder %v2426_v62, 0  ;;  %v530_v43 = vmul.u32 %v523_v10, %v514_v8 }
  0x8b   : >> { %v3995_v63 = vxor.u32 2147483648, %v3164_v2  ;;  %v3172_v1 = vmul.u32.u64.low %v523_v10, %v522_v12  ;;  %v3173_v17 = vmul.u32.u64.high %v523_v10, %v522_v12, %v3172_v1  ;;  %v438_v26 = vsel %vm2427_vm2, 0, %v2426_v62 }
  0x8c   : >> { %v250_v18 = vsel %vm248_vm9, %v3991_v39, %v3164_v2  ;;  %v2432_v30 = vadd.s32 4294967169, %v587_v13  ;;  %v439_v34 = vsub.s32 32, %v438_v26  ;;  %v440_v36 = vshll.u32 %v3114_v41, %v438_v26 }
  0x8d   : >> { %v247_v60 = vsel %vm245_vm11, %v3156_v61, %v3995_v63  ;;  %v443_v20 = vsub.s32 4294967266, %v438_v26  ;;  %v533_v45 = vadd.s32 1, %v3161_v6  ;;  %v454_v7 = vsel %vm369_vm1, %v453_v52, %v3094_v14 }
  0x8e   : >> { %v251_v38 = vsel %vm244_vm13, %v247_v60, %v250_v18  ;;  %v593_v46 = vadd.s32 1, %v2432_v30  ;;  %v441_v47 = vshrl.u32 %v423_v55, %v439_v34  ;;  %vm532_vm3 = vc.u32 %v3173_v17, %v3160_v5 }
  0x8f   : >> { %v252_v56 = vsel %vm242_vm0, nan, %v251_v38  ;;  %v444_v54 = vadd.s32 127, %v443_v20  ;;  %v590_v21 = vand.u32 8388607, %v583_v28  ;;  %v534_v49 = vsel %vm532_vm3, %v533_v45, %v3161_v6 }
  0x90   : >> { %v254_v25 = vrot.slane %v252_v56, 5  ;;  %vm594_vm4 = vcmp.gt.s32.totalorder %v593_v46, 0  ;;  %v442_v41 = vor.u32 %v441_v47, %v440_v36  ;;  %vm350_vm5 = vweird.f32 %v2897_v3 }
  0x91   : >> { %v445_v48 = vshll.u32 %v444_v54, 23  ;;  %v595_v51 = vsel %vm594_vm4, %v593_v46, 0  ;;  %vm3204_vm6 = vcmp.le.f32.partialorder %v367_v22, 0.7853982  ;;  %v535_v10 = vadd.s32 %v534_v49, %v530_v43 }
  0x92   : >> { %256 = vst [vmem:[%s2888_s3] sm:$0x38] %v254_v25  ;;  %v597_v11 = vand.u32 31, %v595_v51  ;;  %vm352_vm7 = vcmp.lt.s32.totalorder %v3112_v40, 2  ;;  %vm353_vm8 = vcmp.eq.s32.totalorder %v3112_v40, 0  ;;  %v449_v55 = vcvt.s32.f32 %v442_v41 }
  0x93   : >> { %v446_v53 = vor.u32 4788187, %v445_v48  ;;  %v3210_v57 = vpop.eup %2610  ;;  %vm356_vm9 = vcmp.eq.s32.totalorder %v3112_v40, 2  ;;  %v3215_v59 = vsel %vm3204_vm6, 0, %v454_v7  ;;  %v536_v22 = vadd.s32 536870912, %v535_v10 }
  0x94   : >> { %v598_v24 = vsub.s32 32, %v597_v11  ;;  %v3217_v37 = vpop.eup %2612  ;;  %v3989_v44 = vxor.u32 2147483648, %v3210_v57  ;;  %v591_v19 = vor.u32 8388608, %v590_v21  ;;  %v3221_v32 = vmul.f32 5.4444447, %v2890_v0 }
  0x95   : >> { %v447_v52 = vand.u32 2147483647, %v446_v53  ;;  %v3990_v62 = vxor.u32 2147483648, %v3217_v37  ;;  %v3224_v50 = vshrl.u32 %v536_v22, 30  ;;  %v600_v6 = vshll.u32 %v2749_v27, %v597_v11 }
  0x96   : >> { %v603_v8 = vshll.u32 %v2750_v29, %v597_v11  ;;  %v358_v12 = vsel %vm356_vm9, %v3989_v44, %v3217_v37  ;;  %v601_v1 = vshrl.u32 %v2750_v29, %v598_v24  ;;  %v606_v18 = vshll.u32 %v2751_v31, %v597_v11 }
  0x97   : >> { %v450_v13 = vmul.f32 %v449_v55, %v447_v52  ;;  %v355_v26 = vsel %vm353_vm8, %v3210_v57, %v3990_v62  ;;  %v538_v30 = vshll.u32 %v3224_v50, 30  ;;  %v604_v60 = vshrl.u32 %v2751_v31, %v598_v24 }
  0x98   : >> { %v607_v34 = vshrl.u32 %v3998_v33, %v598_v24  ;;  %v359_v36 = vsel %vm352_vm7, %v355_v26, %v358_v12  ;;  %v596_v38 = vshrl.u32 %v595_v51, 5  ;;  %v609_v43 = vshll.u32 %v3998_v33, %v597_v11 }
  0x99   : >> { %v451_v20 = vxor.u32 2147483648, %v450_v13  ;;  %v360_v45 = vsel %vm350_vm5, nan, %v359_v36  ;;  %v3246_v46 = vsub.s32 %v535_v10, %v538_v30  ;;  %v599_v56 = vshrl.u32 %v2749_v27, %v598_v24 }
  0x9a   : >> { %v610_v47 = vshrl.u32 %v2753_v35, %v598_v24  ;;  %v362_v54 = vrot.slane %v360_v45, 2  ;;  %v602_v40 = vor.u32 %v601_v1, %v600_v6  ;;  %v612_v25 = vshll.u32 %v2753_v35, %v597_v11 }
  0x9b   : >> { %v452_v7 = vsel %vm369_vm1, %v451_v20, %v450_v13  ;;  %v541_v41 = vsub.s32 0, %v3246_v46  ;;  %v605_v48 = vor.u32 %v604_v60, %v603_v8  ;;  %v608_v49 = vor.u32 %v607_v34, %v606_v18 }
  0x9c   : >> { %v455_v21 = vsel %vm3204_vm6, %v2900_v4, %v452_v7  ;;  %364 = vst [vmem:[%s2888_s3 + $0x10] ss:$-12 sps:$4 sm:$0xc1] %v362_v54   ;;  %v611_v51 = vor.u32 %v610_v47, %v609_v43  ;;  %v613_v10 = vshrl.u32 %v4000_v42, %v598_v24  ;;  %vm615_vm10 = vcmp.lt.s32.totalorder %v596_v38, 1 }
  0x9d   : >> { %2614 = vcosq.f32 %v455_v21  ;;  %v3260_v53 = vand.u32 3, %v3215_v59  ;;  %v2429_v11 = vmin.u32 %v541_v41, %v3246_v46  ;;  %v631_v55 = vshll.u32 %v591_v19, 8 }
  0x9e   : >> { %2616 = vsinq.f32 %v455_v21  ;;  %v614_v22 = vor.u32 %v613_v10, %v612_v25  ;;  %vm617_vm11 = vcmp.lt.s32.totalorder %v596_v38, 3  ;;  %vm618_vm12 = vcmp.lt.s32.totalorder %v596_v38, 4 }
  0x9f   : >> { %v695_v14 = vand.u32 2139095040, %v3221_v32  ;;  %v543_v52 = vclz %v2429_v11  ;;  %vm616_vm13 = vcmp.lt.s32.totalorder %v596_v38, 2  ;;  %v620_v6 = vsel %vm618_vm12, %v608_v49, 2102212464 }
  0xa0   : >> { %v623_v8 = vsel %vm615_vm10, %v602_v40, %v605_v48  ;;  %v619_v12 = vsel %vm615_vm10, %v599_v56, %v602_v40  ;;  %v624_v13 = vsel %vm618_vm12, %v611_v51, 920167782  ;;  %v627_v24 = vsel %vm615_vm10, %v605_v48, %v608_v49 }
  0xa1   : >> { %v628_v1 = vsel %vm618_vm12, %v614_v22, 1326507024  ;;  %v2430_v18 = vadd.s32 4294967294, %v543_v52  ;;  %v621_v26 = vsel %vm617_vm11, %v605_v48, %v620_v6  ;;  %v625_v30 = vsel %vm617_vm11, %v608_v49, %v624_v13 }
  0xa2   : >> { %v629_v60 = vsel %vm617_vm11, %v611_v51, %v628_v1  ;;  %v531_v19 = vadd.s32 %v3160_v5, %v3173_v17  ;;  %v561_v34 = vsub.s32 4, %v3224_v50  ;;  %v626_v36 = vsel %vm616_vm13, %v623_v8, %v625_v30 }
  0xa3   : >> { %v630_v20 = vsel %vm616_vm13, %v627_v24, %v629_v60  ;;  %vm2431_vm14 = vcmp.lt.s32.totalorder %v2430_v18, 0  ;;  %v696_v56 = vshrl.u32 %v695_v14, 23  ;;  %v622_v54 = vsel %vm616_vm13, %v619_v12, %v621_v26 }
  0xa4   : >> { %v3269_v43 = vmul.u32.u64.low %v631_v55, %v630_v20  ;;  %v3270_v45 = vmul.u32.u64.high %v631_v55, %v630_v20, %v3269_v43  ;;  %v546_v47 = vsel %vm2431_vm14, 0, %v2430_v18  ;;  %vm459_vm15 = vweird.f32 %v2900_v4 }
  0xa5   : >> { %v3273_v7 = vmul.u32.u64.low %v631_v55, %v626_v36  ;;  %v3274_v40 = vmul.u32.u64.high %v631_v55, %v626_v36, %v3273_v7  ;;  %v547_v25 = vsub.s32 32, %v546_v47  ;;  %v548_v5 = vshll.u32 %v3246_v46, %v546_v47 }
  0xa6   : >> { %v551_v17 = vsub.s32 4294967266, %v546_v47  ;;  %v2436_v21 = vadd.s32 4294967169, %v696_v56  ;;  %vm461_vm1 = vcmp.lt.s32.totalorder %v3260_v53, 2  ;;  %vm477_vm2 = vcmp.lt.s32.totalorder %v2992_v9, 0 }
  0xa7   : >> { %v549_v41 = vshrl.u32 %v531_v19, %v547_v25  ;;  %v638_v49 = vmul.u32 %v631_v55, %v622_v54  ;;  %vm640_vm3 = vc.u32 %v3270_v45, %v3273_v7  ;;  %vm462_vm4 = vcmp.eq.s32.totalorder %v3260_v53, 0 }
  0xa8   : >> { %v552_v48 = vadd.s32 127, %v551_v17  ;;  %v641_v38 = vadd.s32 1, %v3274_v40  ;;  %v692_v51 = vand.u32 2147483647, %v3221_v32  ;;  %v702_v46 = vadd.s32 1, %v2436_v21 }
  0xa9   : >> { %vm465_vm6 = vcmp.eq.s32.totalorder %v3260_v53, 2  ;;  %v550_v11 = vor.u32 %v549_v41, %v548_v5  ;;  %v562_v14 = vsel %vm477_vm2, %v561_v34, %v3224_v50  ;;  %v3295_v8 = vmul.f32 6.3333335, %v2890_v0 }
  0xaa   : >> { %v3284_v10 = vpop.eup %2614  ;;  %v553_v22 = vshll.u32 %v552_v48, 23  ;;  %v642_v6 = vsel %vm640_vm3, %v641_v38, %v3274_v40  ;;  %vm703_vm7 = vcmp.gt.s32.totalorder %v702_v46, 0  ;;  %vm3303_vm8 = vcmp.le.f32.partialorder %v475_v23, 0.7853982 }
  0xab   : >> { %v3290_v55 = vpop.eup %2616  ;;  %v3987_v52 = vxor.u32 2147483648, %v3284_v10  ;;  %v557_v24 = vcvt.s32.f32 %v550_v11  ;;  %v643_v1 = vadd.s32 %v642_v6, %v638_v49  ;;  %v699_v26 = vand.u32 8388607, %v692_v51 }
  0xac   : >> { %v3988_v12 = vxor.u32 2147483648, %v3290_v55  ;;  %v554_v13 = vor.u32 4788187, %v553_v22  ;;  %v704_v30 = vsel %vm703_vm7, %v702_v46, 0  ;;  %v3316_v34 = vsel %vm3303_vm8, 0, %v562_v14 }
  0xad   : >> { %v467_v18 = vsel %vm465_vm6, %v3987_v52, %v3290_v55  ;;  %v644_v36 = vadd.s32 536870912, %v643_v1  ;;  %v3321_v20 = vand.u32 3, %v3316_v34  ;;  %v706_v43 = vand.u32 31, %v704_v30 }
  0xae   : >> { %v464_v60 = vsel %vm462_vm4, %v3284_v10, %v3988_v12  ;;  %v555_v19 = vand.u32 2147483647, %v554_v13  ;;  %v803_v56 = vand.u32 2139095040, %v3295_v8  ;;  %v705_v25 = vshrl.u32 %v704_v30, 5 }
  0xaf   : >> { %v468_v23 = vsel %vm461_vm1, %v464_v60, %v467_v18  ;;  %v3326_v40 = vshrl.u32 %v644_v36, 30  ;;  %v700_v17 = vor.u32 8388608, %v699_v26  ;;  %v707_v21 = vsub.s32 32, %v706_v43 }
  0xb0   : >> { %v469_v47 = vsel %vm459_vm15, nan, %v468_v23  ;;  %v558_v54 = vmul.f32 %v557_v24, %v555_v19  ;;  %v709_v53 = vshll.u32 %v2749_v27, %v706_v43  ;;  %v712_v49 = vshll.u32 %v2750_v29, %v706_v43 }
  0xb1   : >> { %v471_v5 = vrot.slane %v469_v47, 7  ;;  %v646_v48 = vshll.u32 %v3326_v40, 30  ;;  %v715_v38 = vshll.u32 %v2751_v31, %v706_v43  ;;  %v639_v46 = vadd.s32 %v3273_v7, %v3270_v45 }
  0xb2   : >> { %v559_v41 = vxor.u32 2147483648, %v558_v54  ;;  %v710_v11 = vshrl.u32 %v2750_v29, %v707_v21  ;;  %v713_v22 = vshrl.u32 %v2751_v31, %v707_v21  ;;  %v716_v14 = vshrl.u32 %v3998_v33, %v707_v21 }
  0xb3   : >> { %473 = vst [vmem:[%s2888_s3 + $0x10] sm:$0xe] %v471_v5  ;;  %v3339_v13 = vsub.s32 %v643_v1, %v646_v48  ;;  %vm724_vm9 = vcmp.lt.s32.totalorder %v705_v25, 1  ;;  %v804_v24 = vshrl.u32 %v803_v56, 23  ;;  %v708_v26 = vshrl.u32 %v2749_v27, %v707_v21 }
  0xb4   : >> { %v560_v6 = vsel %vm477_vm2, %v559_v41, %v558_v54  ;;  %v711_v45 = vor.u32 %v710_v11, %v709_v53  ;;  %v718_v7 = vshll.u32 %v3998_v33, %v706_v43  ;;  %v714_v60 = vor.u32 %v713_v22, %v712_v49 }
  0xb5   : >> { %v563_v18 = vsel %vm3303_vm8, %v2992_v9, %v560_v6  ;;  %v649_v30 = vsub.s32 0, %v3339_v13  ;;  %v717_v19 = vor.u32 %v716_v14, %v715_v38  ;;  %v719_v1 = vshrl.u32 %v2753_v35, %v707_v21 }
  0xb6   : >> { %2618 = vcosq.f32 %v563_v18  ;;  %v721_v36 = vshll.u32 %v2753_v35, %v706_v43  ;;  %v722_v23 = vshrl.u32 %v4000_v42, %v707_v21  ;;  %v3351_v56 = vshll.u32 %v700_v17, 8 }
  0xb7   : >> { %2620 = vsinq.f32 %v563_v18  ;;  %v2433_v50 = vmin.u32 %v649_v30, %v3339_v13  ;;  %v800_v47 = vand.u32 2147483647, %v3295_v8  ;;  %v2440_v54 = vadd.s32 4294967169, %v804_v24 }
  0xb8   : >> { %v720_v5 = vor.u32 %v719_v1, %v718_v7  ;;  %v723_v53 = vor.u32 %v722_v23, %v721_v36  ;;  %vm725_vm10 = vcmp.lt.s32.totalorder %v705_v25, 2  ;;  %vm726_vm11 = vcmp.lt.s32.totalorder %v705_v25, 3 }
  0xb9   : >> { %v651_v41 = vclz %v2433_v50  ;;  %vm727_vm12 = vcmp.lt.s32.totalorder %v705_v25, 4  ;;  %v728_v48 = vsel %vm724_vm9, %v708_v26, %v711_v45  ;;  %v732_v49 = vsel %vm724_vm9, %v711_v45, %v714_v60 }
  0xba   : >> { %v729_v43 = vsel %vm727_vm12, %v717_v19, 2102212464  ;;  %v733_v38 = vsel %vm727_vm12, %v720_v5, 920167782  ;;  %v736_v21 = vsel %vm724_vm9, %v714_v60, %v717_v19  ;;  %v737_v11 = vsel %vm727_vm12, %v723_v53, 1326507024 }
  0xbb   : >> { %v2434_v17 = vadd.s32 4294967294, %v651_v41  ;;  %v730_v22 = vsel %vm726_vm11, %v714_v60, %v729_v43  ;;  %v734_v14 = vsel %vm726_vm11, %v717_v19, %v733_v38  ;;  %v738_v6 = vsel %vm726_vm11, %v720_v5, %v737_v11 }
  0xbc   : >> { %v735_v24 = vsel %vm725_vm10, %v732_v49, %v734_v14  ;;  %v739_v18 = vsel %vm725_vm10, %v736_v21, %v738_v6  ;;  %v3361_v7 = vand.u32 8388607, %v800_v47  ;;  %v810_v26 = vadd.s32 1, %v2440_v54 }
  0xbd   : >> { %vm2435_vm13 = vcmp.lt.s32.totalorder %v2434_v17, 0  ;;  %v731_v45 = vsel %vm725_vm10, %v728_v48, %v730_v22  ;;  %v3365_v30 = vmul.u32.u64.low %v3351_v56, %v739_v18  ;;  %v3366_v1 = vmul.u32.u64.high %v3351_v56, %v739_v18, %v3365_v30 }
  0xbe   : >> { %v654_v36 = vsel %vm2435_vm13, 0, %v2434_v17  ;;  %v3369_v60 = vmul.u32.u64.low %v3351_v56, %v735_v24  ;;  %v3370_v19 = vmul.u32.u64.high %v3351_v56, %v735_v24, %v3369_v60  ;;  %vm811_vm14 = vcmp.gt.s32.totalorder %v810_v26, 0 }
  0xbf   : >> { %v655_v23 = vsub.s32 32, %v654_v36  ;;  %v656_v50 = vshll.u32 %v3339_v13, %v654_v36  ;;  %v659_v5 = vsub.s32 4294967266, %v654_v36  ;;  %v812_v53 = vsel %vm811_vm14, %v810_v26, 0 }
  0xc0   : >> { %vm567_vm1 = vweird.f32 %v2992_v9  ;;  %vm569_vm2 = vcmp.lt.s32.totalorder %v3321_v20, 2  ;;  %vm570_vm3 = vcmp.eq.s32.totalorder %v3321_v20, 0  ;;  %v814_v25 = vand.u32 31, %v812_v53 }
  0xc1   : >> { %v657_v54 = vshrl.u32 %v639_v46, %v655_v23  ;;  %v660_v41 = vadd.s32 127, %v659_v5  ;;  %v747_v48 = vmul.u32 %v3351_v56, %v731_v45  ;;  %vm749_vm4 = vc.u32 %v3366_v1, %v3369_v60 }
  0xc2   : >> { %vm573_vm6 = vcmp.eq.s32.totalorder %v3321_v20, 2  ;;  %vm585_vm7 = vcmp.lt.s32.totalorder %v3103_v16, 0  ;;  %v750_v13 = vadd.s32 1, %v3370_v19  ;;  %v808_v43 = vor.u32 8388608, %v3361_v7 }
  0xc3   : >> { %v3380_v49 = vpop.eup %2618  ;;  %v815_v38 = vsub.s32 32, %v814_v25  ;;  %vm3391_vm8 = vcmp.le.f32.partialorder %v583_v28, 0.7853982  ;;  %v658_v11 = vor.u32 %v657_v54, %v656_v50  ;;  %v661_v17 = vshll.u32 %v660_v41, 23 }
  0xc4   : >> { %v3386_v21 = vpop.eup %2620  ;;  %v3985_v46 = vxor.u32 2147483648, %v3380_v49  ;;  %v817_v22 = vshll.u32 %v2749_v27, %v814_v25  ;;  %v751_v6 = vsel %vm749_vm4, %v750_v13, %v3370_v19  ;;  %v820_v24 = vshll.u32 %v2750_v29, %v814_v25 }
  0xc5   : >> { %v3986_v14 = vxor.u32 2147483648, %v3386_v21  ;;  %v823_v18 = vshll.u32 %v2751_v31, %v814_v25  ;;  %v662_v28 = vor.u32 4788187, %v661_v17  ;;  %v665_v26 = vcvt.s32.f32 %v658_v11 }
  0xc6   : >> { %v575_v7 = vsel %vm573_vm6, %v3985_v46, %v3386_v21  ;;  %v752_v45 = vadd.s32 %v751_v6, %v747_v48  ;;  %v818_v36 = vshrl.u32 %v2750_v29, %v815_v38  ;;  %v821_v19 = vshrl.u32 %v2751_v31, %v815_v38 }
  0xc7   : >> { %v572_v30 = vsel %vm570_vm3, %v3380_v49, %v3986_v14  ;;  %v824_v23 = vshrl.u32 %v3998_v33, %v815_v38  ;;  %v663_v5 = vand.u32 2147483647, %v662_v28  ;;  %v826_v41 = vshll.u32 %v3998_v33, %v814_v25 }
  0xc8   : >> { %v576_v50 = vsel %vm569_vm2, %v572_v30, %v575_v7  ;;  %v753_v54 = vadd.s32 536870912, %v752_v45  ;;  %v669_v13 = vsub.s32 4, %v3326_v40  ;;  %v813_v11 = vshrl.u32 %v812_v53, 5 }
  0xc9   : >> { %v577_v48 = vsel %vm567_vm1, nan, %v576_v50  ;;  %v827_v17 = vshrl.u32 %v2753_v35, %v815_v38  ;;  %v666_v46 = vmul.f32 %v665_v26, %v663_v5  ;;  %v829_v52 = vshll.u32 %v2753_v35, %v814_v25 }
  0xca   : >> { %v579_v6 = vcombine.low %v577_v48, %v577_v48  ;;  %v754_v14 = vshrl.u32 %v753_v54, 30  ;;  %v816_v20 = vshrl.u32 %v2749_v27, %v815_v38  ;;  %v819_v7 = vor.u32 %v818_v36, %v817_v22 }
  0xcb   : >> { %v828_v28 = vor.u32 %v827_v17, %v826_v41  ;;  %v830_v30 = vshrl.u32 %v4000_v42, %v815_v38  ;;  %v667_v12 = vxor.u32 2147483648, %v666_v46  ;;  %v822_v50 = vor.u32 %v821_v19, %v820_v24 }
  0xcc   : >> { %581 = vst [vmem:[%s2888_s3 + $0x10] sm:$0x70] %v579_v6  ;;  %v755_v44 = vshll.u32 %v754_v14, 30  ;;  %v825_v62 = vor.u32 %v824_v23, %v823_v18  ;;  %vm832_vm9 = vcmp.lt.s32.totalorder %v813_v11, 1  ;;  %vm835_vm10 = vcmp.lt.s32.totalorder %v813_v11, 4 }
  0xcd   : >> { %v831_v39 = vor.u32 %v830_v30, %v829_v52  ;;  %v848_v53 = vshll.u32 %v808_v43, 8  ;;  %v668_v26 = vsel %vm585_vm7, %v667_v12, %v666_v46  ;;  %vm834_vm11 = vcmp.lt.s32.totalorder %v813_v11, 3 }
  0xce   : >> { %v3424_v5 = vsub.s32 %v752_v45, %v755_v44  ;;  %v837_v25 = vsel %vm835_vm10, %v825_v62, 2102212464  ;;  %v671_v38 = vsel %vm3391_vm8, %v3103_v16, %v668_v26  ;;  %vm833_vm12 = vcmp.lt.s32.totalorder %v813_v11, 2 }
  0xcf   : >> { %v836_v22 = vsel %vm832_vm9, %v816_v20, %v819_v7  ;;  %v841_v52 = vsel %vm835_vm10, %v828_v28, 920167782  ;;  %2622 = vcosq.f32 %v671_v38  ;;  %v838_v24 = vsel %vm834_vm11, %v822_v50, %v837_v25 }
  0xd0   : >> { %v758_v43 = vsub.s32 0, %v3424_v5  ;;  %v840_v44 = vsel %vm832_vm9, %v819_v7, %v822_v50  ;;  %2624 = vsinq.f32 %v671_v38  ;;  %v842_v12 = vsel %vm834_vm11, %v825_v62, %v841_v52 }
  0xd1   : >> { %v844_v46 = vsel %vm832_vm9, %v822_v50, %v825_v62  ;;  %v845_v18 = vsel %vm835_vm10, %v831_v39, 1326507024  ;;  %v3440_v36 = vmul.f32 7.2222223, %v2890_v0  ;;  %v670_v19 = vsel %vm585_vm7, %v669_v13, %v3326_v40 }
  0xd2   : >> { %v2437_v45 = vmin.u32 %v758_v43, %v3424_v5  ;;  %v839_v23 = vsel %vm833_vm12, %v836_v22, %v838_v24  ;;  %v843_v54 = vsel %vm833_vm12, %v840_v44, %v842_v12  ;;  %v846_v41 = vsel %vm834_vm11, %v828_v28, %v845_v18 }
  0xd3   : >> { %v847_v62 = vsel %vm833_vm12, %v844_v46, %v846_v41  ;;  %v3449_v17 = vmul.u32.u64.low %v848_v53, %v843_v54  ;;  %v3450_v39 = vmul.u32.u64.high %v848_v53, %v843_v54, %v3449_v17  ;;  %v778_v6 = vsub.s32 4, %v754_v14 }
  0xd4   : >> { %v760_v48 = vclz %v2437_v45  ;;  %v3452_v20 = vmul.u32.u64.low %v848_v53, %v847_v62  ;;  %v3453_v7 = vmul.u32.u64.high %v848_v53, %v847_v62, %v3452_v20  ;;  %v908_v30 = vand.u32 2147483647, %v3440_v36 }
  0xd5   : >> { %v3458_v40 = vsel %vm3391_vm8, 0, %v670_v19  ;;  %v911_v50 = vand.u32 2139095040, %v3440_v36  ;;  %vm694_vm13 = vcmp.lt.s32.totalorder %v3221_v32, 0  ;;  %v855_v11 = vmul.u32 %v848_v53, %v839_v23 }
  0xd6   : >> { %v2438_v13 = vadd.s32 4294967294, %v760_v48  ;;  %v676_v28 = vand.u32 3, %v3458_v40  ;;  %vm675_vm14 = vweird.f32 %v3103_v16  ;;  %v748_v26 = vadd.s32 %v3369_v60, %v3366_v1 }
  0xd7   : >> { %v858_v25 = vadd.s32 1, %v3450_v39  ;;  %v912_v38 = vshrl.u32 %v911_v50, 23  ;;  %v779_v22 = vsel %vm694_vm13, %v778_v6, %v754_v14  ;;  %vm857_vm3 = vc.u32 %v3453_v7, %v3449_v17 }
  0xd8   : >> { %vm2439_vm2 = vcmp.lt.s32.totalorder %v2438_v13, 0  ;;  %v915_v52 = vand.u32 8388607, %v908_v30  ;;  %vm3476_vm4 = vcmp.le.f32.partialorder %v692_v51, 0.7853982  ;;  %vm677_vm6 = vcmp.lt.s32.totalorder %v676_v28, 2 }
  0xd9   : >> { %v763_v56 = vsel %vm2439_vm2, 0, %v2438_v13  ;;  %v859_v44 = vsel %vm857_vm3, %v858_v25, %v3450_v39  ;;  %v2444_v12 = vadd.s32 4294967169, %v912_v38  ;;  %v3481_v14 = vmul.f32 8.111111, %v2890_v0 }
  0xda   : >> { %v764_v43 = vsub.s32 32, %v763_v56  ;;  %v765_v53 = vshll.u32 %v3424_v5, %v763_v56  ;;  %v768_v24 = vsub.s32 4294967266, %v763_v56  ;;  %v860_v60 = vadd.s32 %v859_v44, %v855_v11 }
  0xdb   : >> { %vm678_vm7 = vcmp.eq.s32.totalorder %v676_v28, 0  ;;  %vm681_vm8 = vcmp.eq.s32.totalorder %v676_v28, 2  ;;  %v3487_v5 = vsel %vm3476_vm4, 0, %v779_v22  ;;  %v918_v19 = vadd.s32 1, %v2444_v12 }
  0xdc   : >> { %v766_v46 = vshrl.u32 %v748_v26, %v764_v43  ;;  %v769_v18 = vadd.s32 127, %v768_v24  ;;  %v3483_v45 = vpop.eup %2622  ;;  %v861_v51 = vadd.s32 536870912, %v860_v60  ;;  %v916_v62 = vor.u32 8388608, %v915_v52 }
  0xdd   : >> { %v3489_v23 = vpop.eup %2624  ;;  %v3992_v54 = vxor.u32 2147483648, %v3483_v45  ;;  %vm919_vm9 = vcmp.gt.s32.totalorder %v918_v19, 0  ;;  %v1016_v20 = vand.u32 2139095040, %v3481_v14  ;;  %v3994_v56 = vand.u32 2147483647, %v3481_v14 }
  0xde   : >> { %v767_v41 = vor.u32 %v766_v46, %v765_v53  ;;  %v770_v48 = vshll.u32 %v769_v18, 23  ;;  %v3993_v39 = vxor.u32 2147483648, %v3489_v23  ;;  %v3493_v6 = vshrl.u32 %v861_v51, 30 }
  0xdf   : >> { %v683_v13 = vsel %vm681_vm8, %v3992_v54, %v3489_v23  ;;  %v920_v26 = vsel %vm919_vm9, %v918_v19, 0  ;;  %v3507_v43 = vand.u32 3, %v3487_v5  ;;  %v856_v44 = vadd.s32 %v3449_v17, %v3453_v7 }
  0xe0   : >> { %v771_v50 = vor.u32 4788187, %v770_v48  ;;  %v774_v11 = vcvt.s32.f32 %v767_v41  ;;  %v680_v25 = vsel %vm678_vm7, %v3483_v45, %v3993_v39  ;;  %v863_v38 = vshll.u32 %v3493_v6, 30 }
  0xe1   : >> { %v684_v22 = vsel %vm677_vm6, %v680_v25, %v683_v13  ;;  %v922_v53 = vand.u32 31, %v920_v26  ;;  %v1017_v46 = vshrl.u32 %v1016_v20, 23  ;;  %v3514_v41 = vshll.u32 %v916_v62, 8 }
  0xe2   : >> { %v772_v52 = vand.u32 2147483647, %v771_v50  ;;  %v685_v24 = vsel %vm675_vm14, nan, %v684_v22  ;;  %v3512_v12 = vsub.s32 %v860_v60, %v863_v38  ;;  %v3521_v50 = vand.u32 8388607, %v3994_v56 }
  0xe3   : >> { %v687_v18 = vrot.slane %v685_v24, 1  ;;  %v923_v19 = vsub.s32 32, %v922_v53  ;;  %v925_v48 = vshll.u32 %v2749_v27, %v922_v53  ;;  %v928_v13 = vshll.u32 %v2750_v29, %v922_v53 }
  0xe4   : >> { %v775_v51 = vmul.f32 %v774_v11, %v772_v52  ;;  %v866_v28 = vsub.s32 0, %v3512_v12  ;;  %v886_v7 = vsub.s32 4, %v3493_v6  ;;  %v921_v11 = vshrl.u32 %v920_v26, 5 }
  0xe5   : >> { %689 = vst [vmem:[%s2888_s3 + $0x20] ss:$-12 sps:$4 sm:$0x83] %v687_v18   ;;  %v926_v60 = vshrl.u32 %v2750_v29, %v923_v19  ;;  %v929_v20 = vshrl.u32 %v2751_v31, %v923_v19  ;;  %v924_v25 = vshrl.u32 %v2749_v27, %v923_v19  ;;  %v2448_v38 = vadd.s32 4294967169, %v1017_v46 }
  0xe6   : >> { %v776_v17 = vxor.u32 2147483648, %v775_v51  ;;  %v2441_v62 = vmin.u32 %v866_v28, %v3512_v12  ;;  %v931_v18 = vshll.u32 %v2751_v31, %v922_v53  ;;  %v932_v56 = vshrl.u32 %v3998_v33, %v923_v19 }
  0xe7   : >> { %v927_v52 = vor.u32 %v926_v60, %v925_v48  ;;  %v930_v24 = vor.u32 %v929_v20, %v928_v13  ;;  %v934_v28 = vshll.u32 %v3998_v33, %v922_v53  ;;  %v935_v26 = vshrl.u32 %v2753_v35, %v923_v19 }
  0xe8   : >> { %v777_v22 = vsel %vm694_vm13, %v776_v17, %v775_v51  ;;  %v868_v39 = vclz %v2441_v62  ;;  %v937_v46 = vshll.u32 %v2753_v35, %v922_v53  ;;  %v938_v51 = vshrl.u32 %v4000_v42, %v923_v19 }
  0xe9   : >> { %v780_v54 = vsel %vm3476_vm4, %v3221_v32, %v777_v22  ;;  %vm802_vm10 = vcmp.lt.s32.totalorder %v3295_v8, 0  ;;  %v933_v13 = vor.u32 %v932_v56, %v931_v18  ;;  %vm940_vm11 = vcmp.lt.s32.totalorder %v921_v11, 1 }
  0xea   : >> { %2626 = vcosq.f32 %v780_v54  ;;  %v2442_v48 = vadd.s32 4294967294, %v868_v39  ;;  %v936_v1 = vor.u32 %v935_v26, %v934_v28  ;;  %v939_v17 = vor.u32 %v938_v51, %v937_v46 }
  0xeb   : >> { %2628 = vsinq.f32 %v780_v54  ;;  %vm941_vm12 = vcmp.lt.s32.totalorder %v921_v11, 2  ;;  %vm943_vm13 = vcmp.lt.s32.totalorder %v921_v11, 4  ;;  %vm942_vm3 = vcmp.lt.s32.totalorder %v921_v11, 3 }
  0xec   : >> { %vm2443_vm2 = vcmp.lt.s32.totalorder %v2442_v48, 0  ;;  %v944_v60 = vsel %vm940_vm11, %v924_v25, %v927_v52  ;;  %v945_v20 = vsel %vm943_vm13, %v933_v13, 2102212464  ;;  %v948_v19 = vsel %vm940_vm11, %v927_v52, %v930_v24 }
  0xed   : >> { %v871_v62 = vsel %vm2443_vm2, 0, %v2442_v48  ;;  %v946_v53 = vsel %vm942_vm3, %v930_v24, %v945_v20  ;;  %v949_v54 = vsel %vm943_vm13, %v936_v1, 920167782  ;;  %v952_v18 = vsel %vm940_vm11, %v930_v24, %v933_v13 }
  0xee   : >> { %v872_v22 = vsub.s32 32, %v871_v62  ;;  %v873_v39 = vshll.u32 %v3512_v12, %v871_v62  ;;  %v876_v56 = vsub.s32 4294967266, %v871_v62  ;;  %v947_v28 = vsel %vm941_vm12, %v944_v60, %v946_v53 }
  0xef   : >> { %v950_v26 = vsel %vm942_vm3, %v933_v13, %v949_v54  ;;  %v953_v46 = vsel %vm943_vm13, %v939_v17, 1326507024  ;;  %v1023_v51 = vadd.s32 1, %v2448_v38  ;;  %vm4007_vm4 = vweird.f32 %v3221_v32 }
  0xf0   : >> { %v874_v25 = vshrl.u32 %v856_v44, %v872_v22  ;;  %v877_v63 = vadd.s32 127, %v876_v56  ;;  %v951_v48 = vsel %vm941_vm12, %v948_v19, %v950_v26  ;;  %v954_v20 = vsel %vm942_vm3, %v936_v1, %v953_v46 }
  0xf1   : >> { %v955_v52 = vsel %vm941_vm12, %v952_v18, %v954_v20  ;;  %v3553_v12 = vmul.u32.u64.low %v3514_v41, %v951_v48  ;;  %v3554_v62 = vmul.u32.u64.high %v3514_v41, %v951_v48, %v3553_v12  ;;  %vm1024_vm6 = vcmp.gt.s32.totalorder %v1023_v51, 0 }
  0xf2   : >> { %v875_v24 = vor.u32 %v874_v25, %v873_v39  ;;  %v878_v13 = vshll.u32 %v877_v63, 23  ;;  %v3558_v38 = vmul.u32.u64.low %v3514_v41, %v955_v52  ;;  %v3559_v44 = vmul.u32.u64.high %v3514_v41, %v955_v52, %v3558_v38 }
  0xf3   : >> { %vm3563_vm7 = vcmp.le.f32.partialorder %v800_v47, 0.7853982  ;;  %v887_v11 = vsel %vm802_vm10, %v886_v7, %v3493_v6  ;;  %v1021_v17 = vor.u32 8388608, %v3521_v50  ;;  %v1025_v60 = vsel %vm1024_vm6, %v1023_v51, 0 }
  0xf4   : >> { %v879_v53 = vor.u32 4788187, %v878_v13  ;;  %v882_v19 = vcvt.s32.f32 %v875_v24  ;;  %v963_v63 = vmul.u32 %v3514_v41, %v947_v28  ;;  %v1027_v54 = vand.u32 31, %v1025_v60 }
  0xf5   : >> { %vm786_vm8 = vcmp.lt.s32.totalorder %v3507_v43, 2  ;;  %vm787_vm9 = vcmp.eq.s32.totalorder %v3507_v43, 0  ;;  %vm790_vm11 = vcmp.eq.s32.totalorder %v3507_v43, 2  ;;  %v966_v47 = vadd.s32 1, %v3554_v62 }
  0xf6   : >> { %v880_v39 = vand.u32 2147483647, %v879_v53  ;;  %vm965_vm12 = vc.u32 %v3559_v44, %v3553_v12  ;;  %v1028_v6 = vsub.s32 32, %v1027_v54  ;;  %v3581_v50 = vmul.f32 9.0, %v2890_v0 }
  0xf7   : >> { %v3576_v22 = vpop.eup %2626  ;;  %v3588_v56 = vsel %vm3563_vm7, 0, %v887_v11  ;;  %v967_v18 = vsel %vm965_vm12, %v966_v47, %v3554_v62  ;;  %v3591_v28 = vshll.u32 %v1021_v17, 8  ;;  %v1030_v25 = vshll.u32 %v2749_v27, %v1027_v54 }
  0xf8   : >> { %4030 = vst [vmem:[#allocation8_spill] sm:$0xff] %v3581_v50  ;;  %v3583_v41 = vpop.eup %2628  ;;  %v3996_v7 = vxor.u32 2147483648, %v3576_v22  ;;  %v883_v46 = vmul.f32 %v882_v19, %v880_v39  ;;  %v968_v51 = vadd.s32 %v967_v18, %v963_v63  ;;  %v1026_v20 = vshrl.u32 %v1025_v60, 5 }
  0xf9   : >> { %v3997_v26 = vxor.u32 2147483648, %v3583_v41  ;;  %v1031_v52 = vshrl.u32 %v2750_v29, %v1028_v6  ;;  %v1033_v24 = vshll.u32 %v2750_v29, %v1027_v54  ;;  %v1034_v11 = vshrl.u32 %v2751_v31, %v1028_v6 }
  0xfa   : >> { %v792_v48 = vsel %vm790_vm11, %v3996_v7, %v3583_v41  ;;  %v884_v13 = vxor.u32 2147483648, %v883_v46  ;;  %v969_v38 = vadd.s32 536870912, %v968_v51  ;;  %v1036_v53 = vshll.u32 %v2751_v31, %v1027_v54 }
  0xfb   : >> { %v789_v62 = vsel %vm787_vm9, %v3576_v22, %v3997_v26  ;;  %v1037_v60 = vshrl.u32 %v3998_v33, %v1028_v6  ;;  %v1039_v19 = vshll.u32 %v3998_v33, %v1027_v54  ;;  %vm910_vm13 = vcmp.lt.s32.totalorder %v3440_v36, 0 }
  0xfc   : >> { %v793_v17 = vsel %vm786_vm8, %v789_v62, %v792_v48  ;;  %v885_v47 = vsel %vm802_vm10, %v884_v13, %v883_v46  ;;  %v970_v39 = vshrl.u32 %v969_v38, 30  ;;  %v1032_v18 = vor.u32 %v1031_v52, %v1030_v25 }
  0xfd   : >> { %v794_v63 = vsel %vm4007_vm4, nan, %v793_v17  ;;  %v888_v43 = vsel %vm3563_vm7, %v3295_v8, %v885_v47  ;;  %v1040_v48 = vshrl.u32 %v2753_v35, %v1028_v6  ;;  %v1042_v62 = vshll.u32 %v2753_v35, %v1027_v54 }
  0xfe   : >> { %v796_v7 = vrot.slane %v794_v63, 6  ;;  %2630 = vcosq.f32 %v888_v43  ;;  %v971_v26 = vshll.u32 %v970_v39, 30  ;;  %v1035_v33 = vor.u32 %v1034_v11, %v1033_v24 }
  0xff   : >> { %v1043_v17 = vshrl.u32 %v4000_v42, %v1028_v6  ;;  %2632 = vsinq.f32 %v888_v43  ;;  %v1038_v46 = vor.u32 %v1037_v60, %v1036_v53  ;;  %v1041_v13 = vor.u32 %v1040_v48, %v1039_v19 }
 0x100   : >> { %798 = vst [vmem:[%s2888_s3 + $0x20] sm:$0x1c] %v796_v7  ;;  %vm1045_vm10 = vcmp.lt.s32.totalorder %v1026_v20, 1  ;;  %v3625_v25 = vsub.s32 %v968_v51, %v971_v26  ;;  %v1029_v52 = vshrl.u32 %v2749_v27, %v1028_v6  ;;  %vm1047_vm2 = vcmp.lt.s32.totalorder %v1026_v20, 3 }
 0x101   : >> { %v1044_v1 = vor.u32 %v1043_v17, %v1042_v62  ;;  %v994_v38 = vsub.s32 4, %v970_v39  ;;  %vm1046_vm3 = vcmp.lt.s32.totalorder %v1026_v20, 2  ;;  %vm1048_vm6 = vcmp.lt.s32.totalorder %v1026_v20, 4 }
 0x102   : >> { %v1124_v54 = vand.u32 2139095040, %v3581_v50  ;;  %v974_v24 = vsub.s32 0, %v3625_v25  ;;  %v1050_v11 = vsel %vm1048_vm6, %v1038_v46, 2102212464  ;;  %v1053_v7 = vsel %vm1045_vm10, %v1032_v18, %v1035_v33 }
 0x103   : >> { %v1054_v63 = vsel %vm1048_vm6, %v1041_v13, 920167782  ;;  %v893_v53 = vand.u32 3, %v3588_v56  ;;  %v1057_v51 = vsel %vm1045_vm10, %v1035_v33, %v1038_v46  ;;  %v1058_v6 = vsel %vm1048_vm6, %v1044_v1, 1326507024 }
 0x104   : >> { %v1055_v26 = vsel %vm1047_vm2, %v1038_v46, %v1054_v63  ;;  %v2445_v60 = vmin.u32 %v974_v24, %v3625_v25  ;;  %v1049_v19 = vsel %vm1045_vm10, %v1029_v52, %v1032_v18  ;;  %v1051_v47 = vsel %vm1047_vm2, %v1035_v33, %v1050_v11 }
 0x105   : >> { %v4001_v43 = vand.u32 2147483647, %v3581_v50  ;;  %v995_v48 = vsel %vm910_vm13, %v994_v38, %v970_v39  ;;  %v1056_v62 = vsel %vm1046_vm3, %v1053_v7, %v1055_v26  ;;  %v1059_v17 = vsel %vm1047_vm2, %v1041_v13, %v1058_v6 }
 0x106   : >> { %v1125_v42 = vshrl.u32 %v1124_v54, 23  ;;  %vm4006_vm7 = vweird.f32 %v3295_v8  ;;  %v976_v46 = vclz %v2445_v60  ;;  %v1060_v1 = vsel %vm1046_vm3, %v1057_v51, %v1059_v17 }
 0x107   : >> { %v3645_v24 = vmul.u32.u64.low %v3591_v28, %v1056_v62  ;;  %v3646_v18 = vmul.u32.u64.high %v3591_v28, %v1056_v62, %v3645_v24  ;;  %v1052_v33 = vsel %vm1046_vm3, %v1049_v19, %v1051_v47  ;;  %vm894_vm8 = vcmp.lt.s32.totalorder %v893_v53, 2 }
 0x108   : >> { %v3651_v52 = vmul.u32.u64.low %v3591_v28, %v1060_v1  ;;  %v3652_v39 = vmul.u32.u64.high %v3591_v28, %v1060_v1, %v3651_v52  ;;  %v2452_v38 = vadd.s32 4294967169, %v1125_v42  ;;  %vm895_vm9 = vcmp.eq.s32.totalorder %v893_v53, 0 }
 0x109   : >> { %vm3656_vm11 = vcmp.le.f32.partialorder %v908_v30, 0.7853982  ;;  %v2446_v54 = vadd.s32 4294967294, %v976_v46  ;;  %vm898_vm12 = vcmp.eq.s32.totalorder %v893_v53, 2  ;;  %v964_v11 = vadd.s32 %v3553_v12, %v3559_v44 }
 0x10a   : >> { %v1128_v20 = vand.u32 8388607, %v4001_v43  ;;  %v1131_v7 = vadd.s32 1, %v2452_v38  ;;  %v3666_v42 = vsel %vm3656_vm11, 0, %v995_v48  ;;  %v1068_v63 = vmul.u32 %v3591_v28, %v1052_v33 }
 0x10b   : >> { %vm2447_vm10 = vcmp.lt.s32.totalorder %v2446_v54, 0  ;;  %v1071_v30 = vadd.s32 1, %v3646_v18  ;;  %v3670_v26 = vpop.eup %2630  ;;  %v3673_v6 = vand.u32 3, %v3666_v42  ;;  %vm1070_vm2 = vc.u32 %v3652_v39, %v3645_v24 }
 0x10c   : >> { %v979_v51 = vsel %vm2447_vm10, 0, %v2446_v54  ;;  %vm1132_vm3 = vcmp.gt.s32.totalorder %v1131_v7, 0  ;;  %v3677_v12 = vpop.eup %2632  ;;  %v4002_v44 = vxor.u32 2147483648, %v3670_v26  ;;  %v1129_v62 = vor.u32 8388608, %v1128_v20 }
 0x10d   : >> { %v980_v60 = vsub.s32 32, %v979_v51  ;;  %v981_v19 = vshll.u32 %v3625_v25, %v979_v51  ;;  %v984_v28 = vsub.s32 4294967266, %v979_v51  ;;  %v4003_v47 = vxor.u32 2147483648, %v3677_v12 }
 0x10e   : >> { %v1072_v48 = vsel %vm1070_vm2, %v1071_v30, %v3646_v18  ;;  %v1133_v17 = vsel %vm1132_vm3, %v1131_v7, 0  ;;  %v900_v46 = vsel %vm898_vm12, %v4002_v44, %v3677_v12  ;;  %v1322_v54 = vadd.s32 3, %v3073_v58 }
 0x10f   : >> { %v982_v1 = vshrl.u32 %v964_v11, %v980_v60  ;;  %v985_v33 = vadd.s32 127, %v984_v28  ;;  %v1073_v52 = vadd.s32 %v1072_v48, %v1068_v63  ;;  %v897_v25 = vsel %vm895_vm9, %v3670_v26, %v4003_v47 }
 0x110   : >> { %v1135_v38 = vand.u32 31, %v1133_v17  ;;  %v3693_v18 = vadd.s32 3, %v3098_v15  ;;  %v901_v20 = vsel %vm894_vm8, %v897_v25, %v900_v46  ;;  %v3699_v60 = vadd.s32 3, %v3215_v59 }
 0x111   : >> { %v983_v7 = vor.u32 %v982_v1, %v981_v19  ;;  %v986_v30 = vshll.u32 %v985_v33, 23  ;;  %v1074_v51 = vadd.s32 536870912, %v1073_v52  ;;  %v902_v11 = vsel %vm4006_vm7, nan, %v901_v20 }
 0x112   : >> { %v1136_v63 = vsub.s32 32, %v1135_v38  ;;  %v3702_v28 = vadd.s32 3, %v3316_v34  ;;  %v904_v58 = vrot.slane %v902_v11, 3  ;;  %v1134_v53 = vshrl.u32 %v1133_v17, 5 }
 0x113   : >> { %v987_v48 = vor.u32 4788187, %v986_v30  ;;  %v990_v15 = vcvt.s32.f32 %v983_v7  ;;  %v3704_v43 = vshrl.u32 %v1074_v51, 30  ;;  %v1138_v19 = vshll.u32 %v2749_v27, %v1135_v38 }
 0x114   : >> { %v1141_v46 = vshll.u32 %v2750_v29, %v1135_v38  ;;  %v3708_v1 = vand.u32 3, %v1322_v54  ;;  %906 = vst [vmem:[%s2888_s3 + $0x20] sm:$0xe0] %v904_v58  ;;  %v1139_v25 = vshrl.u32 %v2750_v29, %v1136_v63  ;;  %v1142_v34 = vshrl.u32 %v2751_v31, %v1136_v63 }
 0x115   : >> { %v988_v33 = vand.u32 2147483647, %v987_v48  ;;  %v1076_v59 = vshll.u32 %v3704_v43, 30  ;;  %v1144_v20 = vshll.u32 %v2751_v31, %v1135_v38  ;;  %v4033_v7 = vmov 2102212464  }
 0x116   : >> { %v1145_v30 = vshrl.u32 %v4033_v7, %v1136_v63  ;;  %v1147_v17 = vshll.u32 %v4033_v7, %v1135_v38  ;;  %v1148_v51 = vshrl.u32 %v2753_v35, %v1136_v63  ;;  %v1069_v54 = vadd.s32 %v3645_v24, %v3652_v39 }
 0x117   : >> { %v991_v11 = vmul.f32 %v990_v15, %v988_v33  ;;  %v3720_v58 = vsub.s32 %v1073_v52, %v1076_v59  ;;  %v3722_v48 = vshll.u32 %v1129_v62, 8  ;;  %v1137_v29 = vshrl.u32 %v2749_v27, %v1136_v63 }
 0x118   : >> { %v1150_v44 = vshll.u32 %v2753_v35, %v1135_v38  ;;  %v4034_v47 = vmov 1326507024   ;;  %vm1324_vm6 = vcmp.lt.s32.totalorder %v3708_v1, 2  ;;  %vm1325_vm8 = vcmp.eq.s32.totalorder %v3708_v1, 0 }
 0x119   : >> { %v1151_v31 = vshrl.u32 %v4034_v47, %v1136_v63  ;;  %v992_v7 = vxor.u32 2147483648, %v991_v11  ;;  %v1079_v15 = vsub.s32 0, %v3720_v58  ;;  %v1140_v33 = vor.u32 %v1139_v25, %v1138_v19 }
 0x11a   : >> { %v1143_v50 = vor.u32 %v1142_v34, %v1141_v46  ;;  %v1146_v24 = vor.u32 %v1145_v30, %v1144_v20  ;;  %v1149_v39 = vor.u32 %v1148_v51, %v1147_v17  ;;  %vm1153_vm9 = vcmp.lt.s32.totalorder %v1134_v53, 1 }
 0x11b   : >> { %v1152_v52 = vor.u32 %v1151_v31, %v1150_v44  ;;  %v993_v27 = vsel %vm910_vm13, %v992_v7, %v991_v11  ;;  %v2449_v35 = vmin.u32 %v1079_v15, %v3720_v58  ;;  %vm1154_vm12 = vcmp.lt.s32.totalorder %v1134_v53, 2 }
 0x11c   : >> { %vm1156_vm10 = vcmp.lt.s32.totalorder %v1134_v53, 4  ;;  %v996_v47 = vsel %vm3656_vm11, %v3440_v36, %v993_v27  ;;  %vm1155_vm2 = vcmp.lt.s32.totalorder %v1134_v53, 3  ;;  %v1157_v62 = vsel %vm1153_vm9, %v1137_v29, %v1140_v33 }
 0x11d   : >> { %v1158_v38 = vsel %vm1156_vm10, %v1146_v24, 2102212464  ;;  %2634 = vcosq.f32 %v996_v47  ;;  %v1081_v63 = vclz %v2449_v35  ;;  %v1161_v19 = vsel %vm1153_vm9, %v1140_v33, %v1143_v50 }
 0x11e   : >> { %v1159_v44 = vsel %vm1155_vm2, %v1143_v50, %v1158_v38  ;;  %2636 = vsinq.f32 %v996_v47  ;;  %v1099_v46 = vsub.s32 4, %v3704_v43  ;;  %v1162_v59 = vsel %vm1156_vm10, %v1149_v39, 920167782 }
 0x11f   : >> { %v1165_v25 = vsel %vm1153_vm9, %v1143_v50, %v1146_v24  ;;  %v2450_v13 = vadd.s32 4294967294, %v1081_v63  ;;  %v1160_v34 = vsel %vm1154_vm12, %v1157_v62, %v1159_v44  ;;  %v1163_v20 = vsel %vm1155_vm2, %v1146_v24, %v1162_v59 }
 0x120   : >> { %v1166_v30 = vsel %vm1156_vm10, %v1152_v52, 1326507024  ;;  %v1164_v17 = vsel %vm1154_vm12, %v1161_v19, %v1163_v20  ;;  %v4035_v11 = vxor.u32 2147483648, %v3164_v2  ;;  %vm1328_vm13 = vcmp.eq.s32.totalorder %v3708_v1, 2 }
 0x121   : >> { %v1167_v51 = vsel %vm1155_vm2, %v1149_v39, %v1166_v30  ;;  %vm1015_vm11 = vcmp.lt.s32.totalorder %v3481_v14, 0  ;;  %vm2451_vm3 = vcmp.lt.s32.totalorder %v2450_v13, 0  ;;  %vm1006_vm9 = vcmp.eq.s32.totalorder %v3673_v6, 2 }
 0x122   : >> { %v1327_v29 = vsel %vm1325_vm8, %v3156_v61, %v4035_v11  ;;  %v1168_v50 = vsel %vm1154_vm12, %v1165_v25, %v1167_v51  ;;  %v3757_v31 = vmul.u32.u64.low %v3722_v48, %v1164_v17  ;;  %v3758_v7 = vmul.u32.u64.high %v3722_v48, %v1164_v17, %v3757_v31 }
 0x123   : >> { %v1084_v15 = vsel %vm2451_vm3, 0, %v2450_v13  ;;  %v3763_v33 = vmul.u32.u64.low %v3722_v48, %v1168_v50  ;;  %v3764_v24 = vmul.u32.u64.high %v3722_v48, %v1168_v50, %v3763_v33  ;;  %v4036_v39 = vxor.u32 2147483648, %v3156_v61 }
 0x124   : >> { %vm1003_vm8 = vcmp.eq.s32.totalorder %v3673_v6, 0  ;;  %v1085_v53 = vsub.s32 32, %v1084_v15  ;;  %v1086_v27 = vshll.u32 %v3720_v58, %v1084_v15  ;;  %v1089_v35 = vsub.s32 4294967266, %v1084_v15 }
 0x125   : >> { %v1330_v52 = vsel %vm1328_vm13, %v4036_v39, %v3164_v2  ;;  %vm1002_vm12 = vcmp.lt.s32.totalorder %v3673_v6, 2  ;;  %v1176_v62 = vmul.u32 %v3722_v48, %v1160_v34  ;;  %v1431_v61 = vand.u32 3, %v3693_v18 }
 0x126   : >> { %v1331_v47 = vsel %vm1324_vm6, %v1327_v29, %v1330_v52  ;;  %v1539_v2 = vand.u32 3, %v3699_v60  ;;  %v1087_v63 = vshrl.u32 %v1069_v54, %v1085_v53  ;;  %v1090_v44 = vadd.s32 127, %v1089_v35 }
 0x127   : >> { %v1332_v38 = vsel %vm242_vm0, nan, %v1331_v47  ;;  %v1179_v58 = vadd.s32 1, %v3758_v7  ;;  %vm1178_vm6 = vc.u32 %v3764_v24, %v3757_v31  ;;  %vm1432_vm10 = vcmp.lt.s32.totalorder %v1431_v61, 2 }
 0x128   : >> { %v1334_v19 = vrot.slane %v1332_v38, 7  ;;  %vm1433_vm2 = vcmp.eq.s32.totalorder %v1431_v61, 0  ;;  %v1648_v1 = vand.u32 3, %v3702_v28  ;;  %vm1000_vm13 = vweird.f32 %v3440_v36 }
 0x129   : >> { %v4037_v0 = vand.u32 2147483647, %v3481_v14  ;;  %v1088_v60 = vor.u32 %v1087_v63, %v1086_v27  ;;  %v1091_v54 = vshll.u32 %v1090_v44, 23  ;;  %v1180_v48 = vsel %vm1178_vm6, %v1179_v58, %v3758_v7 }
 0x12a   : >> { %1336 = vst [vmem:[%s2888_s3 + $0x40] sm:$0xe] %v1334_v19  ;;  %v4040_v59 = vxor.u32 2147483648, %v3217_v37  ;;  %v1181_v13 = vadd.s32 %v1180_v48, %v1176_v62  ;;  %vm1436_vm3 = vcmp.eq.s32.totalorder %v1431_v61, 2  ;;  %vm1540_vm7 = vcmp.lt.s32.totalorder %v1539_v2, 2  ;;  %v3801_v11 = vpop.eup %2634 }
 0x12b   : >> { %vm3786_vm0 = vcmp.le.f32.partialorder %v4037_v0, 0.7853982  ;;  %vm1541_vm4 = vcmp.eq.s32.totalorder %v1539_v2, 0  ;;  %v1092_v28 = vor.u32 4788187, %v1091_v54  ;;  %v1095_v34 = vcvt.s32.f32 %v1088_v60  ;;  %v3807_v15 = vpop.eup %2636 }
 0x12c   : >> { %v1435_v25 = vsel %vm1433_vm2, %v3210_v57, %v4040_v59  ;;  %v4041_v20 = vxor.u32 2147483648, %v3210_v57  ;;  %v4042_v17 = vxor.u32 2147483648, %v3290_v55  ;;  %v1100_v29 = vsel %vm1015_vm11, %v1099_v46, %v3704_v43 }
 0x12d   : >> { %v1182_v50 = vadd.s32 536870912, %v1181_v13  ;;  %vm1544_vm6 = vcmp.eq.s32.totalorder %v1539_v2, 2  ;;  %v1007_v57 = vxor.u32 2147483648, %v3801_v11  ;;  %v4043_v39 = vxor.u32 2147483648, %v3284_v10 }
 0x12e   : >> { %v1438_v30 = vsel %vm1436_vm3, %v4041_v20, %v3217_v37  ;;  %v1543_v51 = vsel %vm1541_vm4, %v3284_v10, %v4042_v17  ;;  %v1093_v37 = vand.u32 2147483647, %v1092_v28  ;;  %v1004_v53 = vxor.u32 2147483648, %v3807_v15 }
 0x12f   : >> { %v1439_v7 = vsel %vm1432_vm10, %v1435_v25, %v1438_v30  ;;  %v1546_v52 = vsel %vm1544_vm6, %v4043_v39, %v3290_v55  ;;  %v3816_v43 = vshrl.u32 %v1182_v50, 30  ;;  %v1008_v35 = vsel %vm1006_vm9, %v1007_v57, %v3807_v15 }
 0x130   : >> { %v1440_v33 = vsel %vm350_vm5, nan, %v1439_v7  ;;  %v1547_v27 = vsel %vm1540_vm7, %v1543_v51, %v1546_v52  ;;  %v1096_v3 = vmul.f32 %v1095_v34, %v1093_v37  ;;  %vm1650_vm5 = vcmp.eq.s32.totalorder %v1648_v1, 0 }
 0x131   : >> { %v1442_v46 = vcombine.low %v1440_v33, %v1440_v33  ;;  %v1548_v10 = vsel %vm459_vm15, nan, %v1547_v27  ;;  %v1005_v55 = vsel %vm1003_vm8, %v3801_v11, %v1004_v53  ;;  %v1184_v47 = vshll.u32 %v3816_v43, 30 }
 0x132   : >> { %v1550_v62 = vrot.slane %v1548_v10, 1  ;;  %vm1649_vm4 = vcmp.lt.s32.totalorder %v1648_v1, 2  ;;  %v1009_v38 = vsel %vm1002_vm12, %v1005_v55, %v1008_v35  ;;  %v1097_v61 = vxor.u32 2147483648, %v1096_v3 }
 0x133   : >> { %1444 = vst [vmem:[%s2888_s3 + $0x40] sm:$0x70] %v1442_v46  ;;  %v4044_v4 = vxor.u32 2147483648, %v3386_v21  ;;  %vm1653_vm15 = vcmp.eq.s32.totalorder %v1648_v1, 2  ;;  %v1010_v63 = vsel %vm1000_vm13, nan, %v1009_v38  ;;  %v3840_v44 = vsub.s32 %v1181_v13, %v1184_v47 }
 0x134   : >> { %1552 = vst [vmem:[%s2888_s3 + $0x50] ss:$-12 sps:$4 sm:$0x83] %v1550_v62   ;;  %v4045_v58 = vxor.u32 2147483648, %v3380_v49  ;;  %1011 = vst [vmem:[%s2888_s3 + $0x30] sm:$0x7] %v1010_v63  ;;  %v1098_v6 = vsel %vm1015_vm11, %v1097_v61, %v1096_v3  ;;  %v1177_v28 = vadd.s32 %v3757_v31, %v3764_v24 }
 0x135   : >> { %v1652_v2 = vsel %vm1650_vm5, %v3380_v49, %v4044_v4  ;;  %v1755_v60 = vadd.s32 3, %v3458_v40  ;;  %v1101_v1 = vsel %vm3786_vm0, %v3481_v14, %v1098_v6  ;;  %v1102_v54 = vsel %vm3786_vm0, 0, %v1100_v29 }
 0x136   : >> { %v1655_v19 = vsel %vm1653_vm15, %v4045_v58, %v3386_v21  ;;  %v1187_v48 = vsub.s32 0, %v3840_v44  ;;  %2638 = vcosq.f32 %v1101_v1  ;;  %v1863_v25 = vadd.s32 3, %v3487_v5 }
 0x137   : >> { %v1656_v0 = vsel %vm1649_vm4, %v1652_v2, %v1655_v19  ;;  %v1756_v59 = vand.u32 3, %v1755_v60  ;;  %2640 = vsinq.f32 %v1101_v1  ;;  %v3859_v13 = vand.u32 3, %v1102_v54 }
 0x138   : >> { %v1657_v49 = vsel %vm567_vm1, nan, %v1656_v0  ;;  %v2453_v40 = vmin.u32 %v1187_v48, %v3840_v44  ;;  %v4046_v9 = vxor.u32 2147483648, %v3489_v23  ;;  %v4047_v5 = vxor.u32 2147483648, %v3483_v45 }
 0x139   : >> { %v1659_v21 = vrot.slane %v1657_v49, 6  ;;  %vm1757_vm7 = vcmp.lt.s32.totalorder %v1756_v59, 2  ;;  %vm1758_vm11 = vcmp.eq.s32.totalorder %v1756_v59, 0  ;;  %vm1761_vm9 = vcmp.eq.s32.totalorder %v1756_v59, 2 }
 0x13a   : >> { %v1189_v18 = vclz %v2453_v40  ;;  %v1760_v34 = vsel %vm1758_vm11, %v3483_v45, %v4046_v9  ;;  %v1763_v20 = vsel %vm1761_vm9, %v4047_v5, %v3489_v23  ;;  %v1864_v30 = vand.u32 3, %v1863_v25  ;;  %v4054_v25 = vld [vmem:[#allocation8_spill] sm:$0xff] }
 0x13b   : >> { %1661 = vst [vmem:[%s2888_s3 + $0x50] sm:$0x1c] %v1659_v21  ;;  %v1764_v17 = vsel %vm1757_vm7, %v1760_v34, %v1763_v20  ;;  %v1968_v51 = vadd.s32 3, %v3588_v56  ;;  %v2076_v29 = vadd.s32 3, %v3666_v42  ;;  %v2185_v31 = vadd.s32 3, %v1102_v54 }
 0x13c   : >> { %vm1111_vm1 = vcmp.eq.s32.totalorder %v3859_v13, 2  ;;  %v2454_v24 = vadd.s32 4294967294, %v1189_v18  ;;  %v1765_v50 = vsel %vm675_vm14, nan, %v1764_v17  ;;  %vm1865_vm8 = vcmp.lt.s32.totalorder %v1864_v30, 2 }
 0x13d   : >> { %vm1866_vm12 = vcmp.eq.s32.totalorder %v1864_v30, 0  ;;  %vm1108_vm10 = vcmp.eq.s32.totalorder %v3859_v13, 0  ;;  %v1767_v45 = vrot.slane %v1765_v50, 3  ;;  %v4048_v23 = vxor.u32 2147483648, %v3583_v41 }
 0x13e   : >> { %vm1869_vm2 = vcmp.eq.s32.totalorder %v1864_v30, 2  ;;  %v1969_v56 = vand.u32 3, %v1968_v51  ;;  %vm1107_vm0 = vcmp.lt.s32.totalorder %v3859_v13, 2  ;;  %vm2455_vm3 = vcmp.lt.s32.totalorder %v2454_v24, 0 }
 0x13f   : >> { %v1868_v7 = vsel %vm1866_vm12, %v3576_v22, %v4048_v23  ;;  %v4049_v42 = vxor.u32 2147483648, %v3576_v22  ;;  %v2077_v37 = vand.u32 3, %v2076_v29  ;;  %v2186_v33 = vand.u32 3, %v2185_v31  ;;  %1769 = vst [vmem:[%s2888_s3 + $0x50] sm:$0xe0] %v1767_v45 }
 0x140   : >> { %v1192_v39 = vsel %vm2455_vm3, 0, %v2454_v24  ;;  %vm1970_vm14 = vcmp.lt.s32.totalorder %v1969_v56, 2  ;;  %vm1971_vm6 = vcmp.eq.s32.totalorder %v1969_v56, 0  ;;  %vm4050_vm5 = vweird.f32 %v3221_v32 }
 0x141   : >> { %v1871_v16 = vsel %vm1869_vm2, %v4049_v42, %v3583_v41  ;;  %v1193_v46 = vsub.s32 32, %v1192_v39  ;;  %v1194_v27 = vshll.u32 %v3840_v44, %v1192_v39  ;;  %v1197_v35 = vsub.s32 4294967266, %v1192_v39 }
 0x142   : >> { %v1872_v52 = vsel %vm1865_vm8, %v1868_v7, %v1871_v16  ;;  %v4051_v10 = vxor.u32 2147483648, %v3677_v12  ;;  %vm1974_vm4 = vcmp.eq.s32.totalorder %v1969_v56, 2  ;;  %vm2078_vm15 = vcmp.lt.s32.totalorder %v2077_v37, 2 }
 0x143   : >> { %v1873_v3 = vsel %vm4050_vm5, nan, %v1872_v52  ;;  %vm2079_vm7 = vcmp.eq.s32.totalorder %v2077_v37, 0  ;;  %v1195_v41 = vshrl.u32 %v1177_v28, %v1193_v46  ;;  %v1198_v55 = vadd.s32 127, %v1197_v35  ;;  %v2639_v61 = vpop.eup %2638 }
 0x144   : >> { %1874 = vst [vmem:[%s2888_s3 + $0x60] sm:$0x7] %v1873_v3  ;;  %v1973_v22 = vsel %vm1971_vm6, %v3670_v26, %v4051_v10  ;;  %v4052_v47 = vxor.u32 2147483648, %v3670_v26  ;;  %v2081_v38 = vsel %vm2079_vm7, %v3801_v11, %v1004_v53  ;;  %vm2082_vm11 = vcmp.eq.s32.totalorder %v2077_v37, 2 }
 0x145   : >> { %vm2187_vm9 = vcmp.lt.s32.totalorder %v2186_v33, 2  ;;  %vm2188_vm8 = vcmp.eq.s32.totalorder %v2186_v33, 0  ;;  %v1196_v4 = vor.u32 %v1195_v41, %v1194_v27  ;;  %v1199_v2 = vshll.u32 %v1198_v55, 23 }
 0x146   : >> { %v1976_v62 = vsel %vm1974_vm4, %v4052_v47, %v3677_v12  ;;  %vm4053_vm12 = vweird.f32 %v3295_v8  ;;  %v2084_v26 = vsel %vm2082_vm11, %v1007_v57, %v3807_v15  ;;  %v2641_v12 = vpop.eup %2640  ;;  %v1112_v44 = vxor.u32 2147483648, %v2639_v61 }
 0x147   : >> { %v1977_v32 = vsel %vm1970_vm14, %v1973_v22, %v1976_v62  ;;  %v2085_v53 = vsel %vm2078_vm15, %v2081_v38, %v2084_v26  ;;  %vm2191_vm2 = vcmp.eq.s32.totalorder %v2186_v33, 2  ;;  %v1109_v19 = vxor.u32 2147483648, %v2641_v12 }
 0x148   : >> { %v1978_v63 = vsel %vm4053_vm12, nan, %v1977_v32  ;;  %v1200_v6 = vor.u32 4788187, %v1199_v2  ;;  %v1203_v0 = vcvt.s32.f32 %v1196_v4  ;;  %v2086_v60 = vsel %vm1000_vm13, nan, %v2085_v53 }
 0x149   : >> { %v1980_v58 = vrot.slane %v1978_v63, 5  ;;  %vm1105_vm3 = vweird.f32 %v3481_v14  ;;  %v1113_v8 = vsel %vm1111_vm1, %v1112_v44, %v2641_v12  ;;  %v2088_v11 = vrot.slane %v2086_v60, 2 }
 0x14a   : >> { %v2193_v15 = vsel %vm2191_vm2, %v1112_v44, %v2641_v12  ;;  %v1110_v57 = vsel %vm1108_vm10, %v2639_v61, %v1109_v19  ;;  %v1201_v1 = vand.u32 2147483647, %v1200_v6  ;;  %v2190_v54 = vsel %vm2188_vm8, %v2639_v61, %v1109_v19 }
 0x14b   : >> { %1982 = vst [vmem:[%s2888_s3 + $0x60] sm:$0x38] %v1980_v58  ;;  %v1114_v36 = vsel %vm1107_vm0, %v1110_v57, %v1113_v8  ;;  %2090 = vst [vmem:[%s2888_s3 + $0x70] ss:$-12 sps:$4 sm:$0xc1] %v2088_v11   ;;  %v2194_v14 = vsel %vm2187_vm9, %v2190_v54, %v2193_v15  ;;  %vm1123_vm13 = vcmp.lt.s32.totalorder %v4054_v25, 0  ;;  %vm1213_vm15 = vweird.f32 %v4054_v25 }
 0x14c   : >> { %v1115_v48 = vsel %vm1105_vm3, nan, %v1114_v36  ;;  %v1204_v49 = vmul.f32 %v1203_v0, %v1201_v1  ;;  %v2195_v21 = vsel %vm1105_vm3, nan, %v2194_v14  ;;  %v1207_v40 = vsub.s32 4, %v3816_v43 }
 0x14d   : >> { %v1117_v59 = vrot.slane %v1115_v48, 5  ;;  %v2197_v28 = vrot.slane %v2195_v21, 7  ;;  %v4055_v18 = vand.u32 2147483647, %v4054_v25 }
 0x14e   : >> { %v1205_v9 = vxor.u32 2147483648, %v1204_v49  ;;  %v1208_v34 = vsel %vm1123_vm13, %v1207_v40, %v3816_v43 }
 0x14f   : >> { %vm1122_vm1 = vcmp.le.f32.partialorder %v4055_v18, 0.7853982  ;;  %1119 = vst [vmem:[%s2888_s3 + $0x30] sm:$0x38] %v1117_v59  ;;  %2199 = vst [vmem:[%s2888_s3 + $0x70] sm:$0xe] %v2197_v28 }
 0x150   : >> { %v1206_v13 = vsel %vm1123_vm13, %v1205_v9, %v1204_v49  ;;  %v1210_v20 = vsel %vm1122_vm1, 0, %v1208_v34 }
 0x151   : >> { %v1209_v5 = vsel %vm1122_vm1, %v4054_v25, %v1206_v13  ;;  %v2293_v30 = vadd.s32 3, %v1210_v20  ;;  %v1214_v17 = vand.u32 3, %v1210_v20 }
 0x152   : >> { %2642 = vcosq.f32 %v1209_v5 }
 0x153   : >> { %2644 = vsinq.f32 %v1209_v5  ;;  %v2294_v51 = vand.u32 3, %v2293_v30  ;;  %vm1219_vm10 = vcmp.eq.s32.totalorder %v1214_v17, 2  ;;  %vm1216_vm14 = vcmp.eq.s32.totalorder %v1214_v17, 0 }
 0x154   : >> { %vm1215_vm5 = vcmp.lt.s32.totalorder %v1214_v17, 2 }
 0x155   : >> { %vm2299_vm0 = vcmp.eq.s32.totalorder %v2294_v51, 2  ;;  %vm2296_vm6 = vcmp.eq.s32.totalorder %v2294_v51, 0  ;;  %vm2295_vm4 = vcmp.lt.s32.totalorder %v2294_v51, 2 }
 0x15f   : >> { %v2643_v29 = vpop.eup %2642 }
 0x160   : >> { %v2645_v31 = vpop.eup %2644  ;;  %v1220_v24 = vxor.u32 2147483648, %v2643_v29 }
 0x161   : >> { %v1217_v50 = vxor.u32 2147483648, %v2645_v31 }
 0x162   : >> { %v1221_v43 = vsel %vm1219_vm10, %v1220_v24, %v2645_v31  ;;  %v2301_v45 = vsel %vm2299_vm0, %v1220_v24, %v2645_v31 }
 0x163   : >> { %v1218_v23 = vsel %vm1216_vm14, %v2643_v29, %v1217_v50  ;;  %v2298_v7 = vsel %vm2296_vm6, %v2643_v29, %v1217_v50 }
 0x164   : >> { %v1222_v56 = vsel %vm1215_vm5, %v1218_v23, %v1221_v43  ;;  %v2302_v42 = vsel %vm2295_vm4, %v2298_v7, %v2301_v45  ;;  %139 = sbr.rel (!%p137_p11) target bundleno = 54 (0x36), region = 78 }
 0x165   : >> { %v1223_v16 = vsel %vm1213_vm15, nan, %v1222_v56  ;;  %v2303_v37 = vsel %vm1213_vm15, nan, %v2302_v42 }
 0x166   : >> { %v1225_v33 = vrot.slane %v1223_v16, 2  ;;  %v2305_v39 = vcombine.low %v2303_v37, %v2303_v37 }
 0x168   : >> { %1227 = vst [vmem:[%s2888_s3 + $0x40] ss:$-12 sps:$4 sm:$0xc1] %v1225_v33   ;;  %2307 = vst [vmem:[%s2888_s3 + $0x70] sm:$0x70] %v2305_v39 }
 0x169   : > { %2687 = shalt.err (!%p2684_p2)
}
 0x16a   : > { %s2688_s24 = scalar_lea.hbm %s3935_s13, 2048  ;;  %s2692_s27 = scalar_lea.hbm %s3982_s1, 4096 }
 0x16b   : > { %p2689_p4 = scmp.ne.s32.totalorder %s3935_s13, %s2688_s24  ;;  %p2693_p0 = scmp.lt.s32.totalorder %s3935_s13, %s3982_s1 }
 0x16c   : > { %p2694_p6 = scmp.lt.s32.totalorder %s2692_s27, %s2688_s24 }
 0x16d   : > { %p2690_p9 = pnand %p2689_p4, %p4056_p13 }
 0x16e   : > { %p2695_p11 = por %p2694_p6, %p2693_p0 }
 0x16f   : > { %p2691_p7 = pneg %p2690_p9 }
 0x171   : > { %p2696_p12 = pnand %p2695_p11, %p2691_p7 }
 0x173   : > { %2699 = shalt.err (!%p2696_p12)
}
 0x174   : > { %s2756_s30 = smov 256   ;;  %s2757_s2 = smov 512  }
 0x175   : > { %s2758_s17 = smov 16  }
 0x176   : > { %2545 = dma.vmem_to_hbm [thread:$0]  (%p4056_p13), %s3938_s14, 2048, %s3935_s13, %s2309_s16, %s2756_s30, %s2757_s2, %s2758_s17  }
 0x177 PF: > { %s2337_s3 = sand.u32 1, %s2730_s6   ;;  %p4057_p1 = scmp.ne.s32.totalorder %s4011_s19, 0 }
 0x178   : > { %p4058_p3 = scmp.ge.s32.totalorder %s2742_s9, 2  ;;  %s2338_s4 = scalar_lea.sflag [#allocation4], %s2337_s3 }
 0x17a   : > { %p2552_p5 = pnand %p4058_p3, %p4057_p1 }
 0x17c   : > { %p2553_p8 = pneg %p2552_p5 }
 0x17e   : > { %2725 = dma.done.wait (%p2553_p8), %s2338_s4, 2048  }
 0x17f   : > { %2727 = vsyncadd (%p2553_p8), %s2338_s4, 4294965248  ;;  %p14_p10 = scmp.ge.s32.totalorder %s2794_s12, 4   ;;  %s4059_s6 = smov %s2734_s7 }
 0x180   : > { %s4060_s7 = smov %s2738_s8  ;;  %s4061_s8 = smov %s2806_s15 }
 0x181   : > { %s4062_s9 = smov %s2794_s12  ;;  %16 = sbr.rel (!%p14_p10) target bundleno = 5 (0x5), region = 89 }
 0x186   :  { %2343 = vsyncpa [#allocation3], 1 }
 0x187   :  { %2345 = vsyncpa [#allocation3 + $0x1], 1 }
 0x188   :  { %2346 = vsyncpa [#allocation4], 1 }
 0x189   :  { %2348 = vsyncpa [#allocation4 + $0x1], 1 }

</bundles_post_ra>
